<compile_context>
chip_gen: v7x
topology: tpu7x:2x2x1
jax: 0.10.0
libtpu: 0.0.40
codegen_flags: <defaults>
</compile_context>

<pallas_src>
import functools

import jax
import jax.numpy as jnp
from jax import lax
from jax.experimental import pallas as pl
from jax.experimental.pallas import tpu as pltpu

K = 3  # conv kernel size ("same" padding = 1)


def _predictor_kernel(xp_ref, w_all_ref, bias_ref, w1_ref, b1_ref, w2_ref,
                      b2_ref, cmask_ref, out_ref,
                      a_scr, hpad_scr, c_scr,
                      *, B, T, H, W, hid, kxp):
    # Layouts (channels on sublanes, flattened spatial on lanes):
    #   xp_ref   : (T, B, kxp, HW)       bf16  im2col'd x patches (tap-major rows)
    #   w_all_ref: (4*hid, kxp+9*hid)    bf16  [Wx | Wh] cell conv, transposed
    #   bias_ref : (4*hid, 1)            f32
    #   w1_ref   : (hid, 9*hid)          bf16  decoder 3x3 conv, transposed
    #   b1_ref   : (hid, 1)              f32
    #   w2_ref   : (hid, 1)              f32   decoder 1x1 conv (hid -> 1)
    #   b2_ref   : (1, 1)                f32
    #   cmask_ref: (2, HW)               bf16  column masks for kw=0 / kw=2 taps
    #   out_ref  : (B, HW)               f32   sigmoid output (lane-dense)
    #   a_scr    : (B, kxp+9*hid, HW)    bf16  stacked matmul operand per batch
    #   hpad_scr : (B, hid, (H+2)*W+2)   bf16  h with zero guard rows, flattened
    #   c_scr    : (B, hid, HW)          f32   cell state
    HW = H * W
    off_h = kxp  # first row of the h-tap block inside a_scr

    # One-time init: taps of h_0 == 0, zero-padded im2col rows stay zero, the
    # guard lanes of the padded h buffer stay zero, c_0 == 0.
    a_scr[...] = jnp.zeros_like(a_scr)
    hpad_scr[...] = jnp.zeros_like(hpad_scr)
    c_scr[...] = jnp.zeros_like(c_scr)

    mask_l = cmask_ref[0:1, :]   # zero where x == 0      (kw == 0 taps)
    mask_r = cmask_ref[1:2, :]   # zero where x == W - 1  (kw == 2 taps)

    def build_taps(b, h_bf):
        """Store h (bf16, (hid, HW)) and scatter its 9 shifted conv taps
        into a_scr's h-rows for the NEXT matmul (and the decoder)."""
        hpad_scr[b, :, W + 1:W + 1 + HW] = h_bf
        for kh in range(K):
            for kw in range(K):
                tap = hpad_scr[b, :, kh * W + kw:kh * W + kw + HW]
                if kw == 0:
                    tap = tap * mask_l
                elif kw == 2:
                    tap = tap * mask_r
                r0 = off_h + (kh * K + kw) * hid
                a_scr[b, r0:r0 + hid, :] = tap

    def step(t, carry):
        xp_t = xp_ref[t]                                    # (B, kxp, HW) bf16
        for b in range(B):                                  # unrolled batch
            a_scr[b, 0:kxp, :] = xp_t[b]
            # fused cell conv: single (4h, kxp+9h) @ (kxp+9h, HW) MXU pass
            z = jnp.dot(w_all_ref[...], a_scr[b],
                        preferred_element_type=jnp.float32)  # (4*hid, HW) f32
            z = z + bias_ref[...]
            # gate order matches torch .chunk(4, 1): i, f, o, g
            # sigmoid(z) = 0.5 * tanh(0.5 z) + 0.5 -> one EUP push for i|f|o
            s = 0.5 * jnp.tanh(0.5 * z[0:3 * hid, :]) + 0.5
            gi = s[0:hid, :]
            gf = s[hid:2 * hid, :]
            go = s[2 * hid:3 * hid, :]
            gg = jnp.tanh(z[3 * hid:4 * hid, :])
            c_new = gf * c_scr[b] + gi * gg
            h_new = go * jnp.tanh(c_new)
            c_scr[b] = c_new
            build_taps(b, h_new.astype(jnp.bfloat16))
        return carry

    lax.fori_loop(0, T, step, 0)

    # Fused decoder on the final hidden state (its taps already sit in a_scr).
    for b in range(B):
        d1 = jnp.dot(w1_ref[...], a_scr[b, off_h:, :],
                     preferred_element_type=jnp.float32)     # (hid, HW)
        d1 = jnp.maximum(d1 + b1_ref[...], 0.0)
        d2 = jnp.sum(d1 * w2_ref[...], axis=0, keepdims=True) + b2_ref[...]
        out_ref[b:b + 1, :] = 0.5 * jnp.tanh(0.5 * d2) + 0.5


def predictor_forward(x_btchw, wx, wh, bias, w1, b1, w2, b2):
    """x: (B, T, C, H, W) f32.  Returns the Predictor output (B, 1, H, W)."""
    B, T, C, H, W = x_btchw.shape
    hid = wh.shape[2]
    HW = H * W
    KX = K * K * C
    KXP = -(-KX // 16) * 16          # pad im2col rows to the bf16 sublane tile
    KA = KXP + K * K * hid

    # ---- x-side im2col in the wrapper (layout plumbing only) --------------
    # rows: (kh, kw, c) tap-major; lanes: flattened (y, x) spatial.
    x_tbhwc = jnp.transpose(x_btchw, (1, 0, 3, 4, 2)).astype(jnp.float32)
    x_p = jnp.pad(x_tbhwc, ((0, 0), (0, 0), (1, 1), (1, 1), (0, 0)))
    taps = jnp.stack([x_p[:, :, kh:kh + H, kw:kw + W, :]
                      for kh in range(K) for kw in range(K)],
                     axis=2)                                  # (T,B,9,H,W,C)
    patches = jnp.transpose(taps, (0, 1, 2, 5, 3, 4)).reshape(T, B, KX, HW)
    patches = jnp.pad(patches, ((0, 0), (0, 0), (0, KXP - KX), (0, 0)))
    patches = patches.astype(jnp.bfloat16)

    # ---- pack weights: transposed, out-channels on sublanes ---------------
    wx_t = jnp.pad(wx.reshape(KX, 4 * hid).T, ((0, 0), (0, KXP - KX)))
    wh_t = wh.reshape(K * K * hid, 4 * hid).T
    w_all = jnp.concatenate([wx_t, wh_t], axis=1).astype(jnp.bfloat16)  # (4h,KA)
    bias_c = bias.reshape(4 * hid, 1).astype(jnp.float32)
    w1_t = w1.reshape(K * K * hid, hid).T.astype(jnp.bfloat16)          # (h,9h)
    b1_c = b1.reshape(hid, 1).astype(jnp.float32)
    w2_c = w2.reshape(hid, 1).astype(jnp.float32)
    b2_c = jnp.asarray(b2, jnp.float32).reshape(1, 1)

    # column masks for the kw=0 / kw=2 taps of the recurrent conv
    xcol = jnp.arange(HW, dtype=jnp.int32) % W
    cmask = jnp.stack([(xcol != 0), (xcol != W - 1)]).astype(jnp.bfloat16)

    kernel = functools.partial(_predictor_kernel, B=B, T=T, H=H, W=W,
                               hid=hid, kxp=KXP)

    out_flat = pl.pallas_call(
        kernel,
        out_shape=jax.ShapeDtypeStruct((B, HW), jnp.float32),
        scratch_shapes=[
            pltpu.VMEM((B, KA, HW), jnp.bfloat16),               # stacked operand
            pltpu.VMEM((B, hid, (H + 2) * W + 2), jnp.bfloat16),  # guarded h
            pltpu.VMEM((B, hid, HW), jnp.float32),               # cell state
        ],
    )(patches, w_all, bias_c, w1_t, b1_c, w2_c, b2_c, cmask)

    return out_flat.reshape(B, H, W)[:, None, :, :]


def ref_predictor(x_btchw, wx, wh, bias, w1, b1, w2, b2):
    """Pure-JAX f32 reference mirroring the PyTorch Predictor forward."""
    B, T, C, H, W = x_btchw.shape
    hid = wh.shape[2]
    w_full = jnp.concatenate([wx, wh], axis=2)                 # (3,3,C+hid,4h)
    x_nhwc = jnp.transpose(x_btchw, (0, 1, 3, 4, 2))
    h = jnp.zeros((B, H, W, hid), jnp.float32)
    c = jnp.zeros((B, H, W, hid), jnp.float32)
    for t in range(T):
        inp = jnp.concatenate([x_nhwc[:, t], h], axis=-1)
        g = lax.conv_general_dilated(
            inp, w_full, window_strides=(1, 1), padding="SAME",
            dimension_numbers=("NHWC", "HWIO", "NHWC")) + bias
        gi, gf, go, gg = jnp.split(g, 4, axis=-1)
        c = jax.nn.sigmoid(gf) * c + jax.nn.sigmoid(gi) * jnp.tanh(gg)
        h = jax.nn.sigmoid(go) * jnp.tanh(c)
    d = lax.conv_general_dilated(
        h, w1, window_strides=(1, 1), padding="SAME",
        dimension_numbers=("NHWC", "HWIO", "NHWC")) + b1
    d = jnp.maximum(d, 0.0)
    y = jax.nn.sigmoid(jnp.einsum("bhwc,c->bhw", d, w2) + b2)
    return y[:, None, :, :]


if __name__ == "__main__":
    B, T, C, H, W, hid = 2, 8, 1, 16, 16, 32

    key = jax.random.PRNGKey(0)
    kx, k1, k2, k3, k4, k5, k6 = jax.random.split(key, 7)
    x = jax.random.normal(kx, (B, T, C, H, W), jnp.float32)
    # synthetic params; conv weights in HWIO layout, gate order i, f, o, g
    w_full = jax.random.normal(k1, (K, K, C + hid, 4 * hid), jnp.float32) * 0.05
    bias = jax.random.normal(k2, (4 * hid,), jnp.float32) * 0.05
    wx, wh = w_full[:, :, :C, :], w_full[:, :, C:, :]
    w1 = jax.random.normal(k3, (K, K, hid, hid), jnp.float32) * 0.05
    b1 = jax.random.normal(k4, (hid,), jnp.float32) * 0.05
    w2 = jax.random.normal(k5, (hid,), jnp.float32) * 0.3
    b2 = jax.random.normal(k6, (), jnp.float32) * 0.1

    out = jax.block_until_ready(
        predictor_forward(x, wx, wh, bias, w1, b1, w2, b2))
    assert out.shape == (B, 1, H, W), out.shape

    ref = ref_predictor(x, wx, wh, bias, w1, b1, w2, b2)
    err = float(jnp.max(jnp.abs(out - ref)))
    # bf16 MXU operands / bf16 recurrent h -> a few 1e-3 of abs error expected
    assert err < 2e-2, err

    print("KERNEL_OK")
</pallas_src>

<mosaic_0001>
module attributes {stable_mosaic.version = 11 : i64} {
  func.func @_predictor_kernel(%arg0: memref<8x2x16x256xbf16, #tpu.memory_space<vmem>>, %arg1: memref<128x304xbf16, #tpu.memory_space<vmem>>, %arg2: memref<128x1xf32, #tpu.memory_space<vmem>>, %arg3: memref<32x288xbf16, #tpu.memory_space<vmem>>, %arg4: memref<32x1xf32, #tpu.memory_space<vmem>>, %arg5: memref<32x1xf32, #tpu.memory_space<vmem>>, %arg6: memref<1x1xf32, #tpu.memory_space<vmem>>, %arg7: memref<2x256xbf16, #tpu.memory_space<vmem>>, %arg8: memref<2x256xf32, #tpu.memory_space<vmem>>, %arg9: memref<2x304x256xbf16, #tpu.memory_space<vmem>>, %arg10: memref<2x32x290xbf16, #tpu.memory_space<vmem>>, %arg11: memref<2x32x256xf32, #tpu.memory_space<vmem>>) attributes {dimension_semantics = [], scalar_prefetch = 0 : i64, scratch_operands = 3 : i64, tpu.core_type = #tpu.core_type<tc>} {
    %cst = arith.constant 0.000000e+00 : bf16
    %0 = vector.broadcast %cst : bf16 to vector<2x304x256xbf16>
    %c0 = arith.constant 0 : index
    %c0_0 = arith.constant 0 : index
    %c0_1 = arith.constant 0 : index
    %1 = vector.load %arg9[%c0, %c0_0, %c0_1] : memref<2x304x256xbf16, #tpu.memory_space<vmem>>, vector<2x304x256xbf16>
    tpu.vector_store %arg9[%c0, %c0_0, %c0_1], %0 {strides = array<i32>} : memref<2x304x256xbf16, #tpu.memory_space<vmem>>, vector<2x304x256xbf16>,
    %cst_2 = arith.constant 0.000000e+00 : bf16
    %2 = vector.broadcast %cst_2 : bf16 to vector<2x32x290xbf16>
    %c0_3 = arith.constant 0 : index
    %c0_4 = arith.constant 0 : index
    %c0_5 = arith.constant 0 : index
    %3 = vector.load %arg10[%c0_3, %c0_4, %c0_5] : memref<2x32x290xbf16, #tpu.memory_space<vmem>>, vector<2x32x290xbf16>
    tpu.vector_store %arg10[%c0_3, %c0_4, %c0_5], %2 {strides = array<i32>} : memref<2x32x290xbf16, #tpu.memory_space<vmem>>, vector<2x32x290xbf16>,
    %cst_6 = arith.constant 0.000000e+00 : f32
    %4 = vector.broadcast %cst_6 : f32 to vector<2x32x256xf32>
    %c0_7 = arith.constant 0 : index
    %c0_8 = arith.constant 0 : index
    %c0_9 = arith.constant 0 : index
    %5 = vector.load %arg11[%c0_7, %c0_8, %c0_9] : memref<2x32x256xf32, #tpu.memory_space<vmem>>, vector<2x32x256xf32>
    tpu.vector_store %arg11[%c0_7, %c0_8, %c0_9], %4 {strides = array<i32>} : memref<2x32x256xf32, #tpu.memory_space<vmem>>, vector<2x32x256xf32>,
    %c0_10 = arith.constant 0 : index
    %c0_11 = arith.constant 0 : index
    %6 = vector.load %arg7[%c0_10, %c0_11] : memref<2x256xbf16, #tpu.memory_space<vmem>>, vector<1x256xbf16>
    %c1 = arith.constant 1 : index
    %c0_12 = arith.constant 0 : index
    %7 = vector.load %arg7[%c1, %c0_12] : memref<2x256xbf16, #tpu.memory_space<vmem>>, vector<1x256xbf16>
    %c0_i32 = arith.constant 0 : i32
    %c8_i32 = arith.constant 8 : i32
    %8 = arith.addi %c0_i32, %c8_i32 : i32
    %c1_i32 = arith.constant 1 : i32
    scf.for %arg12 = %c0_i32 to %8 step %c1_i32  : i32 {
      %59 = arith.index_cast %arg12 : i32 to index
      %c0_51 = arith.constant 0 : index
      %c0_52 = arith.constant 0 : index
      %c0_53 = arith.constant 0 : index
      %60 = vector.load %arg0[%59, %c0_51, %c0_52, %c0_53] : memref<8x2x16x256xbf16, #tpu.memory_space<vmem>>, vector<1x2x16x256xbf16>
      %61 = vector.shape_cast %60 : vector<1x2x16x256xbf16> to vector<2x16x256xbf16>
      %62 = vector.extract_strided_slice %61 {offsets = [0, 0, 0], sizes = [1, 16, 256], strides = [1, 1, 1]} : vector<2x16x256xbf16> to vector<1x16x256xbf16>
      %63 = vector.shape_cast %62 : vector<1x16x256xbf16> to vector<16x256xbf16>
      %c0_54 = arith.constant 0 : index
      %c0_55 = arith.constant 0 : index
      %c0_56 = arith.constant 0 : index
      %64 = vector.load %arg9[%c0_54, %c0_55, %c0_56] : memref<2x304x256xbf16, #tpu.memory_space<vmem>>, vector<1x16x256xbf16>
      %65 = vector.shape_cast %64 : vector<1x16x256xbf16> to vector<16x256xbf16>
      %66 = vector.shape_cast %63 : vector<16x256xbf16> to vector<1x16x256xbf16>
      tpu.vector_store %arg9[%c0_54, %c0_55, %c0_56], %66 {strides = array<i32>} : memref<2x304x256xbf16, #tpu.memory_space<vmem>>, vector<1x16x256xbf16>,
      %c0_57 = arith.constant 0 : index
      %c0_58 = arith.constant 0 : index
      %67 = vector.load %arg1[%c0_57, %c0_58] : memref<128x304xbf16, #tpu.memory_space<vmem>>, vector<128x304xbf16>
      %c0_59 = arith.constant 0 : index
      %c0_60 = arith.constant 0 : index
      %c0_61 = arith.constant 0 : index
      %68 = vector.load %arg9[%c0_59, %c0_60, %c0_61] : memref<2x304x256xbf16, #tpu.memory_space<vmem>>, vector<1x304x256xbf16>
      %69 = vector.shape_cast %68 : vector<1x304x256xbf16> to vector<304x256xbf16>
      %cst_62 = arith.constant dense<0.000000e+00> : vector<128x256xf32>
      %70 = tpu.matmul %67, %69, %cst_62 {dimension_numbers = #tpu.dot_dimension_numbers<[1], [0], [0], [1], [0, 0, 1, 1], [], []>} : vector<128x304xbf16>, vector<304x256xbf16>, vector<128x256xf32> -> vector<128x256xf32>
      %c0_63 = arith.constant 0 : index
      %c0_64 = arith.constant 0 : index
      %71 = vector.load %arg2[%c0_63, %c0_64] : memref<128x1xf32, #tpu.memory_space<vmem>>, vector<128x1xf32>
      %72 = vector.broadcast %71 : vector<128x1xf32> to vector<128x256xf32>
      %73 = arith.addf %70, %72 : vector<128x256xf32>
      %74 = vector.extract_strided_slice %73 {offsets = [0, 0], sizes = [96, 256], strides = [1, 1]} : vector<128x256xf32> to vector<96x256xf32>
      %cst_65 = arith.constant 5.000000e-01 : f32
      %75 = vector.broadcast %cst_65 : f32 to vector<96x256xf32>
      %76 = arith.mulf %75, %74 : vector<96x256xf32>
      %77 = math.tanh %76 : vector<96x256xf32>
      %cst_66 = arith.constant 5.000000e-01 : f32
      %78 = vector.broadcast %cst_66 : f32 to vector<96x256xf32>
      %79 = arith.mulf %78, %77 : vector<96x256xf32>
      %cst_67 = arith.constant 5.000000e-01 : f32
      %80 = vector.broadcast %cst_67 : f32 to vector<96x256xf32>
      %81 = arith.addf %79, %80 : vector<96x256xf32>
      %82 = vector.extract_strided_slice %81 {offsets = [0, 0], sizes = [32, 256], strides = [1, 1]} : vector<96x256xf32> to vector<32x256xf32>
      %83 = vector.extract_strided_slice %81 {offsets = [32, 0], sizes = [32, 256], strides = [1, 1]} : vector<96x256xf32> to vector<32x256xf32>
      %84 = vector.extract_strided_slice %81 {offsets = [64, 0], sizes = [32, 256], strides = [1, 1]} : vector<96x256xf32> to vector<32x256xf32>
      %85 = vector.extract_strided_slice %73 {offsets = [96, 0], sizes = [32, 256], strides = [1, 1]} : vector<128x256xf32> to vector<32x256xf32>
      %86 = math.tanh %85 : vector<32x256xf32>
      %c0_68 = arith.constant 0 : index
      %c0_69 = arith.constant 0 : index
      %c0_70 = arith.constant 0 : index
      %87 = vector.load %arg11[%c0_68, %c0_69, %c0_70] : memref<2x32x256xf32, #tpu.memory_space<vmem>>, vector<1x32x256xf32>
      %88 = vector.shape_cast %87 : vector<1x32x256xf32> to vector<32x256xf32>
      %89 = arith.mulf %83, %88 : vector<32x256xf32>
      %90 = arith.mulf %82, %86 : vector<32x256xf32>
      %91 = arith.addf %89, %90 : vector<32x256xf32>
      %92 = math.tanh %91 : vector<32x256xf32>
      %93 = arith.mulf %84, %92 : vector<32x256xf32>
      %c0_71 = arith.constant 0 : index
      %c0_72 = arith.constant 0 : index
      %c0_73 = arith.constant 0 : index
      %94 = vector.load %arg11[%c0_71, %c0_72, %c0_73] : memref<2x32x256xf32, #tpu.memory_space<vmem>>, vector<1x32x256xf32>
      %95 = vector.shape_cast %94 : vector<1x32x256xf32> to vector<32x256xf32>
      %96 = vector.shape_cast %91 : vector<32x256xf32> to vector<1x32x256xf32>
      tpu.vector_store %arg11[%c0_71, %c0_72, %c0_73], %96 {strides = array<i32>} : memref<2x32x256xf32, #tpu.memory_space<vmem>>, vector<1x32x256xf32>,
      %97 = arith.truncf %93 : vector<32x256xf32> to vector<32x256xbf16>
      %c0_74 = arith.constant 0 : index
      %c0_75 = arith.constant 0 : index
      %c17 = arith.constant 17 : index
      %98 = vector.load %arg10[%c0_74, %c0_75, %c17] : memref<2x32x290xbf16, #tpu.memory_space<vmem>>, vector<1x32x256xbf16>
      %99 = vector.shape_cast %98 : vector<1x32x256xbf16> to vector<32x256xbf16>
      %100 = vector.shape_cast %97 : vector<32x256xbf16> to vector<1x32x256xbf16>
      tpu.vector_store %arg10[%c0_74, %c0_75, %c17], %100 {strides = array<i32>} : memref<2x32x290xbf16, #tpu.memory_space<vmem>>, vector<1x32x256xbf16>,
      %c0_76 = arith.constant 0 : index
      %c0_77 = arith.constant 0 : index
      %c0_78 = arith.constant 0 : index
      %101 = vector.load %arg10[%c0_76, %c0_77, %c0_78] : memref<2x32x290xbf16, #tpu.memory_space<vmem>>, vector<1x32x256xbf16>
      %102 = vector.shape_cast %101 : vector<1x32x256xbf16> to vector<32x256xbf16>
      %103 = vector.broadcast %6 : vector<1x256xbf16> to vector<32x256xbf16>
      %104 = arith.mulf %102, %103 : vector<32x256xbf16>
      %c0_79 = arith.constant 0 : index
      %c16_80 = arith.constant 16 : index
      %c0_81 = arith.constant 0 : index
      %105 = vector.load %arg9[%c0_79, %c16_80, %c0_81] : memref<2x304x256xbf16, #tpu.memory_space<vmem>>, vector<1x32x256xbf16>
      %106 = vector.shape_cast %105 : vector<1x32x256xbf16> to vector<32x256xbf16>
      %107 = vector.shape_cast %104 : vector<32x256xbf16> to vector<1x32x256xbf16>
      tpu.vector_store %arg9[%c0_79, %c16_80, %c0_81], %107 {strides = array<i32>} : memref<2x304x256xbf16, #tpu.memory_space<vmem>>, vector<1x32x256xbf16>,
      %c0_82 = arith.constant 0 : index
      %c0_83 = arith.constant 0 : index
      %c1_84 = arith.constant 1 : index
      %108 = vector.load %arg10[%c0_82, %c0_83, %c1_84] : memref<2x32x290xbf16, #tpu.memory_space<vmem>>, vector<1x32x256xbf16>
      %109 = vector.shape_cast %108 : vector<1x32x256xbf16> to vector<32x256xbf16>
      %c0_85 = arith.constant 0 : index
      %c48 = arith.constant 48 : index
      %c0_86 = arith.constant 0 : index
      %110 = vector.load %arg9[%c0_85, %c48, %c0_86] : memref<2x304x256xbf16, #tpu.memory_space<vmem>>, vector<1x32x256xbf16>
      %111 = vector.shape_cast %110 : vector<1x32x256xbf16> to vector<32x256xbf16>
      %112 = vector.shape_cast %109 : vector<32x256xbf16> to vector<1x32x256xbf16>
      tpu.vector_store %arg9[%c0_85, %c48, %c0_86], %112 {strides = array<i32>} : memref<2x304x256xbf16, #tpu.memory_space<vmem>>, vector<1x32x256xbf16>,
      %c0_87 = arith.constant 0 : index
      %c0_88 = arith.constant 0 : index
      %c2 = arith.constant 2 : index
      %113 = vector.load %arg10[%c0_87, %c0_88, %c2] : memref<2x32x290xbf16, #tpu.memory_space<vmem>>, vector<1x32x256xbf16>
      %114 = vector.shape_cast %113 : vector<1x32x256xbf16> to vector<32x256xbf16>
      %115 = vector.broadcast %7 : vector<1x256xbf16> to vector<32x256xbf16>
      %116 = arith.mulf %114, %115 : vector<32x256xbf16>
      %c0_89 = arith.constant 0 : index
      %c80 = arith.constant 80 : index
      %c0_90 = arith.constant 0 : index
      %117 = vector.load %arg9[%c0_89, %c80, %c0_90] : memref<2x304x256xbf16, #tpu.memory_space<vmem>>, vector<1x32x256xbf16>
      %118 = vector.shape_cast %117 : vector<1x32x256xbf16> to vector<32x256xbf16>
      %119 = vector.shape_cast %116 : vector<32x256xbf16> to vector<1x32x256xbf16>
      tpu.vector_store %arg9[%c0_89, %c80, %c0_90], %119 {strides = array<i32>} : memref<2x304x256xbf16, #tpu.memory_space<vmem>>, vector<1x32x256xbf16>,
      %c0_91 = arith.constant 0 : index
      %c0_92 = arith.constant 0 : index
      %c16_93 = arith.constant 16 : index
      %120 = vector.load %arg10[%c0_91, %c0_92, %c16_93] : memref<2x32x290xbf16, #tpu.memory_space<vmem>>, vector<1x32x256xbf16>
      %121 = vector.shape_cast %120 : vector<1x32x256xbf16> to vector<32x256xbf16>
      %122 = vector.broadcast %6 : vector<1x256xbf16> to vector<32x256xbf16>
      %123 = arith.mulf %121, %122 : vector<32x256xbf16>
      %c0_94 = arith.constant 0 : index
      %c112 = arith.constant 112 : index
      %c0_95 = arith.constant 0 : index
      %124 = vector.load %arg9[%c0_94, %c112, %c0_95] : memref<2x304x256xbf16, #tpu.memory_space<vmem>>, vector<1x32x256xbf16>
      %125 = vector.shape_cast %124 : vector<1x32x256xbf16> to vector<32x256xbf16>
      %126 = vector.shape_cast %123 : vector<32x256xbf16> to vector<1x32x256xbf16>
      tpu.vector_store %arg9[%c0_94, %c112, %c0_95], %126 {strides = array<i32>} : memref<2x304x256xbf16, #tpu.memory_space<vmem>>, vector<1x32x256xbf16>,
      %c0_96 = arith.constant 0 : index
      %c0_97 = arith.constant 0 : index
      %c17_98 = arith.constant 17 : index
      %127 = vector.load %arg10[%c0_96, %c0_97, %c17_98] : memref<2x32x290xbf16, #tpu.memory_space<vmem>>, vector<1x32x256xbf16>
      %128 = vector.shape_cast %127 : vector<1x32x256xbf16> to vector<32x256xbf16>
      %c0_99 = arith.constant 0 : index
      %c144 = arith.constant 144 : index
      %c0_100 = arith.constant 0 : index
      %129 = vector.load %arg9[%c0_99, %c144, %c0_100] : memref<2x304x256xbf16, #tpu.memory_space<vmem>>, vector<1x32x256xbf16>
      %130 = vector.shape_cast %129 : vector<1x32x256xbf16> to vector<32x256xbf16>
      %131 = vector.shape_cast %128 : vector<32x256xbf16> to vector<1x32x256xbf16>
      tpu.vector_store %arg9[%c0_99, %c144, %c0_100], %131 {strides = array<i32>} : memref<2x304x256xbf16, #tpu.memory_space<vmem>>, vector<1x32x256xbf16>,
      %c0_101 = arith.constant 0 : index
      %c0_102 = arith.constant 0 : index
      %c18 = arith.constant 18 : index
      %132 = vector.load %arg10[%c0_101, %c0_102, %c18] : memref<2x32x290xbf16, #tpu.memory_space<vmem>>, vector<1x32x256xbf16>
      %133 = vector.shape_cast %132 : vector<1x32x256xbf16> to vector<32x256xbf16>
      %134 = vector.broadcast %7 : vector<1x256xbf16> to vector<32x256xbf16>
      %135 = arith.mulf %133, %134 : vector<32x256xbf16>
      %c0_103 = arith.constant 0 : index
      %c176 = arith.constant 176 : index
      %c0_104 = arith.constant 0 : index
      %136 = vector.load %arg9[%c0_103, %c176, %c0_104] : memref<2x304x256xbf16, #tpu.memory_space<vmem>>, vector<1x32x256xbf16>
      %137 = vector.shape_cast %136 : vector<1x32x256xbf16> to vector<32x256xbf16>
      %138 = vector.shape_cast %135 : vector<32x256xbf16> to vector<1x32x256xbf16>
      tpu.vector_store %arg9[%c0_103, %c176, %c0_104], %138 {strides = array<i32>} : memref<2x304x256xbf16, #tpu.memory_space<vmem>>, vector<1x32x256xbf16>,
      %c0_105 = arith.constant 0 : index
      %c0_106 = arith.constant 0 : index
      %c32 = arith.constant 32 : index
      %139 = vector.load %arg10[%c0_105, %c0_106, %c32] : memref<2x32x290xbf16, #tpu.memory_space<vmem>>, vector<1x32x256xbf16>
      %140 = vector.shape_cast %139 : vector<1x32x256xbf16> to vector<32x256xbf16>
      %141 = vector.broadcast %6 : vector<1x256xbf16> to vector<32x256xbf16>
      %142 = arith.mulf %140, %141 : vector<32x256xbf16>
      %c0_107 = arith.constant 0 : index
      %c208 = arith.constant 208 : index
      %c0_108 = arith.constant 0 : index
      %143 = vector.load %arg9[%c0_107, %c208, %c0_108] : memref<2x304x256xbf16, #tpu.memory_space<vmem>>, vector<1x32x256xbf16>
      %144 = vector.shape_cast %143 : vector<1x32x256xbf16> to vector<32x256xbf16>
      %145 = vector.shape_cast %142 : vector<32x256xbf16> to vector<1x32x256xbf16>
      tpu.vector_store %arg9[%c0_107, %c208, %c0_108], %145 {strides = array<i32>} : memref<2x304x256xbf16, #tpu.memory_space<vmem>>, vector<1x32x256xbf16>,
      %c0_109 = arith.constant 0 : index
      %c0_110 = arith.constant 0 : index
      %c33 = arith.constant 33 : index
      %146 = vector.load %arg10[%c0_109, %c0_110, %c33] : memref<2x32x290xbf16, #tpu.memory_space<vmem>>, vector<1x32x256xbf16>
      %147 = vector.shape_cast %146 : vector<1x32x256xbf16> to vector<32x256xbf16>
      %c0_111 = arith.constant 0 : index
      %c240 = arith.constant 240 : index
      %c0_112 = arith.constant 0 : index
      %148 = vector.load %arg9[%c0_111, %c240, %c0_112] : memref<2x304x256xbf16, #tpu.memory_space<vmem>>, vector<1x32x256xbf16>
      %149 = vector.shape_cast %148 : vector<1x32x256xbf16> to vector<32x256xbf16>
      %150 = vector.shape_cast %147 : vector<32x256xbf16> to vector<1x32x256xbf16>
      tpu.vector_store %arg9[%c0_111, %c240, %c0_112], %150 {strides = array<i32>} : memref<2x304x256xbf16, #tpu.memory_space<vmem>>, vector<1x32x256xbf16>,
      %c0_113 = arith.constant 0 : index
      %c0_114 = arith.constant 0 : index
      %c34 = arith.constant 34 : index
      %151 = vector.load %arg10[%c0_113, %c0_114, %c34] : memref<2x32x290xbf16, #tpu.memory_space<vmem>>, vector<1x32x256xbf16>
      %152 = vector.shape_cast %151 : vector<1x32x256xbf16> to vector<32x256xbf16>
      %153 = vector.broadcast %7 : vector<1x256xbf16> to vector<32x256xbf16>
      %154 = arith.mulf %152, %153 : vector<32x256xbf16>
      %c0_115 = arith.constant 0 : index
      %c272 = arith.constant 272 : index
      %c0_116 = arith.constant 0 : index
      %155 = vector.load %arg9[%c0_115, %c272, %c0_116] : memref<2x304x256xbf16, #tpu.memory_space<vmem>>, vector<1x32x256xbf16>
      %156 = vector.shape_cast %155 : vector<1x32x256xbf16> to vector<32x256xbf16>
      %157 = vector.shape_cast %154 : vector<32x256xbf16> to vector<1x32x256xbf16>
      tpu.vector_store %arg9[%c0_115, %c272, %c0_116], %157 {strides = array<i32>} : memref<2x304x256xbf16, #tpu.memory_space<vmem>>, vector<1x32x256xbf16>,
      %158 = vector.extract_strided_slice %61 {offsets = [1, 0, 0], sizes = [1, 16, 256], strides = [1, 1, 1]} : vector<2x16x256xbf16> to vector<1x16x256xbf16>
      %159 = vector.shape_cast %158 : vector<1x16x256xbf16> to vector<16x256xbf16>
      %c1_117 = arith.constant 1 : index
      %c0_118 = arith.constant 0 : index
      %c0_119 = arith.constant 0 : index
      %160 = vector.load %arg9[%c1_117, %c0_118, %c0_119] : memref<2x304x256xbf16, #tpu.memory_space<vmem>>, vector<1x16x256xbf16>
      %161 = vector.shape_cast %160 : vector<1x16x256xbf16> to vector<16x256xbf16>
      %162 = vector.shape_cast %159 : vector<16x256xbf16> to vector<1x16x256xbf16>
      tpu.vector_store %arg9[%c1_117, %c0_118, %c0_119], %162 {strides = array<i32>} : memref<2x304x256xbf16, #tpu.memory_space<vmem>>, vector<1x16x256xbf16>,
      %c0_120 = arith.constant 0 : index
      %c0_121 = arith.constant 0 : index
      %163 = vector.load %arg1[%c0_120, %c0_121] : memref<128x304xbf16, #tpu.memory_space<vmem>>, vector<128x304xbf16>
      %c1_122 = arith.constant 1 : index
      %c0_123 = arith.constant 0 : index
      %c0_124 = arith.constant 0 : index
      %164 = vector.load %arg9[%c1_122, %c0_123, %c0_124] : memref<2x304x256xbf16, #tpu.memory_space<vmem>>, vector<1x304x256xbf16>
      %165 = vector.shape_cast %164 : vector<1x304x256xbf16> to vector<304x256xbf16>
      %cst_125 = arith.constant dense<0.000000e+00> : vector<128x256xf32>
      %166 = tpu.matmul %163, %165, %cst_125 {dimension_numbers = #tpu.dot_dimension_numbers<[1], [0], [0], [1], [0, 0, 1, 1], [], []>} : vector<128x304xbf16>, vector<304x256xbf16>, vector<128x256xf32> -> vector<128x256xf32>
      %c0_126 = arith.constant 0 : index
      %c0_127 = arith.constant 0 : index
      %167 = vector.load %arg2[%c0_126, %c0_127] : memref<128x1xf32, #tpu.memory_space<vmem>>, vector<128x1xf32>
      %168 = vector.broadcast %167 : vector<128x1xf32> to vector<128x256xf32>
      %169 = arith.addf %166, %168 : vector<128x256xf32>
      %170 = vector.extract_strided_slice %169 {offsets = [0, 0], sizes = [96, 256], strides = [1, 1]} : vector<128x256xf32> to vector<96x256xf32>
      %cst_128 = arith.constant 5.000000e-01 : f32
      %171 = vector.broadcast %cst_128 : f32 to vector<96x256xf32>
      %172 = arith.mulf %171, %170 : vector<96x256xf32>
      %173 = math.tanh %172 : vector<96x256xf32>
      %cst_129 = arith.constant 5.000000e-01 : f32
      %174 = vector.broadcast %cst_129 : f32 to vector<96x256xf32>
      %175 = arith.mulf %174, %173 : vector<96x256xf32>
      %cst_130 = arith.constant 5.000000e-01 : f32
      %176 = vector.broadcast %cst_130 : f32 to vector<96x256xf32>
      %177 = arith.addf %175, %176 : vector<96x256xf32>
      %178 = vector.extract_strided_slice %177 {offsets = [0, 0], sizes = [32, 256], strides = [1, 1]} : vector<96x256xf32> to vector<32x256xf32>
      %179 = vector.extract_strided_slice %177 {offsets = [32, 0], sizes = [32, 256], strides = [1, 1]} : vector<96x256xf32> to vector<32x256xf32>
      %180 = vector.extract_strided_slice %177 {offsets = [64, 0], sizes = [32, 256], strides = [1, 1]} : vector<96x256xf32> to vector<32x256xf32>
      %181 = vector.extract_strided_slice %169 {offsets = [96, 0], sizes = [32, 256], strides = [1, 1]} : vector<128x256xf32> to vector<32x256xf32>
      %182 = math.tanh %181 : vector<32x256xf32>
      %c1_131 = arith.constant 1 : index
      %c0_132 = arith.constant 0 : index
      %c0_133 = arith.constant 0 : index
      %183 = vector.load %arg11[%c1_131, %c0_132, %c0_133] : memref<2x32x256xf32, #tpu.memory_space<vmem>>, vector<1x32x256xf32>
      %184 = vector.shape_cast %183 : vector<1x32x256xf32> to vector<32x256xf32>
      %185 = arith.mulf %179, %184 : vector<32x256xf32>
      %186 = arith.mulf %178, %182 : vector<32x256xf32>
      %187 = arith.addf %185, %186 : vector<32x256xf32>
      %188 = math.tanh %187 : vector<32x256xf32>
      %189 = arith.mulf %180, %188 : vector<32x256xf32>
      %c1_134 = arith.constant 1 : index
      %c0_135 = arith.constant 0 : index
      %c0_136 = arith.constant 0 : index
      %190 = vector.load %arg11[%c1_134, %c0_135, %c0_136] : memref<2x32x256xf32, #tpu.memory_space<vmem>>, vector<1x32x256xf32>
      %191 = vector.shape_cast %190 : vector<1x32x256xf32> to vector<32x256xf32>
      %192 = vector.shape_cast %187 : vector<32x256xf32> to vector<1x32x256xf32>
      tpu.vector_store %arg11[%c1_134, %c0_135, %c0_136], %192 {strides = array<i32>} : memref<2x32x256xf32, #tpu.memory_space<vmem>>, vector<1x32x256xf32>,
      %193 = arith.truncf %189 : vector<32x256xf32> to vector<32x256xbf16>
      %c1_137 = arith.constant 1 : index
      %c0_138 = arith.constant 0 : index
      %c17_139 = arith.constant 17 : index
      %194 = vector.load %arg10[%c1_137, %c0_138, %c17_139] : memref<2x32x290xbf16, #tpu.memory_space<vmem>>, vector<1x32x256xbf16>
      %195 = vector.shape_cast %194 : vector<1x32x256xbf16> to vector<32x256xbf16>
      %196 = vector.shape_cast %193 : vector<32x256xbf16> to vector<1x32x256xbf16>
      tpu.vector_store %arg10[%c1_137, %c0_138, %c17_139], %196 {strides = array<i32>} : memref<2x32x290xbf16, #tpu.memory_space<vmem>>, vector<1x32x256xbf16>,
      %c1_140 = arith.constant 1 : index
      %c0_141 = arith.constant 0 : index
      %c0_142 = arith.constant 0 : index
      %197 = vector.load %arg10[%c1_140, %c0_141, %c0_142] : memref<2x32x290xbf16, #tpu.memory_space<vmem>>, vector<1x32x256xbf16>
      %198 = vector.shape_cast %197 : vector<1x32x256xbf16> to vector<32x256xbf16>
      %199 = vector.broadcast %6 : vector<1x256xbf16> to vector<32x256xbf16>
      %200 = arith.mulf %198, %199 : vector<32x256xbf16>
      %c1_143 = arith.constant 1 : index
      %c16_144 = arith.constant 16 : index
      %c0_145 = arith.constant 0 : index
      %201 = vector.load %arg9[%c1_143, %c16_144, %c0_145] : memref<2x304x256xbf16, #tpu.memory_space<vmem>>, vector<1x32x256xbf16>
      %202 = vector.shape_cast %201 : vector<1x32x256xbf16> to vector<32x256xbf16>
      %203 = vector.shape_cast %200 : vector<32x256xbf16> to vector<1x32x256xbf16>
      tpu.vector_store %arg9[%c1_143, %c16_144, %c0_145], %203 {strides = array<i32>} : memref<2x304x256xbf16, #tpu.memory_space<vmem>>, vector<1x32x256xbf16>,
      %c1_146 = arith.constant 1 : index
      %c0_147 = arith.constant 0 : index
      %c1_148 = arith.constant 1 : index
      %204 = vector.load %arg10[%c1_146, %c0_147, %c1_148] : memref<2x32x290xbf16, #tpu.memory_space<vmem>>, vector<1x32x256xbf16>
      %205 = vector.shape_cast %204 : vector<1x32x256xbf16> to vector<32x256xbf16>
      %c1_149 = arith.constant 1 : index
      %c48_150 = arith.constant 48 : index
      %c0_151 = arith.constant 0 : index
      %206 = vector.load %arg9[%c1_149, %c48_150, %c0_151] : memref<2x304x256xbf16, #tpu.memory_space<vmem>>, vector<1x32x256xbf16>
      %207 = vector.shape_cast %206 : vector<1x32x256xbf16> to vector<32x256xbf16>
      %208 = vector.shape_cast %205 : vector<32x256xbf16> to vector<1x32x256xbf16>
      tpu.vector_store %arg9[%c1_149, %c48_150, %c0_151], %208 {strides = array<i32>} : memref<2x304x256xbf16, #tpu.memory_space<vmem>>, vector<1x32x256xbf16>,
      %c1_152 = arith.constant 1 : index
      %c0_153 = arith.constant 0 : index
      %c2_154 = arith.constant 2 : index
      %209 = vector.load %arg10[%c1_152, %c0_153, %c2_154] : memref<2x32x290xbf16, #tpu.memory_space<vmem>>, vector<1x32x256xbf16>
      %210 = vector.shape_cast %209 : vector<1x32x256xbf16> to vector<32x256xbf16>
      %211 = vector.broadcast %7 : vector<1x256xbf16> to vector<32x256xbf16>
      %212 = arith.mulf %210, %211 : vector<32x256xbf16>
      %c1_155 = arith.constant 1 : index
      %c80_156 = arith.constant 80 : index
      %c0_157 = arith.constant 0 : index
      %213 = vector.load %arg9[%c1_155, %c80_156, %c0_157] : memref<2x304x256xbf16, #tpu.memory_space<vmem>>, vector<1x32x256xbf16>
      %214 = vector.shape_cast %213 : vector<1x32x256xbf16> to vector<32x256xbf16>
      %215 = vector.shape_cast %212 : vector<32x256xbf16> to vector<1x32x256xbf16>
      tpu.vector_store %arg9[%c1_155, %c80_156, %c0_157], %215 {strides = array<i32>} : memref<2x304x256xbf16, #tpu.memory_space<vmem>>, vector<1x32x256xbf16>,
      %c1_158 = arith.constant 1 : index
      %c0_159 = arith.constant 0 : index
      %c16_160 = arith.constant 16 : index
      %216 = vector.load %arg10[%c1_158, %c0_159, %c16_160] : memref<2x32x290xbf16, #tpu.memory_space<vmem>>, vector<1x32x256xbf16>
      %217 = vector.shape_cast %216 : vector<1x32x256xbf16> to vector<32x256xbf16>
      %218 = vector.broadcast %6 : vector<1x256xbf16> to vector<32x256xbf16>
      %219 = arith.mulf %217, %218 : vector<32x256xbf16>
      %c1_161 = arith.constant 1 : index
      %c112_162 = arith.constant 112 : index
      %c0_163 = arith.constant 0 : index
      %220 = vector.load %arg9[%c1_161, %c112_162, %c0_163] : memref<2x304x256xbf16, #tpu.memory_space<vmem>>, vector<1x32x256xbf16>
      %221 = vector.shape_cast %220 : vector<1x32x256xbf16> to vector<32x256xbf16>
      %222 = vector.shape_cast %219 : vector<32x256xbf16> to vector<1x32x256xbf16>
      tpu.vector_store %arg9[%c1_161, %c112_162, %c0_163], %222 {strides = array<i32>} : memref<2x304x256xbf16, #tpu.memory_space<vmem>>, vector<1x32x256xbf16>,
      %c1_164 = arith.constant 1 : index
      %c0_165 = arith.constant 0 : index
      %c17_166 = arith.constant 17 : index
      %223 = vector.load %arg10[%c1_164, %c0_165, %c17_166] : memref<2x32x290xbf16, #tpu.memory_space<vmem>>, vector<1x32x256xbf16>
      %224 = vector.shape_cast %223 : vector<1x32x256xbf16> to vector<32x256xbf16>
      %c1_167 = arith.constant 1 : index
      %c144_168 = arith.constant 144 : index
      %c0_169 = arith.constant 0 : index
      %225 = vector.load %arg9[%c1_167, %c144_168, %c0_169] : memref<2x304x256xbf16, #tpu.memory_space<vmem>>, vector<1x32x256xbf16>
      %226 = vector.shape_cast %225 : vector<1x32x256xbf16> to vector<32x256xbf16>
      %227 = vector.shape_cast %224 : vector<32x256xbf16> to vector<1x32x256xbf16>
      tpu.vector_store %arg9[%c1_167, %c144_168, %c0_169], %227 {strides = array<i32>} : memref<2x304x256xbf16, #tpu.memory_space<vmem>>, vector<1x32x256xbf16>,
      %c1_170 = arith.constant 1 : index
      %c0_171 = arith.constant 0 : index
      %c18_172 = arith.constant 18 : index
      %228 = vector.load %arg10[%c1_170, %c0_171, %c18_172] : memref<2x32x290xbf16, #tpu.memory_space<vmem>>, vector<1x32x256xbf16>
      %229 = vector.shape_cast %228 : vector<1x32x256xbf16> to vector<32x256xbf16>
      %230 = vector.broadcast %7 : vector<1x256xbf16> to vector<32x256xbf16>
      %231 = arith.mulf %229, %230 : vector<32x256xbf16>
      %c1_173 = arith.constant 1 : index
      %c176_174 = arith.constant 176 : index
      %c0_175 = arith.constant 0 : index
      %232 = vector.load %arg9[%c1_173, %c176_174, %c0_175] : memref<2x304x256xbf16, #tpu.memory_space<vmem>>, vector<1x32x256xbf16>
      %233 = vector.shape_cast %232 : vector<1x32x256xbf16> to vector<32x256xbf16>
      %234 = vector.shape_cast %231 : vector<32x256xbf16> to vector<1x32x256xbf16>
      tpu.vector_store %arg9[%c1_173, %c176_174, %c0_175], %234 {strides = array<i32>} : memref<2x304x256xbf16, #tpu.memory_space<vmem>>, vector<1x32x256xbf16>,
      %c1_176 = arith.constant 1 : index
      %c0_177 = arith.constant 0 : index
      %c32_178 = arith.constant 32 : index
      %235 = vector.load %arg10[%c1_176, %c0_177, %c32_178] : memref<2x32x290xbf16, #tpu.memory_space<vmem>>, vector<1x32x256xbf16>
      %236 = vector.shape_cast %235 : vector<1x32x256xbf16> to vector<32x256xbf16>
      %237 = vector.broadcast %6 : vector<1x256xbf16> to vector<32x256xbf16>
      %238 = arith.mulf %236, %237 : vector<32x256xbf16>
      %c1_179 = arith.constant 1 : index
      %c208_180 = arith.constant 208 : index
      %c0_181 = arith.constant 0 : index
      %239 = vector.load %arg9[%c1_179, %c208_180, %c0_181] : memref<2x304x256xbf16, #tpu.memory_space<vmem>>, vector<1x32x256xbf16>
      %240 = vector.shape_cast %239 : vector<1x32x256xbf16> to vector<32x256xbf16>
      %241 = vector.shape_cast %238 : vector<32x256xbf16> to vector<1x32x256xbf16>
      tpu.vector_store %arg9[%c1_179, %c208_180, %c0_181], %241 {strides = array<i32>} : memref<2x304x256xbf16, #tpu.memory_space<vmem>>, vector<1x32x256xbf16>,
      %c1_182 = arith.constant 1 : index
      %c0_183 = arith.constant 0 : index
      %c33_184 = arith.constant 33 : index
      %242 = vector.load %arg10[%c1_182, %c0_183, %c33_184] : memref<2x32x290xbf16, #tpu.memory_space<vmem>>, vector<1x32x256xbf16>
      %243 = vector.shape_cast %242 : vector<1x32x256xbf16> to vector<32x256xbf16>
      %c1_185 = arith.constant 1 : index
      %c240_186 = arith.constant 240 : index
      %c0_187 = arith.constant 0 : index
      %244 = vector.load %arg9[%c1_185, %c240_186, %c0_187] : memref<2x304x256xbf16, #tpu.memory_space<vmem>>, vector<1x32x256xbf16>
      %245 = vector.shape_cast %244 : vector<1x32x256xbf16> to vector<32x256xbf16>
      %246 = vector.shape_cast %243 : vector<32x256xbf16> to vector<1x32x256xbf16>
      tpu.vector_store %arg9[%c1_185, %c240_186, %c0_187], %246 {strides = array<i32>} : memref<2x304x256xbf16, #tpu.memory_space<vmem>>, vector<1x32x256xbf16>,
      %c1_188 = arith.constant 1 : index
      %c0_189 = arith.constant 0 : index
      %c34_190 = arith.constant 34 : index
      %247 = vector.load %arg10[%c1_188, %c0_189, %c34_190] : memref<2x32x290xbf16, #tpu.memory_space<vmem>>, vector<1x32x256xbf16>
      %248 = vector.shape_cast %247 : vector<1x32x256xbf16> to vector<32x256xbf16>
      %249 = vector.broadcast %7 : vector<1x256xbf16> to vector<32x256xbf16>
      %250 = arith.mulf %248, %249 : vector<32x256xbf16>
      %c1_191 = arith.constant 1 : index
      %c272_192 = arith.constant 272 : index
      %c0_193 = arith.constant 0 : index
      %251 = vector.load %arg9[%c1_191, %c272_192, %c0_193] : memref<2x304x256xbf16, #tpu.memory_space<vmem>>, vector<1x32x256xbf16>
      %252 = vector.shape_cast %251 : vector<1x32x256xbf16> to vector<32x256xbf16>
      %253 = vector.shape_cast %250 : vector<32x256xbf16> to vector<1x32x256xbf16>
      tpu.vector_store %arg9[%c1_191, %c272_192, %c0_193], %253 {strides = array<i32>} : memref<2x304x256xbf16, #tpu.memory_space<vmem>>, vector<1x32x256xbf16>,
    }
    %c8_i32_13 = arith.constant 8 : i32
    %c0_14 = arith.constant 0 : index
    %c0_15 = arith.constant 0 : index
    %9 = vector.load %arg3[%c0_14, %c0_15] : memref<32x288xbf16, #tpu.memory_space<vmem>>, vector<32x288xbf16>
    %c0_16 = arith.constant 0 : index
    %c16 = arith.constant 16 : index
    %c0_17 = arith.constant 0 : index
    %10 = vector.load %arg9[%c0_16, %c16, %c0_17] : memref<2x304x256xbf16, #tpu.memory_space<vmem>>, vector<1x288x256xbf16>
    %11 = vector.shape_cast %10 : vector<1x288x256xbf16> to vector<288x256xbf16>
    %cst_18 = arith.constant dense<0.000000e+00> : vector<32x256xf32>
    %12 = tpu.matmul %9, %11, %cst_18 {dimension_numbers = #tpu.dot_dimension_numbers<[1], [0], [0], [1], [0, 0, 1, 1], [], []>} : vector<32x288xbf16>, vector<288x256xbf16>, vector<32x256xf32> -> vector<32x256xf32>
    %c0_19 = arith.constant 0 : index
    %c0_20 = arith.constant 0 : index
    %13 = vector.load %arg4[%c0_19, %c0_20] : memref<32x1xf32, #tpu.memory_space<vmem>>, vector<32x1xf32>
    %14 = vector.broadcast %13 : vector<32x1xf32> to vector<32x256xf32>
    %15 = arith.addf %12, %14 : vector<32x256xf32>
    %cst_21 = arith.constant 0.000000e+00 : f32
    %16 = vector.broadcast %cst_21 : f32 to vector<32x256xf32>
    %17 = arith.maximumf %15, %16 : vector<32x256xf32>
    %c0_22 = arith.constant 0 : index
    %c0_23 = arith.constant 0 : index
    %18 = vector.load %arg5[%c0_22, %c0_23] : memref<32x1xf32, #tpu.memory_space<vmem>>, vector<32x1xf32>
    %19 = vector.broadcast %18 : vector<32x1xf32> to vector<32x256xf32>
    %20 = arith.mulf %17, %19 : vector<32x256xf32>
    %cst_24 = arith.constant dense<0.000000e+00> : vector<256xf32>
    %21 = vector.multi_reduction <add>, %20, %cst_24 [0] : vector<32x256xf32> to vector<256xf32>
    %22 = vector.shape_cast %21 : vector<256xf32> to vector<1x256xf32>
    %c0_25 = arith.constant 0 : index
    %c0_26 = arith.constant 0 : index
    %23 = vector.load %arg6[%c0_25, %c0_26] : memref<1x1xf32, #tpu.memory_space<vmem>>, vector<1x1xf32>
    %24 = vector.broadcast %23 : vector<1x1xf32> to vector<1x256xf32>
    %25 = arith.addf %22, %24 : vector<1x256xf32>
    %cst_27 = arith.constant 5.000000e-01 : f32
    %26 = vector.broadcast %cst_27 : f32 to vector<1x256xf32>
    %27 = arith.mulf %26, %25 : vector<1x256xf32>
    %28 = math.tanh %27 : vector<1x256xf32>
    %cst_28 = arith.constant 5.000000e-01 : f32
    %29 = vector.broadcast %cst_28 : f32 to vector<1x256xf32>
    %30 = arith.mulf %29, %28 : vector<1x256xf32>
    %cst_29 = arith.constant 5.000000e-01 : f32
    %31 = vector.broadcast %cst_29 : f32 to vector<1x256xf32>
    %32 = arith.addf %30, %31 : vector<1x256xf32>
    %c0_30 = arith.constant 0 : index
    %c0_31 = arith.constant 0 : index
    %33 = vector.load %arg8[%c0_30, %c0_31] : memref<2x256xf32, #tpu.memory_space<vmem>>, vector<1x256xf32>
    tpu.vector_store %arg8[%c0_30, %c0_31], %32 {strides = array<i32>} : memref<2x256xf32, #tpu.memory_space<vmem>>, vector<1x256xf32>,
    %c0_32 = arith.constant 0 : index
    %c0_33 = arith.constant 0 : index
    %34 = vector.load %arg3[%c0_32, %c0_33] : memref<32x288xbf16, #tpu.memory_space<vmem>>, vector<32x288xbf16>
    %c1_34 = arith.constant 1 : index
    %c16_35 = arith.constant 16 : index
    %c0_36 = arith.constant 0 : index
    %35 = vector.load %arg9[%c1_34, %c16_35, %c0_36] : memref<2x304x256xbf16, #tpu.memory_space<vmem>>, vector<1x288x256xbf16>
    %36 = vector.shape_cast %35 : vector<1x288x256xbf16> to vector<288x256xbf16>
    %cst_37 = arith.constant dense<0.000000e+00> : vector<32x256xf32>
    %37 = tpu.matmul %34, %36, %cst_37 {dimension_numbers = #tpu.dot_dimension_numbers<[1], [0], [0], [1], [0, 0, 1, 1], [], []>} : vector<32x288xbf16>, vector<288x256xbf16>, vector<32x256xf32> -> vector<32x256xf32>
    %c0_38 = arith.constant 0 : index
    %c0_39 = arith.constant 0 : index
    %38 = vector.load %arg4[%c0_38, %c0_39] : memref<32x1xf32, #tpu.memory_space<vmem>>, vector<32x1xf32>
    %39 = vector.broadcast %38 : vector<32x1xf32> to vector<32x256xf32>
    %40 = arith.addf %37, %39 : vector<32x256xf32>
    %cst_40 = arith.constant 0.000000e+00 : f32
    %41 = vector.broadcast %cst_40 : f32 to vector<32x256xf32>
    %42 = arith.maximumf %40, %41 : vector<32x256xf32>
    %c0_41 = arith.constant 0 : index
    %c0_42 = arith.constant 0 : index
    %43 = vector.load %arg5[%c0_41, %c0_42] : memref<32x1xf32, #tpu.memory_space<vmem>>, vector<32x1xf32>
    %44 = vector.broadcast %43 : vector<32x1xf32> to vector<32x256xf32>
    %45 = arith.mulf %42, %44 : vector<32x256xf32>
    %cst_43 = arith.constant dense<0.000000e+00> : vector<256xf32>
    %46 = vector.multi_reduction <add>, %45, %cst_43 [0] : vector<32x256xf32> to vector<256xf32>
    %47 = vector.shape_cast %46 : vector<256xf32> to vector<1x256xf32>
    %c0_44 = arith.constant 0 : index
    %c0_45 = arith.constant 0 : index
    %48 = vector.load %arg6[%c0_44, %c0_45] : memref<1x1xf32, #tpu.memory_space<vmem>>, vector<1x1xf32>
    %49 = vector.broadcast %48 : vector<1x1xf32> to vector<1x256xf32>
    %50 = arith.addf %47, %49 : vector<1x256xf32>
    %cst_46 = arith.constant 5.000000e-01 : f32
    %51 = vector.broadcast %cst_46 : f32 to vector<1x256xf32>
    %52 = arith.mulf %51, %50 : vector<1x256xf32>
    %53 = math.tanh %52 : vector<1x256xf32>
    %cst_47 = arith.constant 5.000000e-01 : f32
    %54 = vector.broadcast %cst_47 : f32 to vector<1x256xf32>
    %55 = arith.mulf %54, %53 : vector<1x256xf32>
    %cst_48 = arith.constant 5.000000e-01 : f32
    %56 = vector.broadcast %cst_48 : f32 to vector<1x256xf32>
    %57 = arith.addf %55, %56 : vector<1x256xf32>
    %c1_49 = arith.constant 1 : index
    %c0_50 = arith.constant 0 : index
    %58 = vector.load %arg8[%c1_49, %c0_50] : memref<2x256xf32, #tpu.memory_space<vmem>>, vector<1x256xf32>
    tpu.vector_store %arg8[%c1_49, %c0_50], %57 {strides = array<i32>} : memref<2x256xf32, #tpu.memory_space<vmem>>, vector<1x256xf32>,
    return
  }
}

</mosaic_0001>

<bundles_post_ra>
// kernel: tpu_custom_call.1
= control target key start
LH: loop header
LB: loop body
LE: loop exit
PB: predicated region body
PF: predicated region fallthrough
CT: control target
= control target key end

     0   :  { %s4985_s0 = inlined_call_operand.vmem [shape: bf16[8,2,16,256], index: 0, kind: input, shape index: {}]   ;;  %s4986_s1 = inlined_call_operand.vmem [shape: bf16[128,304], index: 1, kind: input, shape index: {}]   ;;  %s4987_s2 = inlined_call_operand.vmem [shape: f32[128,1], index: 2, kind: input, shape index: {}]   ;;  %s4988_s3 = inlined_call_operand.vmem [shape: bf16[32,288], index: 3, kind: input, shape index: {}]   ;;  %s4989_s4 = inlined_call_operand.vmem [shape: f32[32,1], index: 4, kind: input, shape index: {}]   ;;  %s4990_s5 = inlined_call_operand.vmem [shape: f32[32,1], index: 5, kind: input, shape index: {}]   ;;  %s4991_s6 = inlined_call_operand.<no memory space> [shape: f32[1,1], index: 6, kind: input, shape index: {}]   ;;  %s4992_s7 = inlined_call_operand.vmem [shape: bf16[2,256], index: 7, kind: input, shape index: {}]   ;;  %s4993_s8 = inlined_call_operand.hbm [shape: f32[2,256], index: 8, kind: output, shape index: {}]  }
   0x1   :  { %v13_v0 = vstv %s4991_s6 }
   0x2   :  { %14 = vst [vmem:[#allocation5] sm:$0x1] %v13_v0 }
   0x3   :  { %15 = vsyncpa [#allocation7], 0  ;;  %vm111_vm0 = vcmask 277504   ;;  %v4995_v1 = vmov 0   ;;  %v3581_v3 = vmov 0.0  }
   0x4   :  { %35 = vst [vmem:[#allocation2 + $0x10] sm:$0xff] %v4995_v1  ;;  %36 = vst [vmem:[#allocation2 + $0x18] sm:$0xff] %v4995_v1  ;;  %v3726_v2 = vld.sshfl [vmem:[%s4992_s7] sm:$0x11 pattern:$0x75316420] }
   0x5   :  { %37 = vst [vmem:[#allocation2 + $0x20] sm:$0xff] %v4995_v1  ;;  %38 = vst [vmem:[#allocation2 + $0x28] sm:$0xff] %v4995_v1  ;;  %s3736_s7 = smov 0  }
   0x6   :  { %39 = vst [vmem:[#allocation2 + $0x30] sm:$0xff] %v4995_v1  ;;  %40 = vst [vmem:[#allocation2 + $0x38] sm:$0xff] %v4995_v1 }
   0x7   :  { %41 = vst [vmem:[#allocation2 + $0x40] sm:$0xff] %v4995_v1  ;;  %42 = vst [vmem:[#allocation2 + $0x48] sm:$0xff] %v4995_v1 }
   0x8   :  { %43 = vst [vmem:[#allocation2 + $0x50] sm:$0xff] %v4995_v1  ;;  %44 = vst [vmem:[#allocation2 + $0x58] sm:$0xff] %v4995_v1 }
   0x9   :  { %45 = vst [vmem:[#allocation2 + $0x60] sm:$0xff] %v4995_v1  ;;  %46 = vst [vmem:[#allocation2 + $0x68] sm:$0xff] %v4995_v1 }
   0xa   :  { %47 = vst [vmem:[#allocation2 + $0x70] sm:$0xff] %v4995_v1  ;;  %48 = vst [vmem:[#allocation2 + $0x78] sm:$0xff] %v4995_v1 }
   0xb   :  { %49 = vst [vmem:[#allocation2 + $0x80] sm:$0xff] %v4995_v1  ;;  %50 = vst [vmem:[#allocation2 + $0x88] sm:$0xff] %v4995_v1 }
   0xc   :  { %51 = vst [vmem:[#allocation2 + $0x90] sm:$0xff] %v4995_v1  ;;  %52 = vst [vmem:[#allocation2 + $0x98] sm:$0xff] %v4995_v1 }
   0xd   :  { %53 = vst [vmem:[#allocation2 + $0xa0] sm:$0xff] %v4995_v1  ;;  %54 = vst [vmem:[#allocation2 + $0xa8] sm:$0xff] %v4995_v1 }
   0xe   :  { %55 = vst [vmem:[#allocation2 + $0xb0] sm:$0xff] %v4995_v1  ;;  %56 = vst [vmem:[#allocation2 + $0xb8] sm:$0xff] %v4995_v1 }
   0xf   :  { %57 = vst [vmem:[#allocation2 + $0xc0] sm:$0xff] %v4995_v1  ;;  %58 = vst [vmem:[#allocation2 + $0xc8] sm:$0xff] %v4995_v1 }
  0x10   :  { %59 = vst [vmem:[#allocation2 + $0xd0] sm:$0xff] %v4995_v1  ;;  %60 = vst [vmem:[#allocation2 + $0xd8] sm:$0xff] %v4995_v1 }
  0x11   :  { %61 = vst [vmem:[#allocation2 + $0xe0] sm:$0xff] %v4995_v1  ;;  %62 = vst [vmem:[#allocation2 + $0xe8] sm:$0xff] %v4995_v1 }
  0x12   :  { %63 = vst [vmem:[#allocation2 + $0xf0] sm:$0xff] %v4995_v1  ;;  %64 = vst [vmem:[#allocation2 + $0xf8] sm:$0xff] %v4995_v1 }
  0x13   :  { %65 = vst [vmem:[#allocation2 + $0x100] sm:$0xff] %v4995_v1  ;;  %66 = vst [vmem:[#allocation2 + $0x108] sm:$0xff] %v4995_v1 }
  0x14   :  { %67 = vst [vmem:[#allocation2 + $0x110] sm:$0xff] %v4995_v1  ;;  %68 = vst [vmem:[#allocation2 + $0x118] sm:$0xff] %v4995_v1 }
  0x15   :  { %69 = vst [vmem:[#allocation2 + $0x120] sm:$0xff] %v4995_v1  ;;  %70 = vst [vmem:[#allocation2 + $0x128] sm:$0xff] %v4995_v1 }
  0x16   :  { %73 = vst [vmem:[#allocation2 + $0x140] sm:$0xff] %v4995_v1  ;;  %74 = vst [vmem:[#allocation2 + $0x148] sm:$0xff] %v4995_v1 }
  0x17   :  { %75 = vst [vmem:[#allocation2 + $0x150] sm:$0xff] %v4995_v1  ;;  %76 = vst [vmem:[#allocation2 + $0x158] sm:$0xff] %v4995_v1 }
  0x18   :  { %77 = vst [vmem:[#allocation2 + $0x160] sm:$0xff] %v4995_v1  ;;  %78 = vst [vmem:[#allocation2 + $0x168] sm:$0xff] %v4995_v1 }
  0x19   :  { %79 = vst [vmem:[#allocation2 + $0x170] sm:$0xff] %v4995_v1  ;;  %80 = vst [vmem:[#allocation2 + $0x178] sm:$0xff] %v4995_v1 }
  0x1a   :  { %81 = vst [vmem:[#allocation2 + $0x180] sm:$0xff] %v4995_v1  ;;  %82 = vst [vmem:[#allocation2 + $0x188] sm:$0xff] %v4995_v1 }
  0x1b   :  { %83 = vst [vmem:[#allocation2 + $0x190] sm:$0xff] %v4995_v1  ;;  %84 = vst [vmem:[#allocation2 + $0x198] sm:$0xff] %v4995_v1 }
  0x1c   :  { %85 = vst [vmem:[#allocation2 + $0x1a0] sm:$0xff] %v4995_v1  ;;  %86 = vst [vmem:[#allocation2 + $0x1a8] sm:$0xff] %v4995_v1 }
  0x1d   :  { %87 = vst [vmem:[#allocation2 + $0x1b0] sm:$0xff] %v4995_v1  ;;  %88 = vst [vmem:[#allocation2 + $0x1b8] sm:$0xff] %v4995_v1 }
  0x1e   :  { %89 = vst [vmem:[#allocation2 + $0x1c0] sm:$0xff] %v4995_v1  ;;  %90 = vst [vmem:[#allocation2 + $0x1c8] sm:$0xff] %v4995_v1 }
  0x1f   :  { %91 = vst [vmem:[#allocation2 + $0x1d0] sm:$0xff] %v4995_v1  ;;  %92 = vst [vmem:[#allocation2 + $0x1d8] sm:$0xff] %v4995_v1 }
  0x20   :  { %93 = vst [vmem:[#allocation2 + $0x1e0] sm:$0xff] %v4995_v1  ;;  %94 = vst [vmem:[#allocation2 + $0x1e8] sm:$0xff] %v4995_v1 }
  0x21   :  { %95 = vst [vmem:[#allocation2 + $0x1f0] sm:$0xff] %v4995_v1  ;;  %96 = vst [vmem:[#allocation2 + $0x1f8] sm:$0xff] %v4995_v1 }
  0x22   :  { %97 = vst [vmem:[#allocation2 + $0x200] sm:$0xff] %v4995_v1  ;;  %98 = vst [vmem:[#allocation2 + $0x208] sm:$0xff] %v4995_v1 }
  0x23   :  { %99 = vst [vmem:[#allocation2 + $0x210] sm:$0xff] %v4995_v1  ;;  %100 = vst [vmem:[#allocation2 + $0x218] sm:$0xff] %v4995_v1 }
  0x24   :  { %101 = vst [vmem:[#allocation2 + $0x220] sm:$0xff] %v4995_v1  ;;  %102 = vst [vmem:[#allocation2 + $0x228] sm:$0xff] %v4995_v1 }
  0x25   :  { %103 = vst [vmem:[#allocation2 + $0x230] sm:$0xff] %v4995_v1  ;;  %104 = vst [vmem:[#allocation2 + $0x238] sm:$0xff] %v4995_v1 }
  0x26   :  { %105 = vst [vmem:[#allocation2 + $0x240] sm:$0xff] %v4995_v1  ;;  %106 = vst [vmem:[#allocation2 + $0x248] sm:$0xff] %v4995_v1 }
  0x27   :  { %107 = vst [vmem:[#allocation2 + $0x250] sm:$0xff] %v4995_v1  ;;  %108 = vst [vmem:[#allocation2 + $0x258] sm:$0xff] %v4995_v1 }
  0x28   :  { %109 = vst [vmem:[#allocation3] sm:$0xff] %v4995_v1  ;;  %113 = vst [vmem:[#allocation3 + $0x18] sm:$0xff] %v4995_v1 }
  0x29   :  { %116 = vst [vmem:[#allocation3 + $0x30] sm:$0xff] %v4995_v1  ;;  %119 = vst [vmem:[#allocation3 + $0x48] sm:$0xff] %v4995_v1 }
  0x2a   :  { %5011 = vst [vmem:[#allocation9_spill] sm:$0xff] %v3726_v2  ;;  %112 = vst.msk [vmem:[#allocation3 + $0x10] sm:$0xff] %vm111_vm0, %v4995_v1 }
  0x2b   :  { %115 = vst.msk [vmem:[#allocation3 + $0x28] sm:$0xff] %vm111_vm0, %v4995_v1  ;;  %118 = vst.msk [vmem:[#allocation3 + $0x40] sm:$0xff] %vm111_vm0, %v4995_v1 }
  0x2c   :  { %121 = vst.msk [vmem:[#allocation3 + $0x58] sm:$0xff] %vm111_vm0, %v4995_v1  ;;  %122 = vst [vmem:[#allocation4] sm:$0xff] %v3581_v3 }
  0x2d   :  { %123 = vst [vmem:[#allocation4 + $0x8] sm:$0xff] %v3581_v3  ;;  %124 = vst [vmem:[#allocation4 + $0x10] sm:$0xff] %v3581_v3 }
  0x2e   :  { %125 = vst [vmem:[#allocation4 + $0x18] sm:$0xff] %v3581_v3  ;;  %126 = vst [vmem:[#allocation4 + $0x20] sm:$0xff] %v3581_v3 }
  0x2f   :  { %127 = vst [vmem:[#allocation4 + $0x28] sm:$0xff] %v3581_v3  ;;  %128 = vst [vmem:[#allocation4 + $0x30] sm:$0xff] %v3581_v3 }
  0x30   :  { %129 = vst [vmem:[#allocation4 + $0x38] sm:$0xff] %v3581_v3  ;;  %130 = vst [vmem:[#allocation4 + $0x40] sm:$0xff] %v3581_v3 }
  0x31   :  { %131 = vst [vmem:[#allocation4 + $0x48] sm:$0xff] %v3581_v3  ;;  %132 = vst [vmem:[#allocation4 + $0x50] sm:$0xff] %v3581_v3 }
  0x32   :  { %133 = vst [vmem:[#allocation4 + $0x58] sm:$0xff] %v3581_v3  ;;  %134 = vst [vmem:[#allocation4 + $0x60] sm:$0xff] %v3581_v3 }
  0x33   :  { %135 = vst [vmem:[#allocation4 + $0x68] sm:$0xff] %v3581_v3  ;;  %136 = vst [vmem:[#allocation4 + $0x70] sm:$0xff] %v3581_v3 }
  0x34   :  { %137 = vst [vmem:[#allocation4 + $0x78] sm:$0xff] %v3581_v3 }
  0x35 LB: > { %v5012_v2 = vld [vmem:[#allocation9_spill] sm:$0xff]  ;;  %v3582_v4 = vmov 0   ;;  %s3132_s30 = sshll.u32 %s3578_s7, 5  ;;  %v199_v6 = vld [vmem:[#allocation2 + $0x18] sm:$0xff]  ;;  %v198_v11 = vld [vmem:[#allocation2 + $0x10] sm:$0xff]  ;;  %s3585_s13 = smov 16   ;;  %s3578_s7 = sphi %s3736_s7, %s144_s7  }
  0x36   : > { %3321 = vset.pattern.permute.xlu1 %v3582_v4  ;;  %3320 = vset.pattern.permute.xlu0 %v3582_v4  ;;  %s147_s11 = scalar_lea.vmem %s4985_s0, %s3132_s30  ;;  %v1380_v10 = vld [vmem:[#allocation2 + $0x148] sm:$0xff]  ;;  %v1379_v12 = vld [vmem:[#allocation2 + $0x140] sm:$0xff]  ;;  %v1382_v14 = vld [vmem:[#allocation2 + $0x158] sm:$0xff]  ;;  %s3584_s30 = smov 2   ;;  %vm450_vm1 = vcmask 392192   ;;  %vm886_vm2 = vcmask 1047688  }
  0x37   : > { %v3322_v5 = vld [vmem:[%s147_s11 + $0x4] ss:$8 sps:$4 sm:$0xff]   ;;  %v3324_v7 = vld [vmem:[%s147_s11 + $0x14] ss:$8 sps:$4 sm:$0xff]   ;;  %v3326_v8 = vld [vmem:[%s147_s11] ss:$8 sps:$4 sm:$0xff]  }
  0x38   : > { %475 = vmatprep.subr.bf16.mxu0 %v3322_v5  ;;  %v3327_v9 = vld [vmem:[%s147_s11 + $0x10] ss:$8 sps:$4 sm:$0xff]   ;;  %1655 = vmatprep.subr.bf16.mxu1 %v3324_v7  ;;  %v201_v13 = vld [vmem:[#allocation2 + $0x28] sm:$0xff]  ;;  %v200_v15 = vld [vmem:[#allocation2 + $0x20] sm:$0xff]  ;;  %s3586_s18 = smov 18   ;;  %s3587_s19 = smov 32  }
  0x39   : > { %476 = vmatpush1.bf16.msra.mxu0 %v3326_v8  ;;  %1656 = vmatpush1.bf16.msra.mxu1 %v3327_v9  ;;  %v1381_v16 = vld [vmem:[#allocation2 + $0x150] sm:$0xff]  ;;  %v203_v17 = vld [vmem:[#allocation2 + $0x38] sm:$0xff]  ;;  %v1384_v18 = vld [vmem:[#allocation2 + $0x168] sm:$0xff]  ;;  %v4994_v8 = vlaneseq  ;;  %s3588_s20 = smov 34   ;;  %s3589_s21 = smov 17   ;;  %vm877_vm3 = vcmask 138240  }
  0x3a   : > { %477 = vmatprep.subr.bf16.mxu0 %v199_v6  ;;  %1657 = vmatprep.subr.bf16.mxu1 %v1380_v10  ;;  %v202_v19 = vld [vmem:[#allocation2 + $0x30] sm:$0xff]  ;;  %v1383_v20 = vld [vmem:[#allocation2 + $0x160] sm:$0xff]  ;;  %v205_v21 = vld [vmem:[#allocation2 + $0x48] sm:$0xff]  ;;  %v3583_v6 = vmov 1966171168   ;;  %s3590_s22 = smov 127  }
  0x3b   : > { %v1386_v22 = vld [vmem:[#allocation2 + $0x178] sm:$0xff]  ;;  %v204_v23 = vld [vmem:[#allocation2 + $0x40] sm:$0xff]  ;;  %v1385_v24 = vld [vmem:[#allocation2 + $0x170] sm:$0xff]  ;;  %v908_v7 = vunpack.c.l.s4 %v3583_v6  ;;  %s3591_s23 = smov 111   ;;  %s3592_s24 = smov 95   ;;  %vm1006_vm4 = vcmask 15360  }
  0x3c   : > { %v207_v25 = vld [vmem:[#allocation2 + $0x58] sm:$0xff]  ;;  %v1388_v26 = vld [vmem:[#allocation2 + $0x188] sm:$0xff]  ;;  %v3330_v27 = vld [vmem:[%s4986_s1 + $0x4] ss:$12 sps:$4 sm:$0xff]   ;;  %vm1060_vm5 = vcmask 130048   ;;  %s3593_s25 = smov 126  }
  0x3d   : > { %478 = vmatpush1.bf16.msra.mxu0 %v198_v11  ;;  %1658 = vmatpush1.bf16.msra.mxu1 %v1379_v12  ;;  %v206_v28 = vld [vmem:[#allocation2 + $0x50] sm:$0xff]  ;;  %v1387_v29 = vld [vmem:[#allocation2 + $0x180] sm:$0xff]  ;;  %v209_v30 = vld [vmem:[#allocation2 + $0x68] sm:$0xff]  ;;  %vm1149_vm6 = vcmask 146432   ;;  %s3594_s26 = smov 112   ;;  %vm1201_vm7 = vcmask 261120  }
  0x3e   : > { %479 = vmatprep.subr.bf16.mxu0 %v201_v13  ;;  %1659 = vmatprep.subr.bf16.mxu1 %v1382_v14  ;;  %v1390_v31 = vld [vmem:[#allocation2 + $0x198] sm:$0xff]  ;;  %v208_v32 = vld [vmem:[#allocation2 + $0x60] sm:$0xff]  ;;  %v1389_v33 = vld [vmem:[#allocation2 + $0x190] sm:$0xff]  ;;  %v909_v14 = vunpack.c.0.s8 %v908_v7  ;;  %s3595_s27 = smov 110   ;;  %s3596_s28 = smov 96   ;;  %vm967_vm8 = vcmask 1039360  }
  0x3f   : > { %507 = vmatprep.mubr.bf16.mxu0 %v3330_v27  ;;  %1687 = vmatprep.mubr.bf16.mxu1 %v3330_v27  ;;  %v211_v34 = vld [vmem:[#allocation2 + $0x78] sm:$0xff]  ;;  %v1392_v35 = vld [vmem:[#allocation2 + $0x1a8] sm:$0xff]  ;;  %v210_v36 = vld [vmem:[#allocation2 + $0x70] sm:$0xff]  ;;  %s3597_s6 = smov 94   ;;  %vm1126_vm9 = vcmask 908288   ;;  %vm1267_vm10 = vcmask 777216  }
  0x40   : > { %v1391_v37 = vld [vmem:[#allocation2 + $0x1a0] sm:$0xff]  ;;  %v213_v38 = vld [vmem:[#allocation2 + $0x88] sm:$0xff]  ;;  %v1394_v39 = vld [vmem:[#allocation2 + $0x1b8] sm:$0xff]  ;;  %vm1035_vm11 = vcmask 1031168   ;;  %vm1089_vm12 = vcmask 916480   ;;  %vm1178_vm13 = vcmask 900096  }
  0x41   : > { %480 = vmatpush1.bf16.msra.mxu0 %v200_v15  ;;  %1660 = vmatpush1.bf16.msra.mxu1 %v1381_v16  ;;  %v212_v40 = vld [vmem:[#allocation2 + $0x80] sm:$0xff]  ;;  %v1393_v41 = vld [vmem:[#allocation2 + $0x1b0] sm:$0xff]  ;;  %v215_v42 = vld [vmem:[#allocation2 + $0x98] sm:$0xff]  ;;  %v911_v15 = vshrl.u32 %v4994_v8, 7  ;;  %vm1230_vm14 = vcmask 785408   ;;  %vm1319_vm15 = vcmask 769024  }
  0x42   : > { %481 = vmatprep.subr.bf16.mxu0 %v203_v17  ;;  %1661 = vmatprep.subr.bf16.mxu1 %v1384_v18  ;;  %v1396_v43 = vld [vmem:[#allocation2 + $0x1c8] sm:$0xff]  ;;  %v214_v44 = vld [vmem:[#allocation2 + $0x90] sm:$0xff]  ;;  %v1395_v45 = vld [vmem:[#allocation2 + $0x1c0] sm:$0xff]  ;;  %s144_s7 = sadd.s32 1, %s3578_s7  }
  0x43   : > { %v217_v46 = vld [vmem:[#allocation2 + $0xa8] sm:$0xff]  ;;  %v1398_v47 = vld [vmem:[#allocation2 + $0x1d8] sm:$0xff]  ;;  %v3753_v48 = vld [vmem:[%s4987_s2 + $0x10] sm:$0xff]  ;;  %p141_p0 = scmp.ge.s32.totalorder %s144_s7, 8  }
  0x44   : > { %v3758_v49 = vld [vmem:[%s4987_s2] sm:$0xff]  ;;  %v1397_v51 = vld [vmem:[#allocation2 + $0x1d0] sm:$0xff]  ;;  %v219_v52 = vld [vmem:[#allocation2 + $0xb8] sm:$0xff]  ;;  %262 = vperm.xlu1 %3321, %v3753_v48  }
  0x45   : > { %482 = vmatpush1.bf16.msra.mxu0 %v202_v19  ;;  %1662 = vmatpush1.bf16.msra.mxu1 %v1383_v20  ;;  %v216_v50 = vld [vmem:[#allocation2 + $0xa0] sm:$0xff]  ;;  %v1400_v53 = vld [vmem:[#allocation2 + $0x1e8] sm:$0xff]  ;;  %v3765_v54 = vld [vmem:[%s4987_s2 + $0x18] sm:$0xff] }
  0x46   : > { %483 = vmatprep.subr.bf16.mxu0 %v205_v21  ;;  %1663 = vmatprep.subr.bf16.mxu1 %v1386_v22  ;;  %v3770_v55 = vld [vmem:[%s4987_s2 + $0x8] sm:$0xff]  ;;  %v218_v56 = vld [vmem:[#allocation2 + $0xb0] sm:$0xff]  ;;  %v1399_v57 = vld [vmem:[#allocation2 + $0x1e0] sm:$0xff]  ;;  %v906_v22 = vcombine.high %v5012_v2, %v5012_v2 }
  0x47   : > { %252 = vperm.xlu0 %3320, %v3758_v49   ;;  %v221_v58 = vld [vmem:[#allocation2 + $0xc8] sm:$0xff]  ;;  %v1402_v59 = vld [vmem:[#allocation2 + $0x1f8] sm:$0xff]  ;;  %v3782_v61 = vld [vmem:[%s4987_s2 + $0x20] sm:$0xff] }
  0x48   : > { %267 = vperm.xlu1 %3321, %v3765_v54   ;;  %v3777_v60 = vld [vmem:[%s4987_s2 + $0x28] sm:$0xff]  ;;  %v220_v62 = vld [vmem:[#allocation2 + $0xc0] sm:$0xff]  ;;  %v1401_v63 = vld [vmem:[#allocation2 + $0x1f0] sm:$0xff] }
  0x49   : > { %484 = vmatpush1.bf16.msra.mxu0 %v204_v23  ;;  %1664 = vmatpush1.bf16.msra.mxu1 %v1385_v24  ;;  %v223_v0 = vld [vmem:[#allocation2 + $0xd8] sm:$0xff]  ;;  %v1404_v3 = vld [vmem:[#allocation2 + $0x208] sm:$0xff]  ;;  %v3794_v9 = vld [vmem:[%s4987_s2 + $0x30] sm:$0xff]  ;;  %v3813_v23 = vsub.s32 %v909_v14, %v911_v15 }
  0x4a   : > { %485 = vmatprep.subr.bf16.mxu0 %v207_v25  ;;  %1665 = vmatprep.subr.bf16.mxu1 %v1388_v26  ;;  %v3789_v5 = vld [vmem:[%s4987_s2 + $0x38] sm:$0xff]  ;;  %v222_v10 = vld [vmem:[#allocation2 + $0xd0] sm:$0xff]  ;;  %v1403_v11 = vld [vmem:[#allocation2 + $0x200] sm:$0xff] }
  0x4b   : > { %257 = vperm.xlu0 %3320, %v3770_v55   ;;  %v225_v12 = vld [vmem:[#allocation2 + $0xe8] sm:$0xff]  ;;  %v1406_v13 = vld [vmem:[#allocation2 + $0x218] sm:$0xff]  ;;  %v3807_v17 = vld [vmem:[%s4987_s2 + $0x40] sm:$0xff]  ;;  %5013 = vst [vmem:[#allocation10_spill] sm:$0xff] %v3813_v23 }
  0x4c   : > { %277 = vperm.xlu1 %3321, %v3777_v60   ;;  %v3802_v16 = vld [vmem:[%s4987_s2 + $0x48] sm:$0xff]  ;;  %v224_v18 = vld [vmem:[#allocation2 + $0xe0] sm:$0xff]  ;;  %v1405_v19 = vld [vmem:[#allocation2 + $0x210] sm:$0xff] }
  0x4d   : > { %486 = vmatpush1.bf16.msra.mxu0 %v206_v28  ;;  %1666 = vmatpush1.bf16.msra.mxu1 %v1387_v29  ;;  %v227_v20 = vld [vmem:[#allocation2 + $0xf8] sm:$0xff]  ;;  %v1408_v21 = vld [vmem:[#allocation2 + $0x228] sm:$0xff]  ;;  %v3823_v25 = vld [vmem:[%s4987_s2 + $0x50] sm:$0xff] }
  0x4e   : > { %487 = vmatprep.subr.bf16.mxu0 %v209_v30  ;;  %1667 = vmatprep.subr.bf16.mxu1 %v1390_v31  ;;  %v3818_v24 = vld [vmem:[%s4987_s2 + $0x58] sm:$0xff]  ;;  %v226_v26 = vld [vmem:[#allocation2 + $0xf0] sm:$0xff]  ;;  %v1407_v27 = vld [vmem:[#allocation2 + $0x220] sm:$0xff]  ;;  %v920_v30 = vrot.slane %v906_v22, %v3813_v23  ;;  %v913_v31 = vrot.slane %v5012_v2, %v3813_v23 }
  0x4f   : > { %272 = vperm.xlu0 %3320, %v3782_v61   ;;  %v229_v28 = vld [vmem:[#allocation2 + $0x108] sm:$0xff]  ;;  %v1410_v29 = vld [vmem:[#allocation2 + $0x238] sm:$0xff] }
  0x50   : > { %287 = vperm.xlu1 %3321, %v3789_v5   ;;  %v3336_v7 = vld [vmem:[%s4986_s1 + $0x30] ss:$12 sps:$4 sm:$0xff]   ;;  %v3354_v14 = vld [vmem:[%s4986_s1 + $0x20] ss:$12 sps:$4 sm:$0xff]  }
  0x51   : > { %488 = vmatpush1.bf16.msra.mxu0 %v208_v32  ;;  %1668 = vmatpush1.bf16.msra.mxu1 %v1389_v33  ;;  %v3328_v32 = vld [vmem:[%s4986_s1] ss:$12 sps:$4 sm:$0xff]  }
  0x52   : > { %489 = vmatprep.subr.bf16.mxu0 %v211_v34  ;;  %1669 = vmatprep.subr.bf16.mxu1 %v1392_v35  ;;  %v3836_v33 = vld [vmem:[%s4987_s2 + $0x68] sm:$0xff]  ;;  %v3841_v34 = vld [vmem:[%s4987_s2 + $0x60] sm:$0xff] }
  0x53   : > { %282 = vperm.xlu0 %3320, %v3794_v9   ;;  %v3331_v35 = vld [vmem:[%s4986_s1 + $0x1c] ss:$12 sps:$4 sm:$0xff]   ;;  %v3362_v22 = vld [vmem:[%s4986_s1 + $0x80] ss:$12 sps:$4 sm:$0xff]  }
  0x54   : > { %297 = vperm.xlu1 %3321, %v3802_v16  }
  0x55   : > { %490 = vmatpush1.bf16.msra.mxu0 %v210_v36  ;;  %1670 = vmatpush1.bf16.msra.mxu1 %v1391_v37  ;;  %v228_v36 = vld [vmem:[#allocation2 + $0x100] sm:$0xff]  ;;  %v1409_v37 = vld [vmem:[#allocation2 + $0x230] sm:$0xff] }
  0x56   : > { %491 = vmatprep.subr.bf16.mxu0 %v213_v38  ;;  %1671 = vmatprep.subr.bf16.mxu1 %v1394_v39  ;;  %v993_v38 = vshrl.u32 %v920_v30, 16  ;;  %v986_v39 = vshrl.u32 %v913_v31, 16 }
  0x57   : > { %292 = vperm.xlu0 %3320, %v3807_v17  }
  0x58   : > { %307 = vperm.xlu1 %3321, %v3818_v24  }
  0x59   : > { %492 = vmatpush1.bf16.msra.mxu0 %v212_v40  ;;  %1672 = vmatpush1.bf16.msra.mxu1 %v1393_v41  ;;  %v231_v40 = vld [vmem:[#allocation2 + $0x118] sm:$0xff]  ;;  %v1412_v41 = vld [vmem:[#allocation2 + $0x248] sm:$0xff] }
  0x5a   : > { %493 = vmatprep.subr.bf16.mxu0 %v215_v42  ;;  %1673 = vmatprep.subr.bf16.mxu1 %v1396_v43  ;;  %v3851_v42 = vld [vmem:[%s4987_s2 + $0x78] sm:$0xff]  ;;  %v3856_v43 = vld [vmem:[%s4987_s2 + $0x70] sm:$0xff] }
  0x5b   : > { %302 = vperm.xlu0 %3320, %v3823_v25  }
  0x5c   : > { %317 = vperm.xlu1 %3321, %v3836_v33  }
  0x5d   : > { %494 = vmatpush1.bf16.msra.mxu0 %v214_v44  ;;  %1674 = vmatpush1.bf16.msra.mxu1 %v1395_v45  ;;  %v230_v44 = vld [vmem:[#allocation2 + $0x110] sm:$0xff]  ;;  %v1411_v45 = vld [vmem:[#allocation2 + $0x240] sm:$0xff] }
  0x5e   : > { %495 = vmatprep.subr.bf16.mxu0 %v217_v46  ;;  %1675 = vmatprep.subr.bf16.mxu1 %v1398_v47  ;;  %v233_v46 = vld [vmem:[#allocation2 + $0x128] sm:$0xff]  ;;  %v3858_v47 = vsub.s32 0, %v911_v15 }
  0x5f   : > { %312 = vperm.xlu0 %3320, %v3841_v34   ;;  %v3355_v15 = vld [vmem:[%s4986_s1 + $0x20] ss:$12 sps:$4 sm:$0xff]  }
  0x60   : > { %5014 = vst [vmem:[#allocation11_spill] sm:$0xff] %v3858_v47  ;;  %327 = vperm.xlu1 %3321, %v3851_v42  }
  0x61   : > { %496 = vmatpush1.bf16.msra.mxu0 %v216_v50  ;;  %1676 = vmatpush1.bf16.msra.mxu1 %v1397_v51  ;;  %v994_v50 = vpack.i.b16 %v993_v38, %v993_v38  ;;  %v987_v51 = vpack.i.b16 %v986_v39, %v986_v39 }
  0x62   : > { %497 = vmatprep.subr.bf16.mxu0 %v219_v52  ;;  %1677 = vmatprep.subr.bf16.mxu1 %v1400_v53  ;;  %v3333_v52 = vld [vmem:[%s4986_s1 + $0x18] ss:$12 sps:$4 sm:$0xff]  }
  0x63   : > { %v1414_v53 = vld [vmem:[#allocation2 + $0x258] sm:$0xff]  ;;  %322 = vperm.xlu0 %3320, %v3856_v43  }
  0x65   : > { %498 = vmatpush1.bf16.msra.mxu0 %v218_v56  ;;  %1678 = vmatpush1.bf16.msra.mxu1 %v1399_v57  ;;  %v3334_v56 = vld [vmem:[%s4986_s1 + $0x34] ss:$12 sps:$4 sm:$0xff]  }
  0x66   : > { %499 = vmatprep.subr.bf16.mxu0 %v221_v58  ;;  %1679 = vmatprep.subr.bf16.mxu1 %v1402_v59  ;;  %v232_v57 = vld [vmem:[#allocation2 + $0x120] sm:$0xff]  ;;  %v1413_v58 = vld [vmem:[#allocation2 + $0x250] sm:$0xff]  ;;  %v929_v59 = vpack.i.b16 %v920_v30, %v920_v30 }
  0x69   : > { %500 = vmatpush1.bf16.msra.mxu0 %v220_v62  ;;  %1680 = vmatpush1.bf16.msra.mxu1 %v1401_v63  ;;  %v3869_v62 = vrot.slane %v994_v50, %v3858_v47  ;;  %v922_v63 = vpack.i.b16 %v913_v31, %v913_v31 }
  0x6a   : > { %501 = vmatprep.subr.bf16.mxu0 %v223_v0  ;;  %1681 = vmatprep.subr.bf16.mxu1 %v1404_v3  ;;  %v3872_v0 = vrot.slane %v987_v51, %v3858_v47  ;;  %v3875_v3 = vrot.slane %v929_v59, %v3858_v47 }
  0x6b   : > { %1004 = vrot.lane.b32.xlu1 %v3869_v62, %s3584_s30  ;;  %v3879_v6 = vrot.slane %v922_v63, %v3858_v47 }
  0x6c   : > { %5015 = vst [vmem:[#allocation12_spill] sm:$0xff] %v3875_v3  ;;  %1002 = vrot.lane.b32.xlu0 %v3872_v0, %s3584_s30 }
  0x6d   : > { %502 = vmatpush1.bf16.msra.mxu0 %v222_v10  ;;  %1682 = vmatpush1.bf16.msra.mxu1 %v1403_v11  ;;  %5016 = vst [vmem:[#allocation13_spill] sm:$0xff] %v3879_v6  ;;  %v3337_v10 = vld [vmem:[%s4986_s1 + $0x4c] ss:$12 sps:$4 sm:$0xff]   ;;  %v3339_v11 = vld [vmem:[%s4986_s1 + $0x48] ss:$12 sps:$4 sm:$0xff]  }
  0x6e   : > { %503 = vmatprep.subr.bf16.mxu0 %v225_v12  ;;  %1683 = vmatprep.subr.bf16.mxu1 %v1406_v13  ;;  %v3340_v12 = vld [vmem:[%s4986_s1 + $0x64] ss:$12 sps:$4 sm:$0xff]   ;;  %v3353_v13 = vld [vmem:[%s4986_s1 + $0x8] ss:$12 sps:$4 sm:$0xff]  }
  0x6f   : > { %1058 = vrot.lane.b32.xlu1 %v3875_v3, %s3585_s13 }
  0x70   : > { %1056 = vrot.lane.b32.xlu0 %v3879_v6, %s3585_s13 }
  0x71   : > { %504 = vmatpush1.bf16.msra.mxu0 %v224_v18  ;;  %1684 = vmatpush1.bf16.msra.mxu1 %v1405_v19  ;;  %v3358_v18 = vld [vmem:[%s4986_s1 + $0x50] ss:$12 sps:$4 sm:$0xff]  }
  0x72   : > { %505 = vmatprep.subr.bf16.mxu0 %v227_v20  ;;  %1685 = vmatprep.subr.bf16.mxu1 %v1408_v21  ;;  %v3359_v19 = vld [vmem:[%s4986_s1 + $0x50] ss:$12 sps:$4 sm:$0xff]   ;;  %v3360_v20 = vld [vmem:[%s4986_s1 + $0x68] ss:$12 sps:$4 sm:$0xff]  }
  0x73   : > { %1433 = vperm.xlu1 %3321, %v3758_v49   ;;  %v3342_v49 = vld [vmem:[%s4986_s1 + $0x60] ss:$12 sps:$4 sm:$0xff]   ;;  %v3361_v21 = vld [vmem:[%s4986_s1 + $0x68] ss:$12 sps:$4 sm:$0xff]  }
  0x74   : > { %1438 = vperm.xlu0 %3320, %v3770_v55   ;;  %v3343_v55 = vld [vmem:[%s4986_s1 + $0x7c] ss:$12 sps:$4 sm:$0xff]  }
  0x75   : > { %506 = vmatpush1.bf16.msra.mxu0 %v226_v26  ;;  %1686 = vmatpush1.bf16.msra.mxu1 %v1407_v27  ;;  %v3365_v26 = vld [vmem:[%s4986_s1 + $0x98] ss:$12 sps:$4 sm:$0xff]   ;;  %v3366_v27 = vld [vmem:[%s4986_s1 + $0xb0] ss:$12 sps:$4 sm:$0xff]  }
  0x76   : > { %588 = vmatprep.subr.bf16.mxu0 %v229_v28  ;;  %1768 = vmatprep.subr.bf16.mxu1 %v1410_v29  ;;  %v3367_v28 = vld [vmem:[%s4986_s1 + $0xb0] ss:$12 sps:$4 sm:$0xff]  }
  0x77   : > { %1443 = vperm.xlu1 %3321, %v3753_v48   ;;  %v3345_v48 = vld [vmem:[%s4986_s1 + $0x78] ss:$12 sps:$4 sm:$0xff]  }
  0x78   : > { %508 = vmatmul.mubr.bf16.vlgmr.msra.gmra.mrb[0].mxu0 %v3328_v32  ;;  %1688 = vmatmul.mubr.bf16.vlgmr.msra.gmra.mrb[0].mxu1 %v3328_v32 }
  0x79   : > { %589 = vmatpush1.bf16.msra.mxu0 %v228_v36  ;;  %517 = vmatprep.mubr.bf16.mxu0 %v3331_v35 }
  0x7a   : > { %1697 = vmatprep.mubr.bf16.mxu1 %v3331_v35  ;;  %1769 = vmatpush1.bf16.msra.mxu1 %v1409_v37 }
  0x7b   : > { %590 = vmatprep.subr.bf16.mxu0 %v231_v40  ;;  %1770 = vmatprep.subr.bf16.mxu1 %v1412_v41 }
  0x7c   : > { %1448 = vperm.xlu0 %3320, %v3765_v54   ;;  %1453 = vperm.xlu1 %3321, %v3782_v61   ;;  %v3346_v54 = vld [vmem:[%s4986_s1 + $0x94] ss:$12 sps:$4 sm:$0xff]   ;;  %v3349_v61 = vld [vmem:[%s4986_s1 + $0xac] ss:$12 sps:$4 sm:$0xff]  }
  0x7d   : > { %591 = vmatpush1.bf16.msra.mxu0 %v230_v44 }
  0x7e   : > { %1771 = vmatpush1.bf16.msra.mxu1 %v1411_v45  ;;  %592 = vmatprep.subr.bf16.mxu0 %v233_v46 }
  0x7f   : > { %1772 = vmatprep.subr.bf16.mxu1 %v1414_v53 }
  0x80   : > { %518 = vmatmul.mubr.bf16.gmra.mrb[4].mxu0 %v3333_v52  ;;  %1698 = vmatmul.mubr.bf16.gmra.mrb[4].mxu1 %v3333_v52 }
  0x81   : > { %527 = vmatprep.mubr.bf16.mxu0 %v3334_v56  ;;  %1707 = vmatprep.mubr.bf16.mxu1 %v3334_v56 }
  0x82   : > { %593 = vmatpush1.bf16.msra.mxu0 %v232_v57  ;;  %1773 = vmatpush1.bf16.msra.mxu1 %v1413_v58 }
  0x83   : > { %1458 = vperm.xlu0 %3320, %v3777_v60   ;;  %1463 = vperm.xlu1 %3321, %v3794_v9   ;;  %v3348_v60 = vld [vmem:[%s4986_s1 + $0x90] ss:$12 sps:$4 sm:$0xff]   ;;  %v3352_v9 = vld [vmem:[%s4986_s1 + $0x8] ss:$12 sps:$4 sm:$0xff]  }
  0x87   : > { %1468 = vperm.xlu0 %3320, %v3789_v5   ;;  %1493 = vperm.xlu1 %3321, %v3841_v34   ;;  %v3351_v5 = vld [vmem:[%s4986_s1 + $0xa8] ss:$12 sps:$4 sm:$0xff]  }
  0x88   : > { %528 = vmatmul.mubr.bf16.gmra.mrb[8].mxu0 %v3336_v7  ;;  %1708 = vmatmul.mubr.bf16.gmra.mrb[8].mxu1 %v3336_v7 }
  0x89   : > { %537 = vmatprep.mubr.bf16.mxu0 %v3337_v10  ;;  %1717 = vmatprep.mubr.bf16.mxu1 %v3337_v10 }
  0x8b   : > { %1498 = vperm.xlu0 %3320, %v3836_v33   ;;  %1503 = vperm.xlu1 %3321, %v3856_v43  }
  0x8f   : > { %1508 = vperm.xlu0 %3320, %v3851_v42   ;;  %1473 = vperm.xlu1 %3321, %v3807_v17   ;;  %v3357_v17 = vld [vmem:[%s4986_s1 + $0x38] ss:$12 sps:$4 sm:$0xff]  }
  0x90   : > { %538 = vmatmul.mubr.bf16.gmra.mrb[12].mxu0 %v3339_v11  ;;  %1718 = vmatmul.mubr.bf16.gmra.mrb[12].mxu1 %v3339_v11 }
  0x91   : > { %547 = vmatprep.mubr.bf16.mxu0 %v3340_v12  ;;  %1727 = vmatprep.mubr.bf16.mxu1 %v3340_v12 }
  0x93   : > { %1478 = vperm.xlu0 %3320, %v3802_v16   ;;  %1483 = vperm.xlu1 %3321, %v3823_v25   ;;  %v3356_v16 = vld [vmem:[%s4986_s1 + $0x38] ss:$12 sps:$4 sm:$0xff]  }
  0x94   : > { %v3364_v25 = vld [vmem:[%s4986_s1 + $0x98] ss:$12 sps:$4 sm:$0xff]  }
  0x97   : > { %1488 = vperm.xlu0 %3320, %v3818_v24   ;;  %v3363_v24 = vld [vmem:[%s4986_s1 + $0x80] ss:$12 sps:$4 sm:$0xff]   ;;  %1147 = vrot.lane.b32.xlu1 %v3869_v62, %s3586_s18 }
  0x98   : > { %548 = vmatmul.mubr.bf16.gmra.mrb[16].mxu0 %v3342_v49  ;;  %1728 = vmatmul.mubr.bf16.gmra.mrb[16].mxu1 %v3342_v49 }
  0x99   : > { %557 = vmatprep.mubr.bf16.mxu0 %v3343_v55  ;;  %1737 = vmatprep.mubr.bf16.mxu1 %v3343_v55 }
  0x9b   : > { %1145 = vrot.lane.b32.xlu0 %v3872_v0, %s3586_s18  ;;  %1199 = vrot.lane.b32.xlu1 %v3875_v3, %s3587_s19 }
  0x9f   : > { %1197 = vrot.lane.b32.xlu0 %v3879_v6, %s3587_s19  ;;  %1288 = vrot.lane.b32.xlu1 %v3869_v62, %s3588_s20 }
  0xa0   : > { %558 = vmatmul.mubr.bf16.gmra.mrb[20].mxu0 %v3345_v48  ;;  %1738 = vmatmul.mubr.bf16.gmra.mrb[20].mxu1 %v3345_v48 }
  0xa1   : > { %567 = vmatprep.mubr.bf16.mxu0 %v3346_v54  ;;  %1747 = vmatprep.mubr.bf16.mxu1 %v3346_v54 }
  0xa3   : > { %1286 = vrot.lane.b32.xlu0 %v3872_v0, %s3588_s20 }
  0xa8   : > { %568 = vmatmul.mubr.bf16.gmra.mrb[24].mxu0 %v3348_v60  ;;  %1748 = vmatmul.mubr.bf16.gmra.mrb[24].mxu1 %v3348_v60 }
  0xa9   : > { %577 = vmatprep.mubr.bf16.mxu0 %v3349_v61  ;;  %1757 = vmatprep.mubr.bf16.mxu1 %v3349_v61 }
  0xb0   : > { %578 = vmatmul.mubr.bf16.gmra.mrb[28].mxu0 %v3351_v5  ;;  %1758 = vmatmul.mubr.bf16.gmra.mrb[28].mxu1 %v3351_v5 }
  0xb1   : > { %620 = vmatprep.mubr.bf16.mxu0 %v3582_v4  ;;  %1800 = vmatprep.mubr.bf16.mxu1 %v3582_v4 }
  0xb8   : > { %3073 = vmatmul.mubr.msk.bf16.vlgmr.msra.gmra.mrb[0].mxu0 %vm450_vm1, %v3352_v9  ;;  %3108 = vmatmul.mubr.msk.bf16.vlgmr.msra.gmra.mrb[0].mxu1 %vm450_vm1, %v3353_v13 }
  0xb9   : > { %630 = vmatprep.mubr.bf16.mxu0 %v3582_v4  ;;  %1810 = vmatprep.mubr.bf16.mxu1 %v3582_v4 }
  0xc0   : > { %3074 = vmatmul.mubr.msk.bf16.gmra.mrb[4].mxu0 %vm450_vm1, %v3354_v14  ;;  %3109 = vmatmul.mubr.msk.bf16.gmra.mrb[4].mxu1 %vm450_vm1, %v3355_v15 }
  0xc1   : > { %640 = vmatprep.mubr.bf16.mxu0 %v3582_v4  ;;  %1820 = vmatprep.mubr.bf16.mxu1 %v3582_v4 }
  0xc3   : > { %v4013_v29 = vpop.permute.xlu1 %262 }
  0xc6   : > { %v253_v30 = vpop.permute.xlu0 %252 }
  0xc7   : > { %v4015_v31 = vpop.permute.xlu1 %267 }
  0xc8   : > { %3075 = vmatmul.mubr.msk.bf16.gmra.mrb[8].mxu0 %vm450_vm1, %v3356_v16  ;;  %3110 = vmatmul.mubr.msk.bf16.gmra.mrb[8].mxu1 %vm450_vm1, %v3357_v17 }
  0xc9   : > { %650 = vmatprep.mubr.bf16.mxu0 %v3582_v4  ;;  %1830 = vmatprep.mubr.bf16.mxu1 %v3582_v4 }
  0xca   : > { %v258_v32 = vpop.permute.xlu0 %257 }
  0xcb   : > { %v4017_v33 = vpop.permute.xlu1 %277 }
  0xcf   : > { %v4021_v34 = vpop.permute.xlu1 %287 }
  0xd0   : > { %3076 = vmatmul.mubr.msk.bf16.gmra.mrb[12].mxu0 %vm450_vm1, %v3358_v18  ;;  %3111 = vmatmul.mubr.msk.bf16.gmra.mrb[12].mxu1 %vm450_vm1, %v3359_v19 }
  0xd1   : > { %660 = vmatprep.mubr.bf16.mxu0 %v3582_v4  ;;  %1840 = vmatprep.mubr.bf16.mxu1 %v3582_v4 }
  0xd3   : > { %v4025_v36 = vpop.permute.xlu1 %297 }
  0xd7   : > { %v4029_v38 = vpop.permute.xlu1 %307 }
  0xd8   : > { %3077 = vmatmul.mubr.msk.bf16.gmra.mrb[16].mxu0 %vm450_vm1, %v3360_v20  ;;  %3112 = vmatmul.mubr.msk.bf16.gmra.mrb[16].mxu1 %vm450_vm1, %v3361_v21 }
  0xd9   : > { %670 = vmatprep.mubr.bf16.mxu0 %v3582_v4  ;;  %1850 = vmatprep.mubr.bf16.mxu1 %v3582_v4 }
  0xdb   : > { %v4033_v40 = vpop.permute.xlu1 %317 }
  0xdf   : > { %v4037_v42 = vpop.permute.xlu1 %327 }
  0xe0   : > { %3078 = vmatmul.mubr.msk.bf16.gmra.mrb[20].mxu0 %vm450_vm1, %v3362_v22  ;;  %3113 = vmatmul.mubr.msk.bf16.gmra.mrb[20].mxu1 %vm450_vm1, %v3363_v24 }
  0xe1   : > { %680 = vmatprep.mubr.bf16.mxu0 %v3582_v4  ;;  %1860 = vmatprep.mubr.bf16.mxu1 %v3582_v4 }
  0xe3   : > { %v4045_v44 = vpop.permute.xlu1 %1004 }
  0xe4   : > { %5017 = vst [vmem:[#allocation14_spill] sm:$0xff] %v4045_v44 }
  0xe7   : > { %v4051_v46 = vpop.permute.xlu1 %1058 }
  0xe8   : > { %3079 = vmatmul.mubr.msk.bf16.gmra.mrb[24].mxu0 %vm450_vm1, %v3364_v25  ;;  %3114 = vmatmul.mubr.msk.bf16.gmra.mrb[24].mxu1 %vm450_vm1, %v3365_v26  ;;  %5019 = vst [vmem:[#allocation16_spill] sm:$0xff] %v4051_v46 }
  0xe9   : > { %690 = vmatprep.mubr.bf16.mxu0 %v3582_v4  ;;  %1870 = vmatprep.mubr.bf16.mxu1 %v3582_v4  ;;  %v4019_v4 = vpop.permute.xlu0 %272 }
  0xed   : > { %v4023_v35 = vpop.permute.xlu0 %282 }
  0xf0   : > { %3080 = vmatmul.mubr.msk.bf16.gmra.mrb[28].mxu0 %vm450_vm1, %v3366_v27  ;;  %3115 = vmatmul.mubr.msk.bf16.gmra.mrb[28].mxu1 %vm450_vm1, %v3367_v28 }
  0xf1   : > { %v4027_v37 = vpop.permute.xlu0 %292 }
  0xf2   : > { %v1434_v51 = vpop.permute.xlu1 %1433 }
  0xf5   : > { %v4031_v39 = vpop.permute.xlu0 %302 }
  0xf6   : > { %v1444_v53 = vpop.permute.xlu1 %1443 }
  0xf9   : > { %v4035_v41 = vpop.permute.xlu0 %312 }
  0xfb   : > { %v4055_v49 = vpop.permute.xlu1 %1453 }
  0xfd   : > { %v4043_v43 = vpop.permute.xlu0 %322 }
 0x101   : > { %v4049_v45 = vpop.permute.xlu0 %1002 }
 0x102   : > { %5018 = vst [vmem:[#allocation15_spill] sm:$0xff] %v4049_v45  ;;  %v4059_v27 = vpop.permute.xlu1 %1463 }
 0x105   : > { %v4053_v50 = vpop.permute.xlu0 %1056 }
 0x106   : > { %5020 = vst [vmem:[#allocation17_spill] sm:$0xff] %v4053_v50 }
 0x109   : > { %v1439_v52 = vpop.permute.xlu0 %1438 }
 0x10d   : > { %v1449_v62 = vpop.permute.xlu0 %1448 }
 0x111   : > { %v4057_v26 = vpop.permute.xlu0 %1458 }
 0x18b   : > { %v622_v56 = vpop.f32.mrb[0].mxu0  ;;  %v1802_v57 = vpop.f32.mrb[0].mxu1 }
 0x18c   : > { %v624_v58 = vpop.f32.mrb[1].mxu0  ;;  %v1804_v59 = vpop.f32.mrb[1].mxu1  ;;  %v3133_v0 = vadd.f32 %v622_v56, %v253_v30  ;;  %v3165_v12 = vadd.f32 %v1802_v57, %v1434_v51 }
 0x18d   : > { %v626_v63 = vpop.f32.mrb[2].mxu0  ;;  %v1806_v7 = vpop.f32.mrb[2].mxu1  ;;  %v3134_v55 = vadd.f32 %v624_v58, %v253_v30  ;;  %v3166_v48 = vadd.f32 %v1804_v59, %v1434_v51 }
 0x18e   : > { %v628_v10 = vpop.f32.mrb[3].mxu0  ;;  %v1808_v11 = vpop.f32.mrb[3].mxu1  ;;  %v701_v61 = vmul.f32 0.5, %v3133_v0  ;;  %v1881_v13 = vmul.f32 0.5, %v3165_v12  ;;  %v3135_v14 = vadd.f32 %v626_v63, %v258_v32  ;;  %v3167_v18 = vadd.f32 %v1806_v7, %v1439_v52 }
 0x18f   : > { %v702_v17 = vmul.f32 0.5, %v3134_v55  ;;  %v1882_v21 = vmul.f32 0.5, %v3166_v48  ;;  %v3136_v22 = vadd.f32 %v628_v10, %v258_v32  ;;  %v3168_v25 = vadd.f32 %v1808_v11, %v1439_v52 }
 0x190   : > { %3368 = vtanh.f32 %v701_v61  ;;  %v703_v24 = vmul.f32 0.5, %v3135_v14  ;;  %v1883_v28 = vmul.f32 0.5, %v3167_v18  ;;  %v4072_v14 = vpop.permute.xlu1 %1493 }
 0x191   : > { %3370 = vtanh.f32 %v1881_v13  ;;  %v704_v57 = vmul.f32 0.5, %v3136_v22  ;;  %v1884_v63 = vmul.f32 0.5, %v3168_v25 }
 0x192   : > { %3372 = vtanh.f32 %v702_v17 }
 0x193   : > { %v632_v54 = vpop.f32.mrb[4].mxu0  ;;  %v1812_v60 = vpop.f32.mrb[4].mxu1  ;;  %3374 = vtanh.f32 %v1882_v21 }
 0x194   : > { %v634_v5 = vpop.f32.mrb[5].mxu0  ;;  %v1814_v9 = vpop.f32.mrb[5].mxu1  ;;  %v3137_v30 = vadd.f32 %v632_v54, %v4013_v29  ;;  %3376 = vtanh.f32 %v703_v24  ;;  %v3169_v32 = vadd.f32 %v1812_v60, %v1444_v53 }
 0x195   : > { %v636_v15 = vpop.f32.mrb[6].mxu0  ;;  %v1816_v16 = vpop.f32.mrb[6].mxu1  ;;  %3378 = vtanh.f32 %v1883_v28  ;;  %v3138_v52 = vadd.f32 %v634_v5, %v4013_v29  ;;  %v3170_v55 = vadd.f32 %v1814_v9, %v1444_v53 }
 0x196   : > { %v638_v19 = vpop.f32.mrb[7].mxu0  ;;  %v1818_v20 = vpop.f32.mrb[7].mxu1  ;;  %v705_v12 = vmul.f32 0.5, %v3137_v30  ;;  %3380 = vtanh.f32 %v704_v57  ;;  %v3139_v48 = vadd.f32 %v636_v15, %v4015_v31  ;;  %v1885_v54 = vmul.f32 0.5, %v3169_v32 }
 0x197   : > { %3382 = vtanh.f32 %v1884_v63  ;;  %v3171_v61 = vadd.f32 %v1816_v16, %v1449_v62  ;;  %v4070_v60 = vpop.permute.xlu0 %1468  ;;  %v706_v17 = vmul.f32 0.5, %v3138_v52  ;;  %v3140_v29 = vadd.f32 %v638_v19, %v4015_v31  ;;  %v4097_v1 = vpop.permute.xlu1 %1503 }
 0x198   : > { %3384 = vtanh.f32 %v705_v12  ;;  %v1886_v18 = vmul.f32 0.5, %v3170_v55  ;;  %v707_v9 = vmul.f32 0.5, %v3139_v48  ;;  %v3172_v15 = vadd.f32 %v1818_v20, %v1449_v62 }
 0x199   : > { %3386 = vtanh.f32 %v1885_v54  ;;  %v1887_v30 = vmul.f32 0.5, %v3171_v61  ;;  %v708_v32 = vmul.f32 0.5, %v3140_v29 }
 0x19a   : > { %v3369_v13 = vpop.eup %3368  ;;  %3388 = vtanh.f32 %v706_v17 }
 0x19b   : > { %v642_v51 = vpop.f32.mrb[8].mxu0  ;;  %v1822_v56 = vpop.f32.mrb[8].mxu1  ;;  %v749_v28 = vmul.f32 0.5, %v3369_v13  ;;  %3390 = vtanh.f32 %v1886_v18 }
 0x19c   : > { %v644_v58 = vpop.f32.mrb[9].mxu0  ;;  %v1824_v59 = vpop.f32.mrb[9].mxu1  ;;  %v3141_v57 = vadd.f32 %v642_v51, %v4019_v4  ;;  %v3173_v55 = vadd.f32 %v1822_v56, %v4055_v49  ;;  %3392 = vtanh.f32 %v707_v9  ;;  %v1888_v51 = vmul.f32 0.5, %v3172_v15 }
 0x19d   : > { %v646_v7 = vpop.f32.mrb[10].mxu0  ;;  %v4062_v10 = vpop.f32.mrb[10].mxu1  ;;  %v3142_v61 = vadd.f32 %v644_v58, %v4019_v4  ;;  %v4092_v13 = vadd.f32 0.5, %v749_v28  ;;  %3394 = vtanh.f32 %v1887_v30  ;;  %v3174_v29 = vadd.f32 %v1824_v59, %v4055_v49 }
 0x19e   : > { %v4065_v11 = vpop.f32.mrb[11].mxu0  ;;  %v4067_v0 = vpop.f32.mrb[11].mxu1  ;;  %v709_v17 = vmul.f32 0.5, %v3141_v57  ;;  %3396 = vtanh.f32 %v708_v32  ;;  %v1889_v58 = vmul.f32 0.5, %v3173_v55 }
 0x19f   : > { %v3371_v5 = vpop.eup %3370  ;;  %v4095_v8 = vpop.permute.xlu0 %1498  ;;  %3398 = vtanh.f32 %v1888_v51  ;;  %v710_v30 = vmul.f32 0.5, %v3142_v61  ;;  %v3144_v57 = vadd.f32 %v4065_v11, %v4017_v33 }
 0x1a0   : > { %v3373_v53 = vpop.eup %3372  ;;  %v1929_v63 = vmul.f32 0.5, %v3371_v5  ;;  %3400 = vtanh.f32 %v709_v17 }
 0x1a1   : > { %v3375_v25 = vpop.eup %3374  ;;  %v750_v12 = vmul.f32 0.5, %v3373_v53  ;;  %v3143_v53 = vadd.f32 %v646_v7, %v4017_v33  ;;  %3402 = vtanh.f32 %v1889_v58 }
 0x1a2   : > { %v3377_v20 = vpop.eup %3376  ;;  %v1930_v54 = vmul.f32 0.5, %v3375_v25  ;;  %v4099_v18 = vadd.f32 0.5, %v1929_v63  ;;  %v3175_v25 = vadd.f32 %v4062_v10, %v4057_v26  ;;  %v3176_v10 = vadd.f32 %v4067_v0, %v4057_v26 }
 0x1a3   : > { %v652_v21 = vpop.f32.mrb[12].mxu0  ;;  %v4075_v22 = vpop.f32.mrb[12].mxu1  ;;  %v751_v56 = vmul.f32 0.5, %v3377_v20  ;;  %v4102_v15 = vadd.f32 0.5, %v750_v12  ;;  %v1890_v12 = vmul.f32 0.5, %v3174_v29  ;;  %v711_v61 = vmul.f32 0.5, %v3143_v53 }
 0x1a4   : > { %v4077_v24 = vpop.f32.mrb[13].mxu0  ;;  %v4079_v16 = vpop.f32.mrb[13].mxu1  ;;  %v4110_v28 = vadd.f32 0.5, %v1930_v54  ;;  %v3145_v33 = vadd.f32 %v652_v21, %v4023_v35  ;;  %v1891_v29 = vmul.f32 0.5, %v3175_v25  ;;  %v3177_v26 = vadd.f32 %v4075_v22, %v4059_v27 }
 0x1a5   : > { %v4082_v31 = vpop.f32.mrb[14].mxu0  ;;  %v4084_v19 = vpop.f32.mrb[14].mxu1  ;;  %v4124_v54 = vadd.f32 0.5, %v751_v56  ;;  %3404 = vtanh.f32 %v710_v30  ;;  %v712_v56 = vmul.f32 0.5, %v3144_v57  ;;  %v3146_v53 = vadd.f32 %v4077_v24, %v4023_v35 }
 0x1a6   : > { %v4086_v52 = vpop.f32.mrb[15].mxu0  ;;  %v4088_v62 = vpop.f32.mrb[15].mxu1  ;;  %3406 = vtanh.f32 %v1890_v12  ;;  %v1892_v47 = vmul.f32 0.5, %v3176_v10  ;;  %v713_v30 = vmul.f32 0.5, %v3145_v33  ;;  %v3147_v57 = vadd.f32 %v4082_v31, %v4021_v34 }
 0x1a7   : > { %v3379_v48 = vpop.eup %3378  ;;  %5021 = vst [vmem:[#allocation18_spill] sm:$0xff] %v4124_v54  ;;  %v4141_v25 = vpop.permute.xlu0 %1508  ;;  %3408 = vtanh.f32 %v711_v61  ;;  %v3148_v61 = vadd.f32 %v4086_v52, %v4021_v34 }
 0x1a8   : > { %v3381_v5 = vpop.eup %3380  ;;  %v1931_v4 = vmul.f32 0.5, %v3379_v48  ;;  %v1474_v22 = vpop.permute.xlu1 %1473  ;;  %3410 = vtanh.f32 %v1891_v29 }
 0x1a9   : > { %v3383_v9 = vpop.eup %3382  ;;  %v752_v20 = vmul.f32 0.5, %v3381_v5  ;;  %3412 = vtanh.f32 %v712_v56  ;;  %v716_v44 = vmul.f32 0.5, %v3148_v61 }
 0x1aa   : > { %v3385_v32 = vpop.eup %3384  ;;  %v1932_v51 = vmul.f32 0.5, %v3383_v9  ;;  %v4131_v17 = vadd.f32 0.5, %v1931_v4  ;;  %v3178_v4 = vadd.f32 %v4079_v16, %v4059_v27  ;;  %3414 = vtanh.f32 %v1892_v47 }
 0x1ab   : > { %v4106_v49 = vpop.f32.mrb[16].mxu0  ;;  %v4108_v59 = vpop.f32.mrb[16].mxu1  ;;  %v753_v23 = vmul.f32 0.5, %v3385_v32  ;;  %v4137_v9 = vadd.f32 0.5, %v752_v20  ;;  %v1893_v32 = vmul.f32 0.5, %v3177_v26  ;;  %v3179_v20 = vadd.f32 %v4084_v19, %v4070_v60 }
 0x1ac   : > { %v4114_v7 = vpop.f32.mrb[17].mxu0  ;;  %v4116_v63 = vpop.f32.mrb[17].mxu1  ;;  %5022 = vst [vmem:[#allocation19_spill] sm:$0xff] %v4131_v17  ;;  %v4143_v50 = vadd.f32 0.5, %v1932_v51  ;;  %v714_v51 = vmul.f32 0.5, %v3146_v53  ;;  %v1894_v29 = vmul.f32 0.5, %v3178_v4  ;;  %v3180_v19 = vadd.f32 %v4088_v62, %v4070_v60 }
 0x1ad   : > { %v4120_v55 = vpop.f32.mrb[18].mxu0  ;;  %v4122_v48 = vpop.f32.mrb[18].mxu1  ;;  %5023 = vst [vmem:[#allocation20_spill] sm:$0xff] %v4137_v9  ;;  %v4153_v10 = vadd.f32 0.5, %v753_v23  ;;  %3416 = vtanh.f32 %v713_v30  ;;  %v715_v53 = vmul.f32 0.5, %v3147_v57  ;;  %v3149_v34 = vadd.f32 %v4106_v49, %v4027_v37 }
 0x1ae   : > { %v4127_v11 = vpop.f32.mrb[19].mxu0  ;;  %v4129_v2 = vpop.f32.mrb[19].mxu1  ;;  %5024 = vst [vmem:[#allocation21_spill] sm:$0xff] %v4143_v50  ;;  %v1895_v60 = vmul.f32 0.5, %v3179_v20  ;;  %v3181_v62 = vadd.f32 %v4108_v59, %v1474_v22  ;;  %v1896_v49 = vmul.f32 0.5, %v3180_v19  ;;  %v3182_v6 = vadd.f32 %v4116_v63, %v1474_v22 }
 0x1af   : > { %v3387_v5 = vpop.eup %3386  ;;  %5025 = vst [vmem:[#allocation22_spill] sm:$0xff] %v4153_v10  ;;  %3418 = vtanh.f32 %v1893_v32  ;;  %v717_v32 = vmul.f32 0.5, %v3149_v34  ;;  %v3151_v59 = vadd.f32 %v4120_v55, %v4025_v36 }
 0x1b0   : > { %v3389_v0 = vpop.eup %3388  ;;  %v1933_v24 = vmul.f32 0.5, %v3387_v5  ;;  %3420 = vtanh.f32 %v714_v51 }
 0x1b1   : > { %v3391_v21 = vpop.eup %3390  ;;  %v754_v5 = vmul.f32 0.5, %v3389_v0  ;;  %3422 = vtanh.f32 %v1894_v29  ;;  %v3152_v29 = vadd.f32 %v4127_v11, %v4025_v36 }
 0x1b2   : > { %v3393_v58 = vpop.eup %3392  ;;  %v1934_v56 = vmul.f32 0.5, %v3391_v21  ;;  %v4173_v0 = vadd.f32 0.5, %v1933_v24  ;;  %v3150_v21 = vadd.f32 %v4114_v7, %v4027_v37  ;;  %v1479_v24 = vpop.permute.xlu0 %1478  ;;  %3424 = vtanh.f32 %v715_v53 }
 0x1b3   : > { %v3395_v35 = vpop.eup %3394  ;;  %v4149_v12 = vpop.f32.mrb[20].mxu0  ;;  %v755_v4 = vmul.f32 0.5, %v3393_v58  ;;  %v4178_v57 = vadd.f32 0.5, %v754_v5  ;;  %3426 = vtanh.f32 %v1895_v60  ;;  %v1897_v37 = vmul.f32 0.5, %v3181_v62 }
 0x1b4   : > { %v4151_v27 = vpop.f32.mrb[20].mxu1  ;;  %v3397_v16 = vpop.eup %3396  ;;  %5027 = vst [vmem:[#allocation24_spill] sm:$0xff] %v4173_v0  ;;  %v1935_v20 = vmul.f32 0.5, %v3395_v35  ;;  %v3183_v7 = vadd.f32 %v4122_v48, %v1479_v24  ;;  %3428 = vtanh.f32 %v716_v44  ;;  %v718_v5 = vmul.f32 0.5, %v3150_v21 }
 0x1b5   : > { %v4157_v31 = vpop.f32.mrb[21].mxu0  ;;  %v4159_v33 = vpop.f32.mrb[21].mxu1  ;;  %5028 = vst [vmem:[#allocation25_spill] sm:$0xff] %v4178_v57  ;;  %v4190_v22 = vadd.f32 0.5, %v755_v4  ;;  %v1898_v48 = vmul.f32 0.5, %v3182_v6  ;;  %v719_v44 = vmul.f32 0.5, %v3151_v59  ;;  %v3184_v21 = vadd.f32 %v4129_v2, %v1479_v24 }
 0x1b6   : > { %v4163_v26 = vpop.f32.mrb[22].mxu0  ;;  %v4165_v46 = vpop.f32.mrb[22].mxu1  ;;  %v3153_v6 = vadd.f32 %v4149_v12, %v4031_v39  ;;  %v720_v2 = vmul.f32 0.5, %v3152_v29 }
 0x1b7   : > { %v3399_v23 = vpop.eup %3398  ;;  %v4169_v52 = vpop.f32.mrb[23].mxu0  ;;  %5030 = vst [vmem:[#allocation27_spill] sm:$0xff] %v4190_v22  ;;  %3430 = vtanh.f32 %v1896_v49 }
 0x1b8   : > { %v4171_v45 = vpop.f32.mrb[23].mxu1  ;;  %v3401_v47 = vpop.eup %3400  ;;  %3432 = vtanh.f32 %v717_v32 }
 0x1b9   : > { %5026 = vst [vmem:[#allocation23_spill] sm:$0xff] %v4171_v45  ;;  %v3403_v30 = vpop.eup %3402  ;;  %v4181_v45 = vadd.f32 0.5, %v1934_v56  ;;  %v756_v56 = vmul.f32 0.5, %v3397_v16  ;;  %v757_v53 = vmul.f32 0.5, %v3401_v47  ;;  %3434 = vtanh.f32 %v1897_v37  ;;  %v1484_v32 = vpop.permute.xlu1 %1483 }
 0x1ba   : > { %v3405_v3 = vpop.eup %3404  ;;  %v1937_v4 = vmul.f32 0.5, %v3403_v30  ;;  %v1899_v47 = vmul.f32 0.5, %v3183_v7  ;;  %v4215_v30 = vmul.f32 0.5, %v3399_v23  ;;  %3436 = vtanh.f32 %v718_v5  ;;  %v4223_v7 = vpop.permute.xlu0 %1488 }
 0x1bb   : > { %5029 = vst [vmem:[#allocation26_spill] sm:$0xff] %v4181_v45  ;;  %v3407_v58 = vpop.eup %3406  ;;  %v4186_v51 = vpop.f32.mrb[24].mxu0  ;;  %v758_v16 = vmul.f32 0.5, %v3405_v3  ;;  %v4213_v45 = vadd.f32 0.5, %v1935_v20  ;;  %v4219_v59 = vadd.f32 0.5, %v756_v56  ;;  %v781_v57 = vadd.f32 0.5, %v757_v53 }
 0x1bc   : > { %v4188_v61 = vpop.f32.mrb[24].mxu1  ;;  %v3409_v63 = vpop.eup %3408  ;;  %5032 = vst [vmem:[#allocation29_spill] sm:$0xff] %v4215_v30  ;;  %3438 = vtanh.f32 %v1898_v48  ;;  %v1900_v3 = vmul.f32 0.5, %v3184_v21  ;;  %5034 = vst [vmem:[#allocation31_spill] sm:$0xff] %v4223_v7  ;;  %v1961_v12 = vadd.f32 0.5, %v1937_v4  ;;  %v721_v20 = vmul.f32 0.5, %v3153_v6 }
 0x1bd   : > { %v4194_v19 = vpop.f32.mrb[25].mxu0  ;;  %v4196_v55 = vpop.f32.mrb[25].mxu1  ;;  %5031 = vst [vmem:[#allocation28_spill] sm:$0xff] %v4213_v45  ;;  %5033 = vst [vmem:[#allocation30_spill] sm:$0xff] %v4219_v59  ;;  %3440 = vtanh.f32 %v719_v44  ;;  %v3185_v23 = vadd.f32 %v4151_v27, %v1484_v32  ;;  %v782_v5 = vadd.f32 0.5, %v758_v16  ;;  %v1938_v29 = vmul.f32 0.5, %v3407_v58 }
 0x1be   : > { %v3411_v35 = vpop.eup %3410  ;;  %v4198_v34 = vpop.f32.mrb[26].mxu0  ;;  %3442 = vtanh.f32 %v1899_v47  ;;  %v3154_v56 = vadd.f32 %v4157_v31, %v4031_v39  ;;  %v805_v59 = vld [vmem:[#allocation4] sm:$0xff]  ;;  %v759_v4 = vmul.f32 0.5, %v3409_v63  ;;  %v3186_v27 = vadd.f32 %v4159_v33, %v1484_v32  ;;  %v806_v33 = vld [vmem:[#allocation4 + $0x8] sm:$0xff] }
 0x1bf   : > { %v4200_v60 = vpop.f32.mrb[26].mxu1  ;;  %v3413_v62 = vpop.eup %3412  ;;  %3444 = vtanh.f32 %v720_v2  ;;  %v1901_v44 = vmul.f32 0.5, %v3185_v23  ;;  %v1986_v47 = vld [vmem:[#allocation4 + $0x40] sm:$0xff]  ;;  %v1939_v39 = vmul.f32 0.5, %v3411_v35  ;;  %v3155_v45 = vadd.f32 %v4163_v26, %v4029_v38 }
 0x1c0   : > { %v4203_v36 = vpop.f32.mrb[27].mxu0  ;;  %v4205_v11 = vpop.f32.mrb[27].mxu1  ;;  %v722_v31 = vmul.f32 0.5, %v3154_v56  ;;  %v760_v32 = vmul.f32 0.5, %v3413_v62  ;;  %v1902_v23 = vmul.f32 0.5, %v3186_v27  ;;  %v3187_v10 = vadd.f32 %v4165_v46, %v4223_v7  ;;  %v1987_v62 = vld [vmem:[#allocation4 + $0x48] sm:$0xff] }
 0x1c1   : > { %v4207_v22 = vpop.eup %3414  ;;  %3446 = vtanh.f32 %v1900_v3  ;;  %v4259_v26 = vmul.f32 %v805_v59, %v781_v57  ;;  %v1962_v56 = vadd.f32 0.5, %v1938_v29  ;;  %v723_v9 = vmul.f32 0.5, %v3155_v45  ;;  %v807_v59 = vld [vmem:[#allocation4 + $0x10] sm:$0xff] }
 0x1c2   : > { %v4211_v49 = vpop.eup %3416  ;;  %3448 = vtanh.f32 %v721_v20  ;;  %v4263_v54 = vmul.f32 %v1986_v47, %v1961_v12  ;;  %v1903_v20 = vmul.f32 0.5, %v3187_v10  ;;  %v3156_v46 = vadd.f32 %v4169_v52, %v4029_v38  ;;  %v1988_v38 = vld [vmem:[#allocation4 + $0x50] sm:$0xff]  ;;  %v808_v52 = vld [vmem:[#allocation4 + $0x18] sm:$0xff] }
 0x1c3   : > { %v4217_v24 = vpop.eup %3418  ;;  %v4230_v53 = vpop.f32.mrb[28].mxu0  ;;  %3450 = vtanh.f32 %v1901_v44  ;;  %v783_v7 = vadd.f32 0.5, %v759_v4  ;;  %v3157_v57 = vadd.f32 %v4186_v51, %v4035_v41  ;;  %v1963_v12 = vadd.f32 0.5, %v1939_v39 }
 0x1c4   : > { %v4221_v37 = vpop.eup %3420  ;;  %v4232_v48 = vpop.f32.mrb[28].mxu1  ;;  %3452 = vtanh.f32 %v722_v31  ;;  %v784_v29 = vadd.f32 0.5, %v760_v32  ;;  %v724_v44 = vmul.f32 0.5, %v3156_v46  ;;  %v4277_v47 = vmul.f32 %v1987_v62, %v1962_v56 }
 0x1c5   : > { %v4226_v30 = vpop.eup %3422  ;;  %v4237_v6 = vpop.f32.mrb[29].mxu0  ;;  %3454 = vtanh.f32 %v1902_v23  ;;  %v3189_v4 = vadd.f32 %v4188_v61, %v4072_v14  ;;  %v761_v31 = vmul.f32 0.5, %v4211_v49  ;;  %v3190_v39 = vadd.f32 %v4196_v55, %v4072_v14 }
 0x1c6   : > { %v4234_v21 = vpop.eup %3424  ;;  %v4239_v16 = vpop.f32.mrb[29].mxu1  ;;  %3456 = vtanh.f32 %v723_v9  ;;  %v3158_v9 = vadd.f32 %v4194_v19, %v4035_v41  ;;  %v4291_v32 = vmul.f32 %v807_v59, %v783_v7  ;;  %v3159_v61 = vadd.f32 %v4198_v34, %v4033_v40 }
 0x1c7   : > { %v4241_v58 = vpop.eup %3426  ;;  %v4245_v0 = vpop.f32.mrb[30].mxu0  ;;  %3458 = vtanh.f32 %v3157_v57  ;;  %v4298_v49 = vmul.f32 %v1988_v38, %v1963_v12  ;;  %v4300_v56 = vmul.f32 %v808_v52, %v784_v29  ;;  %v3191_v41 = vadd.f32 %v4200_v60, %v4095_v8  ;;  %v1989_v60 = vld [vmem:[#allocation4 + $0x58] sm:$0xff]  ;;  %v809_v57 = vld [vmem:[#allocation4 + $0x20] sm:$0xff] }
 0x1c8   : > { %v4247_v63 = vpop.f32.mrb[30].mxu1  ;;  %v4249_v2 = vpop.eup %3428  ;;  %3460 = vtanh.f32 %v1903_v20  ;;  %v762_v19 = vmul.f32 0.5, %v4221_v37  ;;  %v1942_v55 = vmul.f32 0.5, %v4226_v30  ;;  %v3160_v34 = vadd.f32 %v4203_v36, %v4033_v40  ;;  %v1990_v36 = vld [vmem:[#allocation4 + $0x60] sm:$0xff] }
 0x1c9   : > { %v4253_v50 = vpop.f32.mrb[31].mxu0  ;;  %v4255_v35 = vpop.f32.mrb[31].mxu1  ;;  %v785_v62 = vadd.f32 0.5, %v761_v31  ;;  %v3192_v20 = vadd.f32 %v4205_v11, %v4095_v8  ;;  %v763_v37 = vmul.f32 0.5, %v4234_v21  ;;  %v3161_v30 = vadd.f32 %v4230_v53, %v4043_v43 }
 0x1ca   : > { %5035 = vst [vmem:[#allocation32_spill] sm:$0xff] %v4255_v35  ;;  %v4257_v3 = vpop.eup %3430  ;;  %v4269_v35 = vmul.f32 %v806_v33, %v782_v5  ;;  %v1940_v5 = vmul.f32 0.5, %v4207_v22  ;;  %v1941_v22 = vmul.f32 0.5, %v4217_v24  ;;  %3462 = vtanh.f32 %v724_v44 }
 0x1cb   : > { %v4261_v17 = vpop.eup %3432  ;;  %3464 = vtanh.f32 %v3189_v4  ;;  %v1943_v12 = vmul.f32 0.5, %v4241_v58  ;;  %v764_v29 = vmul.f32 0.5, %v4249_v2  ;;  %v3193_v8 = vadd.f32 %v4232_v48, %v4097_v1  ;;  %v810_v58 = vld [vmem:[#allocation4 + $0x28] sm:$0xff] }
 0x1cc   : > { %v4267_v27 = vpop.eup %3434  ;;  %3466 = vtanh.f32 %v3158_v9  ;;  %v1964_v7 = vadd.f32 0.5, %v1940_v5  ;;  %v1965_v59 = vadd.f32 0.5, %v1941_v22  ;;  %v786_v44 = vadd.f32 0.5, %v762_v19  ;;  %v1991_v2 = vld [vmem:[#allocation4 + $0x68] sm:$0xff] }
 0x1cd   : > { %v4273_v45 = vpop.eup %3436  ;;  %3468 = vtanh.f32 %v3190_v39  ;;  %v1966_v38 = vadd.f32 0.5, %v1942_v55  ;;  %v3162_v21 = vadd.f32 %v4237_v6, %v4043_v43  ;;  %v4333_v5 = vmul.f32 %v809_v57, %v785_v62  ;;  %v811_v39 = vld [vmem:[#allocation4 + $0x30] sm:$0xff] }
 0x1ce   : > { %v4275_v10 = vpop.eup %3438  ;;  %3470 = vtanh.f32 %v3159_v61  ;;  %v4331_v52 = vmul.f32 %v1989_v60, %v1964_v7  ;;  %v3194_v48 = vadd.f32 %v4239_v16, %v4097_v1  ;;  %v4337_v31 = vmul.f32 %v1990_v36, %v1965_v59  ;;  %v1992_v16 = vld [vmem:[#allocation4 + $0x70] sm:$0xff] }
 0x1cf   : > { %v4282_v51 = vpop.eup %3440  ;;  %3472 = vtanh.f32 %v3191_v41  ;;  %v787_v9 = vadd.f32 0.5, %v763_v37  ;;  %v3163_v43 = vadd.f32 %v4245_v0, %v4037_v42  ;;  %v1967_v22 = vadd.f32 0.5, %v1943_v12 }
 0x1d0   : > { %v4289_v33 = vpop.eup %3442  ;;  %3474 = vtanh.f32 %v3160_v34  ;;  %v788_v61 = vadd.f32 0.5, %v764_v29  ;;  %v4346_v55 = vmul.f32 %v810_v58, %v786_v44  ;;  %v4348_v1 = vmul.f32 %v1991_v2, %v1966_v38  ;;  %v812_v34 = vld [vmem:[#allocation4 + $0x38] sm:$0xff] }
 0x1d1   : > { %v4296_v23 = vpop.eup %3444  ;;  %3476 = vtanh.f32 %v3192_v20  ;;  %v3195_v0 = vadd.f32 %v4247_v63, %v4141_v25  ;;  %v765_v62 = vmul.f32 0.5, %v4261_v17  ;;  %v4356_v57 = vmul.f32 %v811_v39, %v787_v9 }
 0x1d2   : > { %v4304_v14 = vpop.eup %3446  ;;  %3478 = vtanh.f32 %v3161_v30  ;;  %v4359_v59 = vmul.f32 0.5, %v4257_v3  ;;  %v4362_v63 = vmul.f32 %v1992_v16, %v1967_v22  ;;  %v4364_v36 = vmul.f32 %v812_v34, %v788_v61  ;;  %v5040_v61 = vld [vmem:[#allocation22_spill] sm:$0xff] }
 0x1d3   : > { %v4310_v24 = vpop.eup %3448  ;;  %3480 = vtanh.f32 %v3193_v8  ;;  %v5036_v8 = vld [vmem:[#allocation18_spill] sm:$0xff]  ;;  %v767_v22 = vmul.f32 0.5, %v4282_v51 }
 0x1d4   : > { %v4314_v46 = vpop.eup %3450  ;;  %3482 = vtanh.f32 %v3162_v21  ;;  %v766_v21 = vmul.f32 0.5, %v4273_v45 }
 0x1d5   : > { %v4319_v40 = vpop.eup %3452  ;;  %3484 = vtanh.f32 %v3194_v48 }
 0x1d6   : > { %v4325_v11 = vpop.eup %3454  ;;  %3486 = vtanh.f32 %v3163_v43  ;;  %v5039_v43 = vld [vmem:[#allocation21_spill] sm:$0xff]  ;;  %v790_v16 = vadd.f32 0.5, %v766_v21 }
 0x1d7   : > { %v4329_v53 = vpop.eup %3456 }
 0x1d8   : > { %v3459_v4 = vpop.eup %3458 }
 0x1d9   : > { %v4341_v6 = vpop.eup %3460  ;;  %v821_v41 = vmul.f32 %v3459_v4, %v4092_v13  ;;  %v3164_v13 = vadd.f32 %v4253_v50, %v4037_v42  ;;  %v1945_v42 = vmul.f32 0.5, %v4267_v27  ;;  %v5037_v27 = vld [vmem:[#allocation19_spill] sm:$0xff] }
 0x1da   : > { %v4344_v19 = vpop.eup %3462 }
 0x1db   : > { %v3465_v7 = vpop.eup %3464  ;;  %v829_v20 = vadd.f32 %v821_v41, %v4259_v26  ;;  %v1969_v9 = vadd.f32 0.5, %v1945_v42 }
 0x1dc   : > { %v3467_v60 = vpop.eup %3466  ;;  %v2002_v37 = vmul.f32 %v3465_v7, %v4099_v18  ;;  %v789_v18 = vadd.f32 0.5, %v765_v62 }
 0x1dd   : > { %v3469_v30 = vpop.eup %3468  ;;  %3488 = vtanh.f32 %v829_v20  ;;  %853 = vst [vmem:[#allocation4] sm:$0xff] %v829_v20  ;;  %v822_v17 = vmul.f32 %v3467_v60, %v4102_v15  ;;  %v5042_v20 = vld [vmem:[#allocation25_spill] sm:$0xff] }
 0x1de   : > { %v3471_v26 = vpop.eup %3470  ;;  %v2010_v50 = vadd.f32 %v2002_v37, %v4263_v54  ;;  %v2003_v3 = vmul.f32 %v3469_v30, %v4110_v28  ;;  %3490 = vtanh.f32 %v3195_v0  ;;  %v1946_v28 = vmul.f32 0.5, %v4275_v10  ;;  %v5041_v0 = vld [vmem:[#allocation24_spill] sm:$0xff]  ;;  %v5044_v37 = vld [vmem:[#allocation23_spill] sm:$0xff] }
 0x1df   : > { %v3473_v12 = vpop.eup %3472  ;;  %v830_v29 = vadd.f32 %v822_v17, %v4269_v35  ;;  %v823_v44 = vmul.f32 %v3471_v26, %v5036_v8  ;;  %3492 = vtanh.f32 %v3164_v13  ;;  %v5038_v35 = vld [vmem:[#allocation20_spill] sm:$0xff]  ;;  %v5045_v26 = vld [vmem:[#allocation26_spill] sm:$0xff] }
 0x1e0   : > { %v3475_v38 = vpop.eup %3474  ;;  %3494 = vtanh.f32 %v2010_v50  ;;  %2034 = vst [vmem:[#allocation4 + $0x40] sm:$0xff] %v2010_v50  ;;  %v2011_v15 = vadd.f32 %v2003_v3, %v4277_v47  ;;  %v2004_v58 = vmul.f32 %v3473_v12, %v5037_v27  ;;  %v1970_v62 = vadd.f32 0.5, %v1946_v28  ;;  %v5046_v12 = vld [vmem:[#allocation27_spill] sm:$0xff] }
 0x1e1   : > { %v3477_v54 = vpop.eup %3476  ;;  %3496 = vtanh.f32 %v830_v29  ;;  %854 = vst [vmem:[#allocation4 + $0x8] sm:$0xff] %v830_v29  ;;  %v831_v2 = vadd.f32 %v823_v44, %v4291_v32  ;;  %v824_v48 = vmul.f32 %v3475_v38, %v5038_v35  ;;  %v791_v50 = vadd.f32 0.5, %v767_v22  ;;  %v5047_v44 = vld [vmem:[#allocation32_spill] sm:$0xff] }
 0x1e2   : > { %v3479_v4 = vpop.eup %3478  ;;  %3498 = vtanh.f32 %v2011_v15  ;;  %2035 = vst [vmem:[#allocation4 + $0x48] sm:$0xff] %v2011_v15  ;;  %v2012_v45 = vadd.f32 %v2004_v58, %v4298_v49  ;;  %v2005_v39 = vmul.f32 %v3477_v54, %v5039_v43  ;;  %v3196_v38 = vadd.f32 %v5047_v44, %v4141_v25  ;;  %v5048_v58 = vld [vmem:[#allocation28_spill] sm:$0xff] }
 0x1e3   : > { %v3481_v47 = vpop.eup %3480  ;;  %3500 = vtanh.f32 %v831_v2  ;;  %855 = vst [vmem:[#allocation4 + $0x10] sm:$0xff] %v831_v2  ;;  %v832_v10 = vadd.f32 %v824_v48, %v4300_v56  ;;  %v825_v41 = vmul.f32 %v3479_v4, %v5040_v61  ;;  %v5043_v56 = vld [vmem:[#allocation31_spill] sm:$0xff]  ;;  %v1947_v15 = vmul.f32 0.5, %v4289_v33 }
 0x1e4   : > { %v3483_v32 = vpop.eup %3482  ;;  %3502 = vtanh.f32 %v2012_v45  ;;  %2036 = vst [vmem:[#allocation4 + $0x50] sm:$0xff] %v2012_v45  ;;  %v2013_v34 = vadd.f32 %v2005_v39, %v4331_v52  ;;  %v2006_v7 = vmul.f32 %v3481_v47, %v5041_v0  ;;  %v3188_v30 = vadd.f32 %v5044_v37, %v5043_v56 }
 0x1e5   : > { %v3485_v49 = vpop.eup %3484  ;;  %3504 = vtanh.f32 %v832_v10  ;;  %856 = vst [vmem:[#allocation4 + $0x18] sm:$0xff] %v832_v10  ;;  %v833_v51 = vadd.f32 %v825_v41, %v4333_v5  ;;  %v826_v13 = vmul.f32 %v3483_v32, %v5042_v20  ;;  %v768_v28 = vmul.f32 0.5, %v4296_v23 }
 0x1e6   : > { %v3487_v60 = vpop.eup %3486  ;;  %3506 = vtanh.f32 %v2013_v34  ;;  %2037 = vst [vmem:[#allocation4 + $0x58] sm:$0xff] %v2013_v34  ;;  %v2014_v17 = vadd.f32 %v2006_v7, %v4337_v31  ;;  %v2007_v52 = vmul.f32 %v3485_v49, %v5045_v26  ;;  %v1904_v2 = vmul.f32 0.5, %v3188_v30 }
 0x1e7   : > { %v3489_v42 = vpop.eup %3488  ;;  %3508 = vtanh.f32 %v833_v51  ;;  %857 = vst [vmem:[#allocation4 + $0x20] sm:$0xff] %v833_v51  ;;  %v834_v3 = vadd.f32 %v826_v13, %v4346_v55  ;;  %v827_v5 = vmul.f32 %v3487_v60, %v5046_v12  ;;  %v1948_v25 = vmul.f32 0.5, %v4304_v14  ;;  %v5050_v12 = vld [vmem:[#allocation29_spill] sm:$0xff] }
 0x1e8   : > { %v3491_v29 = vpop.eup %3490  ;;  %3510 = vtanh.f32 %v2014_v17  ;;  %2038 = vst [vmem:[#allocation4 + $0x60] sm:$0xff] %v2014_v17  ;;  %v2015_v8 = vadd.f32 %v2007_v52, %v4348_v1  ;;  %v845_v21 = vmul.f32 %v3489_v42, %v789_v18  ;;  %v5049_v1 = vld [vmem:[#allocation30_spill] sm:$0xff]  ;;  %v1971_v39 = vadd.f32 0.5, %v1947_v15  ;;  %v1993_v52 = vld [vmem:[#allocation4 + $0x78] sm:$0xff] }
 0x1e9   : > { %v3493_v31 = vpop.eup %3492  ;;  %3512 = vtanh.f32 %v834_v3  ;;  %858 = vst [vmem:[#allocation4 + $0x28] sm:$0xff] %v834_v3  ;;  %v835_v27 = vadd.f32 %v827_v5, %v4356_v57  ;;  %v2008_v55 = vmul.f32 %v3491_v29, %v5048_v58  ;;  %v769_v57 = vmul.f32 0.5, %v4310_v24 }
 0x1ea   : > { %v3495_v54 = vpop.eup %3494  ;;  %3514 = vtanh.f32 %v2015_v8  ;;  %2039 = vst [vmem:[#allocation4 + $0x68] sm:$0xff] %v2015_v8  ;;  %v828_v35 = vmul.f32 %v3493_v31, %v5049_v1  ;;  %v1949_v47 = vmul.f32 0.5, %v4314_v46  ;;  %v792_v10 = vadd.f32 0.5, %v768_v28 }
 0x1eb   : > { %v3497_v48 = vpop.eup %3496  ;;  %3516 = vtanh.f32 %v835_v27  ;;  %859 = vst [vmem:[#allocation4 + $0x30] sm:$0xff] %v835_v27  ;;  %v2016_v33 = vadd.f32 %v2008_v55, %v4362_v63  ;;  %v2026_v18 = vmul.f32 %v3495_v54, %v1969_v9  ;;  %v770_v61 = vmul.f32 0.5, %v4319_v40 }
 0x1ec   : > { %v3499_v4 = vpop.eup %3498  ;;  %v836_v45 = vadd.f32 %v828_v35, %v4364_v36  ;;  %3518 = vtanh.f32 %v3196_v38  ;;  %v846_v23 = vmul.f32 %v3497_v48, %v790_v16  ;;  %v1968_v24 = vadd.f32 0.5, %v4359_v59 }
 0x1ed   : > { %v3501_v43 = vpop.eup %3500  ;;  %3520 = vtanh.f32 %v2016_v33  ;;  %2040 = vst [vmem:[#allocation4 + $0x70] sm:$0xff] %v2016_v33  ;;  %v2027_v22 = vmul.f32 %v3499_v4, %v1970_v62  ;;  %v1972_v36 = vadd.f32 0.5, %v1948_v25  ;;  %v1950_v41 = vmul.f32 0.5, %v4325_v11  ;;  %v4421_v4 = vpop.permute.xlu0 %1145 }
 0x1ee   : > { %v3503_v14 = vpop.eup %3502  ;;  %3522 = vtanh.f32 %v836_v45  ;;  %860 = vst [vmem:[#allocation4 + $0x38] sm:$0xff] %v836_v45  ;;  %v847_v63 = vmul.f32 %v3501_v43, %v791_v50  ;;  %v793_v34 = vadd.f32 0.5, %v769_v57  ;;  %v771_v46 = vmul.f32 0.5, %v4329_v53  ;;  %v4423_v57 = vpop.permute.xlu1 %1147 }
 0x1ef   : > { %v3505_v9 = vpop.eup %3504  ;;  %v2028_v32 = vmul.f32 %v3503_v14, %v1971_v39  ;;  %v1973_v62 = vadd.f32 0.5, %v1949_v47  ;;  %3524 = vtanh.f32 %v1904_v2  ;;  %v794_v13 = vadd.f32 0.5, %v770_v61 }
 0x1f0   : > { %v3507_v16 = vpop.eup %3506  ;;  %v861_v0 = vpack.c.bf16 %v847_v63, %v845_v21  ;;  %v848_v7 = vmul.f32 %v3505_v9, %v792_v10  ;;  %v1951_v60 = vmul.f32 0.5, %v4341_v6  ;;  %v1974_v37 = vadd.f32 0.5, %v1950_v41  ;;  %v5051_v10 = vld [vmem:[#allocation12_spill] sm:$0xff] }
 0x1f1   : > { %v3509_v49 = vpop.eup %3508  ;;  %v2042_v40 = vpack.c.bf16 %v2028_v32, %v2026_v18  ;;  %v2029_v51 = vmul.f32 %v3507_v16, %v1972_v36  ;;  %v772_v53 = vmul.f32 0.5, %v4344_v19  ;;  %v795_v42 = vadd.f32 0.5, %v771_v46  ;;  %v4425_v45 = vpop.permute.xlu0 %1197  ;;  %v5052_v16 = vld [vmem:[#allocation13_spill] sm:$0xff] }
 0x1f2   : > { %v3511_v20 = vpop.eup %3510  ;;  %869 = vrot.lane.b32.xlu0 %v861_v0, %s3589_s21  ;;  %v862_v11 = vpack.c.bf16 %v848_v7, %v846_v23  ;;  %v849_v59 = vmul.f32 %v3509_v49, %v793_v34  ;;  %v1960_v6 = vadd.f32 0.5, %v5050_v12  ;;  %v1975_v8 = vadd.f32 0.5, %v1951_v60  ;;  %v4427_v23 = vpop.permute.xlu1 %1199 }
 0x1f3   : > { %v3513_v56 = vpop.eup %3512  ;;  %v2043_v30 = vpack.c.bf16 %v2029_v51, %v2027_v22  ;;  %v2030_v17 = vmul.f32 %v3511_v20, %v1973_v62  ;;  %v2001_v21 = vmul.f32 %v1993_v52, %v1968_v24  ;;  %v796_v19 = vadd.f32 0.5, %v772_v53  ;;  %v5056_v52 = vld [vmem:[#allocation17_spill] sm:$0xff] }
 0x1f4   : > { %v3515_v26 = vpop.eup %3514  ;;  %871 = vrot.lane.b32.xlu1 %v862_v11, %s3589_s21  ;;  %v850_v50 = vmul.f32 %v3513_v56, %v794_v13  ;;  %v5053_v56 = vld [vmem:[#allocation14_spill] sm:$0xff]  ;;  %v4521_v12 = vsel %vm1149_vm6, %v4421_v4, %v4423_v57 }
 0x1f5   : > { %v3517_v3 = vpop.eup %3516  ;;  %v2031_v5 = vmul.f32 %v3515_v26, %v1974_v37  ;;  %v4429_v43 = vpop.permute.xlu0 %1286  ;;  %v5054_v37 = vld [vmem:[#allocation15_spill] sm:$0xff]  ;;  %v5055_v26 = vld [vmem:[#allocation16_spill] sm:$0xff] }
 0x1f6   : > { %v3519_v29 = vpop.eup %3518  ;;  %2050 = vrot.lane.b32.xlu0 %v2042_v40, %s3589_s21  ;;  %v851_v44 = vmul.f32 %v3517_v3, %v795_v42  ;;  %v4431_v39 = vpop.permute.xlu1 %1288  ;;  %v4499_v53 = vsel %vm1006_vm4, %v5054_v37, %v5053_v56  ;;  %v4510_v42 = vsel %vm1060_vm5, %v5056_v52, %v5055_v26 }
 0x1f7   : > { %v3521_v38 = vpop.eup %3520  ;;  %v2009_v31 = vmul.f32 %v3519_v29, %v1960_v6 }
 0x1f8   : > { %v3523_v15 = vpop.eup %3522  ;;  %2052 = vrot.lane.b32.xlu1 %v2043_v30, %s3589_s21  ;;  %v863_v27 = vpack.c.bf16 %v851_v44, %v849_v59  ;;  %v2032_v58 = vmul.f32 %v3521_v38, %v1975_v8  ;;  %v4541_v8 = vsel %vm111_vm0, %v4429_v43, %v4431_v39 }
 0x1f9   : > { %v2017_v55 = vadd.f32 %v2009_v31, %v2001_v21  ;;  %v852_v54 = vmul.f32 %v3523_v15, %v796_v19  ;;  %v3525_v2 = vpop.eup %3524 }
 0x1fa   : > { %873 = vrot.lane.b32.xlu0 %v863_v27, %s3589_s21  ;;  %v2044_v28 = vpack.c.bf16 %v2032_v58, %v2030_v17  ;;  %v1952_v35 = vmul.f32 0.5, %v3525_v2 }
 0x1fb   : > { %3526 = vtanh.f32 %v2017_v55  ;;  %2041 = vst [vmem:[#allocation4 + $0x78] sm:$0xff] %v2017_v55  ;;  %v864_v1 = vpack.c.bf16 %v852_v54, %v850_v50 }
 0x1fc   : > { %v1976_v48 = vadd.f32 0.5, %v1952_v35 }
 0x1fd   : > { %875 = vrot.lane.b32.xlu1 %v864_v1, %s3589_s21 }
 0x1fe   : > { %2054 = vrot.lane.b32.xlu0 %v2044_v28, %s3589_s21 }
 0x205   : > { %v3527_v25 = vpop.eup %3526 }
 0x206   : > { %v2033_v33 = vmul.f32 %v3527_v25, %v1976_v48 }
 0x208   : > { %v2045_v18 = vpack.c.bf16 %v2033_v33, %v2031_v5  ;;  %v4531_v5 = vsel %vm1201_vm7, %v4425_v45, %v4427_v23 }
 0x20a   : > { %2056 = vrot.lane.b32.xlu1 %v2045_v18, %s3589_s21 }
 0x264   : > { %v870_v47 = vpop.permute.xlu0 %869 }
 0x265   : > { %887 = vst.msk [vmem:[#allocation3] sm:$0xff] %vm886_vm2, %v870_v47 }
 0x266   : > { %v872_v22 = vpop.permute.xlu1 %871 }
 0x267   : > { %v4435_v14 = vsel %vm877_vm3, %v870_v47, %v872_v22  ;;  %890 = vst.msk [vmem:[#allocation3 + $0x10] sm:$0xff] %vm877_vm3, %v872_v22 }
 0x268   : > { %v936_v61 = vmul.bf16 %v5051_v10, %v4435_v14  ;;  %v2051_v63 = vpop.permute.xlu0 %2050  ;;  %957 = vrot.lane.b32.xlu1 %v4435_v14, %s3590_s22  ;;  %v1012_v17 = vmul.bf16 %v4499_v53, %v4435_v14  ;;  %v1066_v50 = vmul.bf16 %v4510_v42, %v4435_v14  ;;  %v1155_v6 = vmul.bf16 %v4521_v12, %v4435_v14 }
 0x269   : > { %2067 = vst.msk [vmem:[#allocation3 + $0x30] sm:$0xff] %vm886_vm2, %v2051_v63  ;;  %v1207_v29 = vmul.bf16 %v4531_v5, %v4435_v14  ;;  %v1296_v44 = vmul.bf16 %v4541_v8, %v4435_v14 }
 0x26a   : > { %940 = vst [vmem:[#allocation2 + $0x18] sm:$0xff] %v936_v61  ;;  %v2053_v9 = vpop.permute.xlu1 %2052 }
 0x26b   : > { %v4444_v24 = vsel %vm877_vm3, %v2051_v63, %v2053_v9  ;;  %2069 = vst.msk [vmem:[#allocation3 + $0x40] sm:$0xff] %vm877_vm3, %v2053_v9 }
 0x26c   : > { %v4447_v36 = vld [vmem:[#allocation3] sm:$0xff]  ;;  %v2078_v41 = vmul.bf16 %v4444_v24, %v5051_v10  ;;  %v874_v32 = vpop.permute.xlu0 %873  ;;  %1116 = vrot.lane.b32.xlu1 %v4435_v14, %s3591_s23  ;;  %v2128_v21 = vmul.bf16 %v4444_v24, %v4499_v53  ;;  %v2170_v19 = vmul.bf16 %v4444_v24, %v4510_v42  ;;  %v2248_v31 = vmul.bf16 %v4444_v24, %v4521_v12 }
 0x26d   : > { %v935_v34 = vmul.bf16 %v5052_v16, %v4447_v36  ;;  %891 = vst.msk [vmem:[#allocation3 + $0x18] sm:$0xff] %vm886_vm2, %v874_v32  ;;  %955 = vrot.lane.b32.xlu0 %v4447_v36, %s3590_s22  ;;  %v1011_v15 = vmul.bf16 %v5054_v37, %v4447_v36  ;;  %v2290_v27 = vmul.bf16 %v4444_v24, %v4531_v5 }
 0x26e   : > { %2082 = vst [vmem:[#allocation2 + $0x148] sm:$0xff] %v2078_v41  ;;  %v4514_v3 = vld [vmem:[#allocation3 + $0x10] sm:$0xff]  ;;  %v1065_v58 = vmul.bf16 %v5056_v52, %v4447_v36  ;;  %v2368_v55 = vmul.bf16 %v4444_v24, %v4541_v8  ;;  %v1154_v54 = vmul.bf16 %v4421_v4, %v4447_v36  ;;  %v1206_v28 = vmul.bf16 %v4425_v45, %v4447_v36 }
 0x26f   : > { %939 = vst [vmem:[#allocation2 + $0x10] sm:$0xff] %v935_v34  ;;  %v876_v46 = vpop.permute.xlu1 %875  ;;  %v1295_v2 = vmul.bf16 %v4429_v43, %v4447_v36  ;;  %v1013_v47 = vmul.bf16 %v5053_v56, %v4514_v3  ;;  %v1067_v22 = vmul.bf16 %v5055_v26, %v4514_v3  ;;  %v1208_v61 = vmul.bf16 %v4427_v23, %v4514_v3 }
 0x270   : > { %v4458_v0 = vld [vmem:[#allocation3 + $0x30] sm:$0xff]  ;;  %v4461_v7 = vsel %vm877_vm3, %v874_v32, %v876_v46  ;;  %893 = vst.msk [vmem:[#allocation3 + $0x28] sm:$0xff] %vm877_vm3, %v876_v46  ;;  %v2055_v49 = vpop.permute.xlu0 %2054  ;;  %1257 = vrot.lane.b32.xlu1 %v4435_v14, %s3592_s24  ;;  %v1156_v14 = vmul.bf16 %v4423_v57, %v4514_v3  ;;  %v1297_v63 = vmul.bf16 %v4431_v39, %v4514_v3 }
 0x271   : > { %v2077_v62 = vmul.bf16 %v4458_v0, %v5052_v16  ;;  %v938_v40 = vmul.bf16 %v5051_v10, %v4461_v7  ;;  %2070 = vst.msk [vmem:[#allocation3 + $0x48] sm:$0xff] %vm886_vm2, %v2055_v49  ;;  %1114 = vrot.lane.b32.xlu0 %v4447_v36, %s3591_s23  ;;  %v2127_v1 = vmul.bf16 %v4458_v0, %v5054_v37 }
 0x272   : > { %v4545_v38 = vld [vmem:[#allocation3 + $0x40] sm:$0xff]  ;;  %v2169_v35 = vmul.bf16 %v4458_v0, %v5056_v52  ;;  %v2247_v48 = vmul.bf16 %v4458_v0, %v4421_v4  ;;  %v2289_v25 = vmul.bf16 %v4458_v0, %v4425_v45  ;;  %v2367_v33 = vmul.bf16 %v4458_v0, %v4429_v43 }
 0x273   : > { %2081 = vst [vmem:[#allocation2 + $0x140] sm:$0xff] %v2077_v62  ;;  %942 = vst [vmem:[#allocation2 + $0x28] sm:$0xff] %v938_v40  ;;  %v2171_v32 = vmul.bf16 %v4545_v38, %v5055_v26 }
 0x274   : > { %v4473_v51 = vld [vmem:[#allocation3 + $0x18] sm:$0xff]  ;;  %2099 = vrot.lane.b32.xlu1 %v4444_v24, %s3590_s22 }
 0x275   : > { %v937_v20 = vmul.bf16 %v5052_v16, %v4473_v51  ;;  %1255 = vrot.lane.b32.xlu0 %v4447_v36, %s3592_s24  ;;  %v1014_v9 = vmul.bf16 %v5054_v37, %v4473_v51  ;;  %v1068_v41 = vmul.bf16 %v5056_v52, %v4473_v51  ;;  %v1157_v34 = vmul.bf16 %v4421_v4, %v4473_v51 }
 0x276   : > { %v1209_v40 = vmul.bf16 %v4425_v45, %v4473_v51 }
 0x277   : > { %941 = vst [vmem:[#allocation2 + $0x20] sm:$0xff] %v937_v20  ;;  %v4610_v18 = vld [vmem:[#allocation3 + $0x28] sm:$0xff] }
 0x278   : > { %v4481_v13 = vld [vmem:[#allocation3 + $0x48] sm:$0xff]  ;;  %2219 = vrot.lane.b32.xlu1 %v4444_v24, %s3591_s23 }
 0x279   : > { %v2079_v60 = vmul.bf16 %v4481_v13, %v5052_v16  ;;  %2097 = vrot.lane.b32.xlu0 %v4458_v0, %s3590_s22 }
 0x27b   : > { %2083 = vst [vmem:[#allocation2 + $0x150] sm:$0xff] %v2079_v60  ;;  %v2291_v60 = vmul.bf16 %v4545_v38, %v4427_v23 }
 0x27c   : > { %v2057_v11 = vpop.permute.xlu1 %2056  ;;  %2339 = vrot.lane.b32.xlu1 %v4444_v24, %s3592_s24  ;;  %v2129_v24 = vmul.bf16 %v4545_v38, %v5053_v56 }
 0x27d   : > { %v4492_v59 = vsel %vm877_vm3, %v2055_v49, %v2057_v11  ;;  %2072 = vst.msk [vmem:[#allocation3 + $0x58] sm:$0xff] %vm877_vm3, %v2057_v11  ;;  %2217 = vrot.lane.b32.xlu0 %v4458_v0, %s3591_s23 }
 0x27e   : > { %v2080_v30 = vmul.bf16 %v4492_v59, %v5051_v10 }
 0x280   : > { %2084 = vst [vmem:[#allocation2 + $0x158] sm:$0xff] %v2080_v30  ;;  %1025 = vrot.lane.b32.xlu1 %v1012_v17, %s3593_s25  ;;  %v1298_v17 = vmul.bf16 %v4429_v43, %v4473_v51 }
 0x281   : > { %2337 = vrot.lane.b32.xlu0 %v4458_v0, %s3592_s24  ;;  %v2249_v0 = vmul.bf16 %v4545_v38, %v4423_v57 }
 0x284   : > { %1079 = vrot.lane.b32.xlu1 %v1066_v50, %s3594_s26  ;;  %v4627_v10 = vld [vmem:[#allocation3 + $0x58] sm:$0xff] }
 0x285   : > { %959 = vrot.lane.b32.xlu0 %v4514_v3, %s3590_s22 }
 0x288   : > { %1168 = vrot.lane.b32.xlu1 %v1155_v6, %s3595_s27 }
 0x289   : > { %1118 = vrot.lane.b32.xlu0 %v4514_v3, %s3591_s23 }
 0x28c   : > { %1220 = vrot.lane.b32.xlu1 %v1207_v29, %s3596_s28 }
 0x28d   : > { %1259 = vrot.lane.b32.xlu0 %v4514_v3, %s3592_s24  ;;  %v2369_v3 = vmul.bf16 %v4545_v38, %v4431_v39 }
 0x290   : > { %1309 = vrot.lane.b32.xlu1 %v1296_v44, %s3597_s6  ;;  %v2130_v44 = vmul.bf16 %v4481_v13, %v5054_v37 }
 0x291   : > { %2101 = vrot.lane.b32.xlu0 %v4545_v38, %s3590_s22 }
 0x294   : > { %2141 = vrot.lane.b32.xlu1 %v2128_v21, %s3593_s25 }
 0x295   : > { %2221 = vrot.lane.b32.xlu0 %v4545_v38, %s3591_s23 }
 0x298   : > { %2183 = vrot.lane.b32.xlu1 %v2170_v19, %s3594_s26 }
 0x299   : > { %2341 = vrot.lane.b32.xlu0 %v4545_v38, %s3592_s24  ;;  %v2172_v38 = vmul.bf16 %v4481_v13, %v5056_v52 }
 0x29c   : > { %2261 = vrot.lane.b32.xlu1 %v2248_v31, %s3595_s27 }
 0x29d   : > { %1023 = vrot.lane.b32.xlu0 %v1011_v15, %s3593_s25 }
 0x2a0   : > { %2303 = vrot.lane.b32.xlu1 %v2290_v27, %s3596_s28  ;;  %v2250_v27 = vmul.bf16 %v4481_v13, %v4421_v4 }
 0x2a1   : > { %1077 = vrot.lane.b32.xlu0 %v1065_v58, %s3594_s26 }
 0x2a4   : > { %2381 = vrot.lane.b32.xlu1 %v2368_v55, %s3597_s6 }
 0x2a5   : > { %1166 = vrot.lane.b32.xlu0 %v1154_v54, %s3595_s27  ;;  %v2292_v54 = vmul.bf16 %v4481_v13, %v4425_v45 }
 0x2a8   : > { %961 = vrot.lane.b32.xlu1 %v4473_v51, %s3590_s22 }
 0x2a9   : > { %1218 = vrot.lane.b32.xlu0 %v1206_v28, %s3596_s28 }
 0x2ac   : > { %1120 = vrot.lane.b32.xlu1 %v4473_v51, %s3591_s23 }
 0x2ad   : > { %1307 = vrot.lane.b32.xlu0 %v1295_v2, %s3597_s6 }
 0x2b0   : > { %1261 = vrot.lane.b32.xlu1 %v4473_v51, %s3592_s24 }
 0x2b1   : > { %2139 = vrot.lane.b32.xlu0 %v2127_v1, %s3593_s25  ;;  %v2370_v1 = vmul.bf16 %v4481_v13, %v4429_v43 }
 0x2b4   : > { %2103 = vrot.lane.b32.xlu1 %v4481_v13, %s3590_s22 }
 0x2b5   : > { %2181 = vrot.lane.b32.xlu0 %v2169_v35, %s3594_s26 }
 0x2b8   : > { %2223 = vrot.lane.b32.xlu1 %v4481_v13, %s3591_s23 }
 0x2b9   : > { %2259 = vrot.lane.b32.xlu0 %v2247_v48, %s3595_s27 }
 0x2bc   : > { %2343 = vrot.lane.b32.xlu1 %v4481_v13, %s3592_s24  ;;  %v1070_v13 = vmul.bf16 %v5055_v26, %v4610_v18 }
 0x2bd   : > { %2301 = vrot.lane.b32.xlu0 %v2289_v25, %s3596_s28  ;;  %v1016_v25 = vmul.bf16 %v5053_v56, %v4610_v18 }
 0x2c0   : > { %965 = vrot.lane.b32.xlu1 %v4610_v18, %s3590_s22 }
 0x2c1   : > { %2379 = vrot.lane.b32.xlu0 %v2367_v33, %s3597_s6 }
 0x2c4   : > { %1124 = vrot.lane.b32.xlu1 %v4610_v18, %s3591_s23 }
 0x2c5   : > { %1027 = vrot.lane.b32.xlu0 %v1013_v47, %s3593_s25 }
 0x2c8   : > { %1265 = vrot.lane.b32.xlu1 %v4610_v18, %s3592_s24 }
 0x2c9   : > { %1081 = vrot.lane.b32.xlu0 %v1067_v22, %s3594_s26 }
 0x2cc   : > { %2107 = vrot.lane.b32.xlu1 %v4627_v10, %s3590_s22 }
 0x2cd   : > { %1170 = vrot.lane.b32.xlu0 %v1156_v14, %s3595_s27  ;;  %v1015_v14 = vmul.bf16 %v4499_v53, %v4461_v7 }
 0x2d0   : > { %2227 = vrot.lane.b32.xlu1 %v4627_v10, %s3591_s23 }
 0x2d1   : > { %1222 = vrot.lane.b32.xlu0 %v1208_v61, %s3596_s28 }
 0x2d4   : > { %2347 = vrot.lane.b32.xlu1 %v4627_v10, %s3592_s24 }
 0x2d5   : > { %1311 = vrot.lane.b32.xlu0 %v1297_v63, %s3597_s6 }
 0x2d8   : > { %1029 = vrot.lane.b32.xlu1 %v1014_v9, %s3593_s25  ;;  %v1159_v9 = vmul.bf16 %v4423_v57, %v4610_v18 }
 0x2d9   : > { %2143 = vrot.lane.b32.xlu0 %v2129_v24, %s3593_s25 }
 0x2da   : > { %v958_v36 = vpop.permute.xlu1 %957 }
 0x2dc   : > { %1083 = vrot.lane.b32.xlu1 %v1068_v41, %s3594_s26 }
 0x2dd   : > { %2185 = vrot.lane.b32.xlu0 %v2171_v32, %s3594_s26 }
 0x2de   : > { %v1117_v16 = vpop.permute.xlu1 %1116 }
 0x2df   : > { %v956_v46 = vpop.permute.xlu0 %955 }
 0x2e0   : > { %v968_v49 = vsel %vm967_vm8, %v956_v46, %v958_v36  ;;  %1172 = vrot.lane.b32.xlu1 %v1157_v34, %s3595_s27  ;;  %v1158_v46 = vmul.bf16 %v4521_v12, %v4461_v7 }
 0x2e1   : > { %976 = vst [vmem:[#allocation2 + $0x30] sm:$0xff] %v968_v49  ;;  %2263 = vrot.lane.b32.xlu0 %v2249_v0, %s3595_s27 }
 0x2e2   : > { %v1258_v62 = vpop.permute.xlu1 %1257 }
 0x2e3   : > { %v1115_v20 = vpop.permute.xlu0 %1114 }
 0x2e4   : > { %v1127_v11 = vsel %vm1126_vm9, %v1115_v20, %v1117_v16  ;;  %1224 = vrot.lane.b32.xlu1 %v1209_v40, %s3596_s28  ;;  %v1210_v20 = vmul.bf16 %v4531_v5, %v4461_v7 }
 0x2e5   : > { %1135 = vst [vmem:[#allocation2 + $0x90] sm:$0xff] %v1127_v11  ;;  %2305 = vrot.lane.b32.xlu0 %v2291_v60, %s3596_s28 }
 0x2e6   : > { %v2100_v30 = vpop.permute.xlu1 %2099 }
 0x2e7   : > { %v1256_v50 = vpop.permute.xlu0 %1255 }
 0x2e8   : > { %v1268_v6 = vsel %vm1267_vm10, %v1256_v50, %v1258_v62  ;;  %1313 = vrot.lane.b32.xlu1 %v1298_v17, %s3597_s6 }
 0x2e9   : > { %1276 = vst [vmem:[#allocation2 + $0xf0] sm:$0xff] %v1268_v6  ;;  %2383 = vrot.lane.b32.xlu0 %v2369_v3, %s3597_s6  ;;  %v2174_v6 = vmul.bf16 %v4627_v10, %v5055_v26  ;;  %v2173_v26 = vmul.bf16 %v4492_v59, %v4510_v42 }
 0x2ea   : > { %v2220_v29 = vpop.permute.xlu1 %2219 }
 0x2eb   : > { %v2098_v21 = vpop.permute.xlu0 %2097 }
 0x2ec   : > { %v2109_v19 = vsel %vm967_vm8, %v2098_v21, %v2100_v30  ;;  %2145 = vrot.lane.b32.xlu1 %v2130_v44, %s3593_s25  ;;  %v2252_v21 = vmul.bf16 %v4627_v10, %v4423_v57  ;;  %v2251_v57 = vmul.bf16 %v4492_v59, %v4521_v12 }
 0x2ed   : > { %2117 = vst [vmem:[#allocation2 + $0x160] sm:$0xff] %v2109_v19  ;;  %963 = vrot.lane.b32.xlu0 %v4461_v7, %s3590_s22 }
 0x2ee   : > { %v2340_v51 = vpop.permute.xlu1 %2339 }
 0x2ef   : > { %v2218_v31 = vpop.permute.xlu0 %2217 }
 0x2f0   : > { %v2229_v15 = vsel %vm1126_vm9, %v2218_v31, %v2220_v29  ;;  %2187 = vrot.lane.b32.xlu1 %v2172_v38, %s3594_s26  ;;  %v2294_v38 = vmul.bf16 %v4627_v10, %v4427_v23 }
 0x2f1   : > { %2237 = vst [vmem:[#allocation2 + $0x1c0] sm:$0xff] %v2229_v15  ;;  %1122 = vrot.lane.b32.xlu0 %v4461_v7, %s3591_s23 }
 0x2f2   : > { %v4687_v37 = vpop.permute.xlu1 %1025 }
 0x2f3   : > { %v2338_v58 = vpop.permute.xlu0 %2337 }
 0x2f4   : > { %v2349_v55 = vsel %vm1267_vm10, %v2338_v58, %v2340_v51  ;;  %2265 = vrot.lane.b32.xlu1 %v2250_v27, %s3595_s27  ;;  %v2372_v27 = vmul.bf16 %v4627_v10, %v4431_v39 }
 0x2f5   : > { %2357 = vst [vmem:[#allocation2 + $0x220] sm:$0xff] %v2349_v55  ;;  %1263 = vrot.lane.b32.xlu0 %v4461_v7, %s3592_s24 }
 0x2f6   : > { %v4695_v52 = vpop.permute.xlu1 %1079 }
 0x2f7   : > { %v960_v28 = vpop.permute.xlu0 %959 }
 0x2f8   : > { %v969_v2 = vsel %vm967_vm8, %v958_v36, %v960_v28  ;;  %2307 = vrot.lane.b32.xlu1 %v2292_v54, %s3596_s28  ;;  %v1069_v36 = vmul.bf16 %v4510_v42, %v4461_v7  ;;  %v2371_v28 = vmul.bf16 %v4492_v59, %v4541_v8 }
 0x2f9   : > { %977 = vst [vmem:[#allocation2 + $0x38] sm:$0xff] %v969_v2  ;;  %2105 = vrot.lane.b32.xlu0 %v4492_v59, %s3590_s22 }
 0x2fa   : > { %v4703_v4 = vpop.permute.xlu1 %1168 }
 0x2fb   : > { %v1119_v35 = vpop.permute.xlu0 %1118 }
 0x2fc   : > { %v1128_v48 = vsel %vm1126_vm9, %v1117_v16, %v1119_v35  ;;  %2385 = vrot.lane.b32.xlu1 %v2370_v1, %s3597_s6  ;;  %v1211_v16 = vmul.bf16 %v4427_v23, %v4610_v18  ;;  %v2293_v23 = vmul.bf16 %v4492_v59, %v4531_v5 }
 0x2fd   : > { %1136 = vst [vmem:[#allocation2 + $0x98] sm:$0xff] %v1128_v48  ;;  %2225 = vrot.lane.b32.xlu0 %v4492_v59, %s3591_s23 }
 0x2fe   : > { %v4711_v45 = vpop.permute.xlu1 %1220 }
 0x2ff   : > { %v1260_v33 = vpop.permute.xlu0 %1259 }
 0x300   : > { %v1269_v47 = vsel %vm1267_vm10, %v1258_v62, %v1260_v33  ;;  %1033 = vrot.lane.b32.xlu1 %v1016_v25, %s3593_s25  ;;  %v1300_v62 = vmul.bf16 %v4431_v39, %v4610_v18  ;;  %v1299_v18 = vmul.bf16 %v4541_v8, %v4461_v7 }
 0x301   : > { %1277 = vst [vmem:[#allocation2 + $0xf8] sm:$0xff] %v1269_v47  ;;  %2345 = vrot.lane.b32.xlu0 %v4492_v59, %s3592_s24 }
 0x302   : > { %v4719_v43 = vpop.permute.xlu1 %1309 }
 0x303   : > { %v2102_v22 = vpop.permute.xlu0 %2101 }
 0x304   : > { %v2110_v61 = vsel %vm967_vm8, %v2100_v30, %v2102_v22  ;;  %1087 = vrot.lane.b32.xlu1 %v1070_v13, %s3594_s26  ;;  %v2132_v30 = vmul.bf16 %v4627_v10, %v5053_v56  ;;  %v2131_v56 = vmul.bf16 %v4492_v59, %v4499_v53 }
 0x305   : > { %2118 = vst [vmem:[#allocation2 + $0x168] sm:$0xff] %v2110_v61  ;;  %1031 = vrot.lane.b32.xlu0 %v1015_v14, %s3593_s25 }
 0x306   : > { %v4728_v63 = vpop.permute.xlu1 %2141 }
 0x307   : > { %v2222_v24 = vpop.permute.xlu0 %2221 }
 0x308   : > { %v2230_v41 = vsel %vm1126_vm9, %v2220_v29, %v2222_v24  ;;  %1176 = vrot.lane.b32.xlu1 %v1159_v9, %s3595_s27 }
 0x309   : > { %2238 = vst [vmem:[#allocation2 + $0x1c8] sm:$0xff] %v2230_v41  ;;  %1085 = vrot.lane.b32.xlu0 %v1069_v36, %s3594_s26 }
 0x30a   : > { %v4737_v32 = vpop.permute.xlu1 %2183 }
 0x30b   : > { %v2342_v34 = vpop.permute.xlu0 %2341 }
 0x30c   : > { %v2350_v0 = vsel %vm1267_vm10, %v2340_v51, %v2342_v34  ;;  %1228 = vrot.lane.b32.xlu1 %v1211_v16, %s3596_s28 }
 0x30d   : > { %2358 = vst [vmem:[#allocation2 + $0x228] sm:$0xff] %v2350_v0  ;;  %1174 = vrot.lane.b32.xlu0 %v1158_v46, %s3595_s27 }
 0x30e   : > { %v4746_v49 = vpop.permute.xlu1 %2261 }
 0x30f   : > { %v1024_v40 = vpop.permute.xlu0 %1023 }
 0x310   : > { %v1036_v60 = vsel %vm1035_vm11, %v1024_v40, %v4687_v37  ;;  %1317 = vrot.lane.b32.xlu1 %v1300_v62, %s3597_s6 }
 0x311   : > { %1044 = vst [vmem:[#allocation2 + $0x50] sm:$0xff] %v1036_v60  ;;  %1226 = vrot.lane.b32.xlu0 %v1210_v20, %s3596_s28 }
 0x312   : > { %v4756_v11 = vpop.permute.xlu1 %2303 }
 0x313   : > { %v1078_v17 = vpop.permute.xlu0 %1077 }
 0x314   : > { %v1090_v50 = vsel %vm1089_vm12, %v1078_v17, %v4695_v52  ;;  %2149 = vrot.lane.b32.xlu1 %v2132_v30, %s3593_s25 }
 0x315   : > { %1098 = vst [vmem:[#allocation2 + $0x70] sm:$0xff] %v1090_v50  ;;  %1315 = vrot.lane.b32.xlu0 %v1299_v18, %s3597_s6 }
 0x316   : > { %v4766_v3 = vpop.permute.xlu1 %2381 }
 0x317   : > { %v1167_v29 = vpop.permute.xlu0 %1166 }
 0x318   : > { %v1179_v7 = vsel %vm1178_vm13, %v1167_v29, %v4703_v4  ;;  %2191 = vrot.lane.b32.xlu1 %v2174_v6, %s3594_s26 }
 0x319   : > { %1187 = vst [vmem:[#allocation2 + $0xb0] sm:$0xff] %v1179_v7  ;;  %2147 = vrot.lane.b32.xlu0 %v2131_v56, %s3593_s25 }
 0x31a   : > { %v4776_v44 = vpop.permute.xlu1 %961 }
 0x31b   : > { %v1219_v19 = vpop.permute.xlu0 %1218 }
 0x31c   : > { %v1231_v53 = vsel %vm1230_vm14, %v1219_v19, %v4711_v45  ;;  %2269 = vrot.lane.b32.xlu1 %v2252_v21, %s3595_s27 }
 0x31d   : > { %1239 = vst [vmem:[#allocation2 + $0xd0] sm:$0xff] %v1231_v53  ;;  %2189 = vrot.lane.b32.xlu0 %v2173_v26, %s3594_s26 }
 0x31e   : > { %v4786_v51 = vpop.permute.xlu1 %1120 }
 0x31f   : > { %v1308_v31 = vpop.permute.xlu0 %1307 }
 0x320   : > { %v1320_v42 = vsel %vm1319_vm15, %v1308_v31, %v4719_v43  ;;  %2311 = vrot.lane.b32.xlu1 %v2294_v38, %s3596_s28 }
 0x321   : > { %1328 = vst [vmem:[#allocation2 + $0x110] sm:$0xff] %v1320_v42  ;;  %2267 = vrot.lane.b32.xlu0 %v2251_v57, %s3595_s27 }
 0x322   : > { %v4796_v15 = vpop.permute.xlu1 %1261 }
 0x323   : > { %v2140_v58 = vpop.permute.xlu0 %2139 }
 0x324   : > { %v2151_v12 = vsel %vm1035_vm11, %v2140_v58, %v4728_v63  ;;  %2389 = vrot.lane.b32.xlu1 %v2372_v27, %s3597_s6 }
 0x325   : > { %2159 = vst [vmem:[#allocation2 + $0x180] sm:$0xff] %v2151_v12  ;;  %2309 = vrot.lane.b32.xlu0 %v2293_v23, %s3596_s28 }
 0x326   : > { %v4806_v55 = vpop.permute.xlu1 %2103 }
 0x327   : > { %v2182_v54 = vpop.permute.xlu0 %2181 }
 0x328   : > { %v2193_v39 = vsel %vm1089_vm12, %v2182_v54, %v4737_v32 }
 0x329   : > { %2201 = vst [vmem:[#allocation2 + $0x1a0] sm:$0xff] %v2193_v39  ;;  %2387 = vrot.lane.b32.xlu0 %v2371_v28, %s3597_s6 }
 0x32a   : > { %v4813_v5 = vpop.permute.xlu1 %2223 }
 0x32b   : > { %v2260_v10 = vpop.permute.xlu0 %2259 }
 0x32c   : > { %v2271_v2 = vsel %vm1178_vm13, %v2260_v10, %v4746_v49 }
 0x32d   : > { %2279 = vst [vmem:[#allocation2 + $0x1e0] sm:$0xff] %v2271_v2 }
 0x32e   : > { %v4817_v1 = vpop.permute.xlu1 %2343 }
 0x32f   : > { %v2302_v35 = vpop.permute.xlu0 %2301 }
 0x330   : > { %v2313_v48 = vsel %vm1230_vm14, %v2302_v35, %v4756_v11 }
 0x331   : > { %2321 = vst [vmem:[#allocation2 + $0x200] sm:$0xff] %v2313_v48 }
 0x332   : > { %v966_v59 = vpop.permute.xlu1 %965 }
 0x333   : > { %v2380_v8 = vpop.permute.xlu0 %2379 }
 0x334   : > { %v2391_v25 = vsel %vm1319_vm15, %v2380_v8, %v4766_v3 }
 0x335   : > { %2399 = vst [vmem:[#allocation2 + $0x240] sm:$0xff] %v2391_v25 }
 0x336   : > { %v1125_v33 = vpop.permute.xlu1 %1124 }
 0x337   : > { %v1028_v47 = vpop.permute.xlu0 %1027 }
 0x338   : > { %v1037_v13 = vsel %vm1035_vm11, %v4687_v37, %v1028_v47 }
 0x339   : > { %1045 = vst [vmem:[#allocation2 + $0x58] sm:$0xff] %v1037_v13 }
 0x33a   : > { %v1266_v22 = vpop.permute.xlu1 %1265 }
 0x33b   : > { %v1082_v14 = vpop.permute.xlu0 %1081 }
 0x33c   : > { %v1091_v61 = vsel %vm1089_vm12, %v4695_v52, %v1082_v14 }
 0x33d   : > { %1099 = vst [vmem:[#allocation2 + $0x78] sm:$0xff] %v1091_v61 }
 0x33e   : > { %v2108_v9 = vpop.permute.xlu1 %2107 }
 0x33f   : > { %v1171_v24 = vpop.permute.xlu0 %1170 }
 0x340   : > { %v1180_v36 = vsel %vm1178_vm13, %v4703_v4, %v1171_v24 }
 0x341   : > { %1188 = vst [vmem:[#allocation2 + $0xb8] sm:$0xff] %v1180_v36 }
 0x342   : > { %v2228_v41 = vpop.permute.xlu1 %2227 }
 0x343   : > { %v1223_v16 = vpop.permute.xlu0 %1222 }
 0x344   : > { %v1232_v34 = vsel %vm1230_vm14, %v4711_v45, %v1223_v16 }
 0x345   : > { %1240 = vst [vmem:[#allocation2 + $0xd8] sm:$0xff] %v1232_v34 }
 0x346   : > { %v2348_v37 = vpop.permute.xlu1 %2347 }
 0x347   : > { %v1312_v46 = vpop.permute.xlu0 %1311 }
 0x348   : > { %v1321_v0 = vsel %vm1319_vm15, %v4719_v43, %v1312_v46 }
 0x349   : > { %1329 = vst [vmem:[#allocation2 + $0x118] sm:$0xff] %v1321_v0 }
 0x34a   : > { %v1030_v52 = vpop.permute.xlu1 %1029 }
 0x34b   : > { %v2144_v62 = vpop.permute.xlu0 %2143 }
 0x34c   : > { %v2152_v40 = vsel %vm1035_vm11, %v4728_v63, %v2144_v62 }
 0x34d   : > { %2160 = vst [vmem:[#allocation2 + $0x188] sm:$0xff] %v2152_v40 }
 0x34e   : > { %v1084_v4 = vpop.permute.xlu1 %1083 }
 0x34f   : > { %v2186_v20 = vpop.permute.xlu0 %2185 }
 0x350   : > { %v2194_v60 = vsel %vm1089_vm12, %v4737_v32, %v2186_v20 }
 0x351   : > { %2202 = vst [vmem:[#allocation2 + $0x1a8] sm:$0xff] %v2194_v60 }
 0x352   : > { %v4837_v45 = vpop.permute.xlu1 %1172 }
 0x353   : > { %v2264_v30 = vpop.permute.xlu0 %2263 }
 0x354   : > { %v2272_v17 = vsel %vm1178_vm13, %v4746_v49, %v2264_v30 }
 0x355   : > { %2280 = vst [vmem:[#allocation2 + $0x1e8] sm:$0xff] %v2272_v17 }
 0x356   : > { %v4841_v43 = vpop.permute.xlu1 %1224 }
 0x357   : > { %v2306_v18 = vpop.permute.xlu0 %2305 }
 0x358   : > { %v2314_v63 = vsel %vm1230_vm14, %v4756_v11, %v2306_v18 }
 0x359   : > { %2322 = vst [vmem:[#allocation2 + $0x208] sm:$0xff] %v2314_v63 }
 0x35a   : > { %v4845_v50 = vpop.permute.xlu1 %1313 }
 0x35b   : > { %v2384_v6 = vpop.permute.xlu0 %2383 }
 0x35c   : > { %v2392_v32 = vsel %vm1319_vm15, %v4766_v3, %v2384_v6 }
 0x35d   : > { %2400 = vst [vmem:[#allocation2 + $0x248] sm:$0xff] %v2392_v32  ;;  %v2412_v32 = vld [vmem:[#allocation2 + $0x18] sm:$0xff] (%p141_p0) }
 0x35e   : > { %v4849_v29 = vpop.permute.xlu1 %2145  ;;  %2508 = vmatprep.subr.bf16.mxu0 (%p141_p0), %v2412_v32  ;;  %v2440_v32 = vld [vmem:[#allocation2 + $0xf8] sm:$0xff] (%p141_p0) }
 0x35f   : > { %v964_v56 = vpop.permute.xlu0 %963 }
 0x360   : > { %v970_v49 = vsel %vm967_vm8, %v4776_v44, %v964_v56  ;;  %v971_v7 = vsel %vm967_vm8, %v964_v56, %v966_v59  ;;  %v2411_v56 = vld [vmem:[#allocation2 + $0x10] sm:$0xff] (%p141_p0) }
 0x361   : > { %978 = vst [vmem:[#allocation2 + $0x40] sm:$0xff] %v970_v49  ;;  %979 = vst [vmem:[#allocation2 + $0x48] sm:$0xff] %v971_v7  ;;  %v5057_v49 = vmov (%p141_p0), 0   ;;  %v2724_v7 = vld [vmem:[#allocation2 + $0x140] sm:$0xff] (%p141_p0)  ;;  %2509 = vmatpush1.bf16.msra.mxu0 (%p141_p0), %v2411_v56  ;;  %v2936_v56 = vld [vmem:[%s4990_s5 + $0x10] sm:$0xff] (%p141_p0) }
 0x362   : > { %v4854_v21 = vpop.permute.xlu1 %2187  ;;  %3529 = vset.pattern.permute.xlu1 (%p141_p0), %v5057_v49  ;;  %3528 = vset.pattern.permute.xlu0 (%p141_p0), %v5057_v49 }
 0x363   : > { %v1123_v11 = vpop.permute.xlu0 %1122 }
 0x364   : > { %v1129_v19 = vsel %vm1126_vm9, %v4786_v51, %v1123_v11  ;;  %v1130_v26 = vsel %vm1126_vm9, %v1123_v11, %v1125_v33  ;;  %v2727_v11 = vld [vmem:[#allocation2 + $0x158] sm:$0xff] (%p141_p0) }
 0x365   : > { %1137 = vst [vmem:[#allocation2 + $0xa0] sm:$0xff] %v1129_v19  ;;  %1138 = vst [vmem:[#allocation2 + $0xa8] sm:$0xff] %v1130_v26  ;;  %v2413_v19 = vld [vmem:[#allocation2 + $0x20] sm:$0xff] (%p141_p0)  ;;  %v2726_v26 = vld [vmem:[#allocation2 + $0x150] sm:$0xff] (%p141_p0) }
 0x366   : > { %v4859_v3 = vpop.permute.xlu1 %2265 }
 0x367   : > { %v1264_v53 = vpop.permute.xlu0 %1263 }
 0x368   : > { %v1270_v44 = vsel %vm1267_vm10, %v4796_v15, %v1264_v53  ;;  %v1271_v38 = vsel %vm1267_vm10, %v1264_v53, %v1266_v22  ;;  %v2729_v53 = vld [vmem:[#allocation2 + $0x168] sm:$0xff] (%p141_p0) }
 0x369   : > { %1278 = vst [vmem:[#allocation2 + $0x100] sm:$0xff] %v1270_v44  ;;  %1279 = vst [vmem:[#allocation2 + $0x108] sm:$0xff] %v1271_v38  ;;  %v2415_v44 = vld [vmem:[#allocation2 + $0x30] sm:$0xff] (%p141_p0)  ;;  %v2728_v38 = vld [vmem:[#allocation2 + $0x160] sm:$0xff] (%p141_p0) }
 0x36a   : > { %v4864_v31 = vpop.permute.xlu1 %2307 }
 0x36b   : > { %v2106_v57 = vpop.permute.xlu0 %2105 }
 0x36c   : > { %v2111_v51 = vsel %vm967_vm8, %v4806_v55, %v2106_v57  ;;  %v2112_v42 = vsel %vm967_vm8, %v2106_v57, %v2108_v9 }
 0x36d   : > { %2119 = vst [vmem:[#allocation2 + $0x170] sm:$0xff] %v2111_v51  ;;  %2120 = vst [vmem:[#allocation2 + $0x178] sm:$0xff] %v2112_v42  ;;  %v2417_v51 = vld [vmem:[#allocation2 + $0x40] sm:$0xff] (%p141_p0) }
 0x36e   : > { %v4869_v27 = vpop.permute.xlu1 %2385 }
 0x36f   : > { %v2226_v58 = vpop.permute.xlu0 %2225 }
 0x370   : > { %v2231_v15 = vsel %vm1126_vm9, %v4813_v5, %v2226_v58  ;;  %v2232_v23 = vsel %vm1126_vm9, %v2226_v58, %v2228_v41  ;;  %v2733_v58 = vld [vmem:[#allocation2 + $0x188] sm:$0xff] (%p141_p0) }
 0x371   : > { %2239 = vst [vmem:[#allocation2 + $0x1d0] sm:$0xff] %v2231_v15  ;;  %2240 = vst [vmem:[#allocation2 + $0x1d8] sm:$0xff] %v2232_v23  ;;  %v2419_v15 = vld [vmem:[#allocation2 + $0x50] sm:$0xff] (%p141_p0)  ;;  %v2732_v23 = vld [vmem:[#allocation2 + $0x180] sm:$0xff] (%p141_p0) }
 0x372   : > { %v1034_v12 = vpop.permute.xlu1 %1033 }
 0x373   : > { %v2346_v54 = vpop.permute.xlu0 %2345 }
 0x374   : > { %v2351_v28 = vsel %vm1267_vm10, %v4817_v1, %v2346_v54  ;;  %v2352_v55 = vsel %vm1267_vm10, %v2346_v54, %v2348_v37  ;;  %v2731_v57 = vld [vmem:[#allocation2 + $0x178] sm:$0xff] (%p141_p0)  ;;  %v2730_v42 = vld [vmem:[#allocation2 + $0x170] sm:$0xff] (%p141_p0) }
 0x375   : > { %2359 = vst [vmem:[#allocation2 + $0x230] sm:$0xff] %v2351_v28  ;;  %2360 = vst [vmem:[#allocation2 + $0x238] sm:$0xff] %v2352_v55 }
 0x376   : > { %v1088_v39 = vpop.permute.xlu1 %1087 }
 0x377   : > { %v1032_v10 = vpop.permute.xlu0 %1031 }
 0x378   : > { %v1038_v2 = vsel %vm1035_vm11, %v1030_v52, %v1032_v10  ;;  %v1039_v35 = vsel %vm1035_vm11, %v1032_v10, %v1034_v12  ;;  %v2737_v10 = vld [vmem:[#allocation2 + $0x1a8] sm:$0xff] (%p141_p0) }
 0x379   : > { %1046 = vst [vmem:[#allocation2 + $0x60] sm:$0xff] %v1038_v2  ;;  %1047 = vst [vmem:[#allocation2 + $0x68] sm:$0xff] %v1039_v35  ;;  %v3532_v2 = vld [vmem:[%s4988_s3 + $0x4] ss:$12 sps:$4 sm:$0xff] (%p141_p0)  }
 0x37a   : > { %v1177_v5 = vpop.permute.xlu1 %1176  ;;  %v2423_v35 = vld [vmem:[#allocation2 + $0x70] sm:$0xff] (%p141_p0)  ;;  %2540 = vmatprep.mubr.bf16.mxu0 (%p141_p0), %v3532_v2  ;;  %2852 = vmatprep.mubr.bf16.mxu1 (%p141_p0), %v3532_v2  ;;  %v3539_v2 = vld [vmem:[%s4988_s3 + $0x20] ss:$12 sps:$4 sm:$0xff] (%p141_p0)  }
 0x37b   : > { %v1086_v48 = vpop.permute.xlu0 %1085 }
 0x37c   : > { %v1092_v59 = vsel %vm1089_vm12, %v1084_v4, %v1086_v48  ;;  %v1093_v8 = vsel %vm1089_vm12, %v1086_v48, %v1088_v39  ;;  %v2424_v39 = vld [vmem:[#allocation2 + $0x78] sm:$0xff] (%p141_p0) }
 0x37d   : > { %1100 = vst [vmem:[#allocation2 + $0x80] sm:$0xff] %v1092_v59  ;;  %1101 = vst [vmem:[#allocation2 + $0x88] sm:$0xff] %v1093_v8 }
 0x37e   : > { %v1229_v1 = vpop.permute.xlu1 %1228 }
 0x37f   : > { %v1175_v25 = vpop.permute.xlu0 %1174 }
 0x380   : > { %v1181_v33 = vsel %vm1178_vm13, %v4837_v45, %v1175_v25  ;;  %v1182_v47 = vsel %vm1178_vm13, %v1175_v25, %v1177_v5  ;;  %v2422_v12 = vld [vmem:[#allocation2 + $0x68] sm:$0xff] (%p141_p0)  ;;  %v2421_v28 = vld [vmem:[#allocation2 + $0x60] sm:$0xff] (%p141_p0)  ;;  %v2428_v25 = vld [vmem:[#allocation2 + $0x98] sm:$0xff] (%p141_p0) }
 0x381   : > { %1189 = vst [vmem:[#allocation2 + $0xc0] sm:$0xff] %v1181_v33  ;;  %1190 = vst [vmem:[#allocation2 + $0xc8] sm:$0xff] %v1182_v47  ;;  %v2736_v5 = vld [vmem:[#allocation2 + $0x1a0] sm:$0xff] (%p141_p0)  ;;  %v2741_v33 = vld [vmem:[#allocation2 + $0x1c8] sm:$0xff] (%p141_p0) }
 0x382   : > { %v1318_v13 = vpop.permute.xlu1 %1317  ;;  %v2760_v47 = vld [vmem:[%s4989_s4] sm:$0xff] (%p141_p0) }
 0x383   : > { %v1227_v22 = vpop.permute.xlu0 %1226  ;;  %2766 = vperm.xlu1 (%p141_p0), %3529, %v2760_v47   ;;  %2453 = vperm.xlu0 (%p141_p0), %3528, %v2760_v47  }
 0x384   : > { %v1233_v14 = vsel %vm1230_vm14, %v4841_v43, %v1227_v22  ;;  %v1234_v61 = vsel %vm1230_vm14, %v1227_v22, %v1229_v1  ;;  %v2426_v48 = vld [vmem:[#allocation2 + $0x88] sm:$0xff] (%p141_p0)  ;;  %v2425_v8 = vld [vmem:[#allocation2 + $0x80] sm:$0xff] (%p141_p0) }
 0x385   : > { %1241 = vst [vmem:[#allocation2 + $0xe0] sm:$0xff] %v1233_v14  ;;  %1242 = vst [vmem:[#allocation2 + $0xe8] sm:$0xff] %v1234_v61  ;;  %v2740_v22 = vld [vmem:[#allocation2 + $0x1c0] sm:$0xff] (%p141_p0)  ;;  %v2430_v14 = vld [vmem:[#allocation2 + $0xa8] sm:$0xff] (%p141_p0) }
 0x386   : > { %v2150_v9 = vpop.permute.xlu1 %2149  ;;  %v2743_v61 = vld [vmem:[#allocation2 + $0x1d8] sm:$0xff] (%p141_p0) }
 0x387   : > { %v1316_v24 = vpop.permute.xlu0 %1315 }
 0x388   : > { %v1322_v36 = vsel %vm1319_vm15, %v4845_v50, %v1316_v24  ;;  %v1323_v41 = vsel %vm1319_vm15, %v1316_v24, %v1318_v13  ;;  %v2427_v13 = vld [vmem:[#allocation2 + $0x90] sm:$0xff] (%p141_p0)  ;;  %v2429_v24 = vld [vmem:[#allocation2 + $0xa0] sm:$0xff] (%p141_p0) }
 0x389   : > { %1330 = vst [vmem:[#allocation2 + $0x120] sm:$0xff] %v1322_v36  ;;  %1331 = vst [vmem:[#allocation2 + $0x128] sm:$0xff] %v1323_v41  ;;  %v2742_v36 = vld [vmem:[#allocation2 + $0x1d0] sm:$0xff] (%p141_p0)  ;;  %v2432_v41 = vld [vmem:[#allocation2 + $0xb8] sm:$0xff] (%p141_p0) }
 0x38a   : > { %v2192_v16 = vpop.permute.xlu1 %2191 }
 0x38b   : > { %v2148_v34 = vpop.permute.xlu0 %2147 }
 0x38c   : > { %v2153_v37 = vsel %vm1035_vm11, %v4849_v29, %v2148_v34  ;;  %v2154_v46 = vsel %vm1035_vm11, %v2148_v34, %v2150_v9  ;;  %v2725_v29 = vld [vmem:[#allocation2 + $0x148] sm:$0xff] (%p141_p0)  ;;  %v2762_v34 = vld [vmem:[%s4989_s4 + $0x10] sm:$0xff] (%p141_p0) }
 0x38d   : > { %2161 = vst [vmem:[#allocation2 + $0x190] sm:$0xff] %v2153_v37  ;;  %2162 = vst [vmem:[#allocation2 + $0x198] sm:$0xff] %v2154_v46  ;;  %2820 = vmatprep.subr.bf16.mxu1 (%p141_p0), %v2725_v29  ;;  %v2761_v9 = vld [vmem:[%s4989_s4 + $0x8] sm:$0xff] (%p141_p0)  ;;  %v2431_v37 = vld [vmem:[#allocation2 + $0xb0] sm:$0xff] (%p141_p0) }
 0x38e   : > { %v2270_v52 = vpop.permute.xlu1 %2269  ;;  %2821 = vmatpush1.bf16.msra.mxu1 (%p141_p0), %v2724_v7  ;;  %2771 = vperm.xlu1 (%p141_p0), %3529, %v2761_v9   ;;  %v2744_v46 = vld [vmem:[#allocation2 + $0x1e0] sm:$0xff] (%p141_p0)  ;;  %v2753_v29 = vld [vmem:[#allocation2 + $0x228] sm:$0xff] (%p141_p0)  ;;  %v2439_v7 = vld [vmem:[#allocation2 + $0xf0] sm:$0xff] (%p141_p0) }
 0x38f   : > { %v2190_v0 = vpop.permute.xlu0 %2189  ;;  %2822 = vmatprep.subr.bf16.mxu1 (%p141_p0), %v2727_v11  ;;  %2458 = vperm.xlu0 (%p141_p0), %3528, %v2761_v9   ;;  %v2442_v11 = vld [vmem:[#allocation2 + $0x108] sm:$0xff] (%p141_p0) }
 0x390   : > { %v2195_v62 = vsel %vm1089_vm12, %v4854_v21, %v2190_v0  ;;  %v2196_v40 = vsel %vm1089_vm12, %v2190_v0, %v2192_v16  ;;  %v2414_v21 = vld [vmem:[#allocation2 + $0x28] sm:$0xff] (%p141_p0) }
 0x391   : > { %2203 = vst [vmem:[#allocation2 + $0x1b0] sm:$0xff] %v2195_v62  ;;  %2204 = vst [vmem:[#allocation2 + $0x1b8] sm:$0xff] %v2196_v40  ;;  %2510 = vmatprep.subr.bf16.mxu0 (%p141_p0), %v2414_v21  ;;  %v2745_v16 = vld [vmem:[#allocation2 + $0x1e8] sm:$0xff] (%p141_p0)  ;;  %v2622_v62 = vld [vmem:[%s4990_s5] sm:$0xff] (%p141_p0) }
 0x392   : > { %v2312_v45 = vpop.permute.xlu1 %2311  ;;  %2511 = vmatpush1.bf16.msra.mxu0 (%p141_p0), %v2413_v19  ;;  %2823 = vmatpush1.bf16.msra.mxu1 (%p141_p0), %v2726_v26  ;;  %v2434_v0 = vld [vmem:[#allocation2 + $0xc8] sm:$0xff] (%p141_p0)  ;;  %v2450_v40 = vld [vmem:[%s4989_s4 + $0x18] sm:$0xff] (%p141_p0)  ;;  %v2752_v21 = vld [vmem:[#allocation2 + $0x220] sm:$0xff] (%p141_p0) }
 0x393   : > { %v2268_v4 = vpop.permute.xlu0 %2267  ;;  %2824 = vmatprep.subr.bf16.mxu1 (%p141_p0), %v2729_v53  ;;  %2776 = vperm.xlu1 (%p141_p0), %3529, %v2762_v34   ;;  %v2755_v19 = vld [vmem:[#allocation2 + $0x238] sm:$0xff] (%p141_p0)  ;;  %v2754_v53 = vld [vmem:[#allocation2 + $0x230] sm:$0xff] (%p141_p0) }
 0x394   : > { %v2273_v20 = vsel %vm1178_vm13, %v4859_v3, %v2268_v4  ;;  %v2274_v60 = vsel %vm1178_vm13, %v2268_v4, %v2270_v52  ;;  %v2416_v3 = vld [vmem:[#allocation2 + $0x38] sm:$0xff] (%p141_p0)  ;;  %v2734_v55 = vld [vmem:[#allocation2 + $0x190] sm:$0xff] (%p141_p0)  ;;  %2463 = vperm.xlu0 (%p141_p0), %3528, %v2762_v34   ;;  %v2433_v4 = vld [vmem:[#allocation2 + $0xc0] sm:$0xff] (%p141_p0) }
 0x395   : > { %2281 = vst [vmem:[#allocation2 + $0x1f0] sm:$0xff] %v2273_v20  ;;  %2282 = vst [vmem:[#allocation2 + $0x1f8] sm:$0xff] %v2274_v60  ;;  %2512 = vmatprep.subr.bf16.mxu0 (%p141_p0), %v2416_v3  ;;  %v2735_v54 = vld [vmem:[#allocation2 + $0x198] sm:$0xff] (%p141_p0)  ;;  %v2441_v3 = vld [vmem:[#allocation2 + $0x100] sm:$0xff] (%p141_p0) }
 0x396   : > { %v2390_v63 = vpop.permute.xlu1 %2389  ;;  %2513 = vmatpush1.bf16.msra.mxu0 (%p141_p0), %v2415_v44  ;;  %2825 = vmatpush1.bf16.msra.mxu1 (%p141_p0), %v2728_v38  ;;  %v2436_v60 = vld [vmem:[#allocation2 + $0xd8] sm:$0xff] (%p141_p0)  ;;  %v2757_v38 = vld [vmem:[#allocation2 + $0x248] sm:$0xff] (%p141_p0) }
 0x397   : > { %v2310_v30 = vpop.permute.xlu0 %2309  ;;  %143 = sbr.rel (!%p141_p0) target bundleno = 53 (0x35), region = 65  ;;  %2826 = vmatprep.subr.bf16.mxu1 (%p141_p0), %v2731_v57  ;;  %2628 = vperm.xlu1 (%p141_p0), %3529, %v2622_v62   ;;  %v2937_v26 = vld [vmem:[%s4990_s5 + $0x18] sm:$0xff] (%p141_p0)  ;;  %v2984_v57 = vld [vmem:[#allocation5] sm:$0x1] (%p141_p0) }
 0x398   : > { %v2315_v17 = vsel %vm1230_vm14, %v4864_v31, %v2310_v30  ;;  %v2316_v43 = vsel %vm1230_vm14, %v2310_v30, %v2312_v45  ;;  %v2418_v31 = vld [vmem:[#allocation2 + $0x48] sm:$0xff] (%p141_p0)  ;;  %v2739_v59 = vld [vmem:[#allocation2 + $0x1b8] sm:$0xff] (%p141_p0)  ;;  %v2738_v1 = vld [vmem:[#allocation2 + $0x1b0] sm:$0xff] (%p141_p0)  ;;  %2468 = vperm.xlu0 (%p141_p0), %3528, %v2450_v40  }
 0x399   : > { %2323 = vst [vmem:[#allocation2 + $0x210] sm:$0xff] %v2315_v17  ;;  %2324 = vst [vmem:[#allocation2 + $0x218] sm:$0xff] %v2316_v43  ;;  %2514 = vmatprep.subr.bf16.mxu0 (%p141_p0), %v2418_v31  ;;  %v2749_v45 = vld [vmem:[#allocation2 + $0x208] sm:$0xff] (%p141_p0)  ;;  %v2435_v17 = vld [vmem:[#allocation2 + $0xd0] sm:$0xff] (%p141_p0) }
 0x39a   :  { %2515 = vmatpush1.bf16.msra.mxu0 (%p141_p0), %v2417_v51  ;;  %2827 = vmatpush1.bf16.msra.mxu1 (%p141_p0), %v2730_v42  ;;  %v2623_v30 = vld [vmem:[%s4990_s5 + $0x8] sm:$0xff] (%p141_p0)  ;;  %v2748_v43 = vld [vmem:[#allocation2 + $0x200] sm:$0xff] (%p141_p0)  ;;  %v2444_v44 = vld [vmem:[#allocation2 + $0x118] sm:$0xff] (%p141_p0) }
 0x39b   : > { %v2388_v18 = vpop.permute.xlu0 %2387  ;;  %2828 = vmatprep.subr.bf16.mxu1 (%p141_p0), %v2733_v58  ;;  %2781 = vperm.xlu1 (%p141_p0), %3529, %v2450_v40   ;;  %v3530_v31 = vld [vmem:[%s4988_s3] ss:$12 sps:$4 sm:$0xff] (%p141_p0)   ;;  %v2443_v42 = vld [vmem:[#allocation2 + $0x110] sm:$0xff] (%p141_p0)  ;;  %v3533_v58 = vld [vmem:[%s4988_s3 + $0x1c] ss:$12 sps:$4 sm:$0xff] (%p141_p0)  }
 0x39c   : > { %v2393_v50 = vsel %vm1319_vm15, %v4869_v27, %v2388_v18  ;;  %v2394_v6 = vsel %vm1319_vm15, %v2388_v18, %v2390_v63  ;;  %v2420_v27 = vld [vmem:[#allocation2 + $0x58] sm:$0xff] (%p141_p0)  ;;  %v2746_v20 = vld [vmem:[#allocation2 + $0x1f0] sm:$0xff] (%p141_p0)  ;;  %v2438_v18 = vld [vmem:[#allocation2 + $0xe8] sm:$0xff] (%p141_p0)  ;;  %2633 = vperm.xlu0 (%p141_p0), %3528, %v2623_v30  }
 0x39d   : > { %2401 = vst [vmem:[#allocation2 + $0x250] sm:$0xff] %v2393_v50  ;;  %2402 = vst [vmem:[#allocation2 + $0x258] sm:$0xff] %v2394_v6  ;;  %2516 = vmatprep.subr.bf16.mxu0 (%p141_p0), %v2420_v27  ;;  %v2747_v52 = vld [vmem:[#allocation2 + $0x1f8] sm:$0xff] (%p141_p0)  ;;  %v2437_v50 = vld [vmem:[#allocation2 + $0xe0] sm:$0xff] (%p141_p0) }
 0x39e   :  { %2517 = vmatpush1.bf16.msra.mxu0 %v2419_v15  ;;  %2829 = vmatpush1.bf16.msra.mxu1 %v2732_v23  ;;  %v2672_v51 = vld [vmem:[#allocation5] sm:$0x1]  ;;  %v2446_v15 = vld [vmem:[#allocation2 + $0x128] sm:$0xff] }
 0x39f   :  { %2518 = vmatprep.subr.bf16.mxu0 %v2422_v12  ;;  %2830 = vmatprep.subr.bf16.mxu1 %v2735_v54  ;;  %v2756_v27 = vld [vmem:[#allocation2 + $0x240] sm:$0xff] }
 0x3a0   :  { %v2751_v63 = vld [vmem:[#allocation2 + $0x218] sm:$0xff]  ;;  %v2750_v6 = vld [vmem:[#allocation2 + $0x210] sm:$0xff]  ;;  %2945 = vperm.xlu1 %3529, %v2623_v30   ;;  %2940 = vperm.xlu0 %3528, %v2622_v62   ;;  %v2445_v12 = vld [vmem:[#allocation2 + $0x120] sm:$0xff] }
 0x3a2   :  { %2519 = vmatpush1.bf16.msra.mxu0 %v2421_v28  ;;  %2831 = vmatpush1.bf16.msra.mxu1 %v2734_v55  ;;  %v3535_v28 = vld [vmem:[%s4988_s3 + $0x18] ss:$12 sps:$4 sm:$0xff]   ;;  %v3536_v55 = vld [vmem:[%s4988_s3 + $0x8] ss:$12 sps:$4 sm:$0xff]  }
 0x3a3   :  { %2520 = vmatprep.subr.bf16.mxu0 %v2424_v39  ;;  %2832 = vmatprep.subr.bf16.mxu1 %v2737_v10  ;;  %v3537_v39 = vld [vmem:[%s4988_s3 + $0x8] ss:$12 sps:$4 sm:$0xff]   ;;  %v3538_v10 = vld [vmem:[%s4988_s3 + $0x20] ss:$12 sps:$4 sm:$0xff]   ;;  %s3598_s3 = smov [#allocation6]  }
 0x3a4   :  { %2950 = vperm.xlu1 %3529, %v2936_v56   ;;  %2638 = vperm.xlu0 %3528, %v2936_v56   ;;  %v2759_v23 = vld [vmem:[#allocation2 + $0x258] sm:$0xff]  ;;  %v2758_v54 = vld [vmem:[#allocation2 + $0x250] sm:$0xff]  ;;  %s3030_s7 = sshll.u32 %s3598_s3, 4  ;;  %s3031_s7 = int_to_ptr.vmem [resolvable:$true] %s3030_s7 }
 0x3a5   :  { %s3548_s29 = scalar_lea.vmem %s3031_s7, 64  ;;  %p3553_p2 = scmp.lt.s32.totalorder %s3031_s7, %s3031_s7 }
 0x3a6   :  { %2521 = vmatpush1.bf16.msra.mxu0 %v2423_v35  ;;  %2833 = vmatpush1.bf16.msra.mxu1 %v2736_v5  ;;  %p3549_p1 = scmp.ne.s32.totalorder %s3031_s7, %s3548_s29  ;;  %p3554_p3 = scmp.lt.s32.totalorder %s3548_s29, %s3548_s29 }
 0x3a7   :  { %2522 = vmatprep.subr.bf16.mxu0 %v2426_v48  ;;  %2834 = vmatprep.subr.bf16.mxu1 %v2739_v59 }
 0x3a8   :  { %2955 = vperm.xlu1 %3529, %v2937_v26   ;;  %2643 = vperm.xlu0 %3528, %v2937_v26   ;;  %p3555_p4 = por %p3554_p3, %p3553_p2 }
 0x3aa   :  { %2523 = vmatpush1.bf16.msra.mxu0 %v2425_v8  ;;  %2835 = vmatpush1.bf16.msra.mxu1 %v2738_v1  ;;  %p3556_p5 = pnand %p3555_p4, %p3549_p1 }
 0x3ab   :  { %2524 = vmatprep.subr.bf16.mxu0 %v2428_v25  ;;  %2836 = vmatprep.subr.bf16.mxu1 %v2741_v33 }
 0x3ac   :  { %2987 = vperm.xlu1 %3529, %v2984_v57   ;;  %2675 = vperm.xlu0 %3528, %v2672_v51  }
 0x3ae   :  { %2525 = vmatpush1.bf16.msra.mxu0 %v2427_v13  ;;  %2837 = vmatpush1.bf16.msra.mxu1 %v2740_v22 }
 0x3af   :  { %2526 = vmatprep.subr.bf16.mxu0 %v2430_v14  ;;  %2838 = vmatprep.subr.bf16.mxu1 %v2743_v61 }
 0x3b2   :  { %2527 = vmatpush1.bf16.msra.mxu0 %v2429_v24  ;;  %2839 = vmatpush1.bf16.msra.mxu1 %v2742_v36 }
 0x3b3   :  { %2528 = vmatprep.subr.bf16.mxu0 %v2432_v41  ;;  %2840 = vmatprep.subr.bf16.mxu1 %v2745_v16 }
 0x3b6   :  { %2529 = vmatpush1.bf16.msra.mxu0 %v2431_v37  ;;  %2841 = vmatpush1.bf16.msra.mxu1 %v2744_v46 }
 0x3b7   :  { %2530 = vmatprep.subr.bf16.mxu0 %v2434_v0  ;;  %2842 = vmatprep.subr.bf16.mxu1 %v2747_v52 }
 0x3ba   :  { %2531 = vmatpush1.bf16.msra.mxu0 %v2433_v4  ;;  %2843 = vmatpush1.bf16.msra.mxu1 %v2746_v20 }
 0x3bb   :  { %2532 = vmatprep.subr.bf16.mxu0 %v2436_v60  ;;  %2844 = vmatprep.subr.bf16.mxu1 %v2749_v45 }
 0x3be   :  { %2533 = vmatpush1.bf16.msra.mxu0 %v2435_v17  ;;  %2845 = vmatpush1.bf16.msra.mxu1 %v2748_v43 }
 0x3bf   :  { %2534 = vmatprep.subr.bf16.mxu0 %v2438_v18  ;;  %2846 = vmatprep.subr.bf16.mxu1 %v2751_v63 }
 0x3c2   :  { %2535 = vmatpush1.bf16.msra.mxu0 %v2437_v50  ;;  %2847 = vmatpush1.bf16.msra.mxu1 %v2750_v6 }
 0x3c3   :  { %2536 = vmatprep.subr.bf16.mxu0 %v2440_v32  ;;  %2848 = vmatprep.subr.bf16.mxu1 %v2753_v29 }
 0x3c6   :  { %2537 = vmatpush1.bf16.msra.mxu0 %v2439_v7  ;;  %2849 = vmatpush1.bf16.msra.mxu1 %v2752_v21 }
 0x3c7   :  { %2538 = vmatprep.subr.bf16.mxu0 %v2442_v11  ;;  %2850 = vmatprep.subr.bf16.mxu1 %v2755_v19 }
 0x3ca   :  { %2539 = vmatpush1.bf16.msra.mxu0 %v2441_v3  ;;  %2851 = vmatpush1.bf16.msra.mxu1 %v2754_v53 }
 0x3cb   :  { %2561 = vmatprep.subr.bf16.mxu0 %v2444_v44  ;;  %2873 = vmatprep.subr.bf16.mxu1 %v2757_v38 }
 0x3cd   :  { %2541 = vmatmul.mubr.bf16.vlgmr.msra.gmra.mrb[0].mxu0 %v3530_v31  ;;  %2853 = vmatmul.mubr.bf16.vlgmr.msra.gmra.mrb[0].mxu1 %v3530_v31 }
 0x3ce   :  { %2562 = vmatpush1.bf16.msra.mxu0 %v2443_v42  ;;  %2874 = vmatpush1.bf16.msra.mxu1 %v2756_v27 }
 0x3cf   :  { %2550 = vmatprep.mubr.bf16.mxu0 %v3533_v58  ;;  %2862 = vmatprep.mubr.bf16.mxu1 %v3533_v58 }
 0x3d0   :  { %2563 = vmatprep.subr.bf16.mxu0 %v2446_v15  ;;  %2875 = vmatprep.subr.bf16.mxu1 %v2759_v23 }
 0x3d2   :  { %2564 = vmatpush1.bf16.msra.mxu0 %v2445_v12  ;;  %2876 = vmatpush1.bf16.msra.mxu1 %v2758_v54 }
 0x3d5   :  { %2551 = vmatmul.mubr.bf16.gmra.mrb[4].mxu0 %v3535_v28  ;;  %2863 = vmatmul.mubr.bf16.gmra.mrb[4].mxu1 %v3535_v28 }
 0x3d6   :  { %2593 = vmatprep.mubr.bf16.mxu0 %v5057_v49  ;;  %2905 = vmatprep.mubr.bf16.mxu1 %v5057_v49 }
 0x3dd   :  { %3122 = vmatmul.mubr.msk.bf16.vlgmr.msra.gmra.mrb[0].mxu0 %vm1201_vm7, %v3536_v55  ;;  %3130 = vmatmul.mubr.msk.bf16.vlgmr.msra.gmra.mrb[0].mxu1 %vm1201_vm7, %v3537_v39 }
 0x3de   :  { %2603 = vmatprep.mubr.bf16.mxu0 %v5057_v49  ;;  %2915 = vmatprep.mubr.bf16.mxu1 %v5057_v49 }
 0x3e5   :  { %3123 = vmatmul.mubr.msk.bf16.gmra.mrb[4].mxu0 %vm1201_vm7, %v3538_v10  ;;  %3131 = vmatmul.mubr.msk.bf16.gmra.mrb[4].mxu1 %vm1201_vm7, %v3539_v2 }
 0x402   :  { %v2767_v35 = vpop.permute.xlu1 %2766  ;;  %v2454_v5 = vpop.permute.xlu0 %2453 }
 0x40d   :  { %v2772_v48 = vpop.permute.xlu1 %2771 }
 0x40e   :  { %v2459_v59 = vpop.permute.xlu0 %2458 }
 0x412   :  { %v2777_v8 = vpop.permute.xlu1 %2776 }
 0x413   :  { %v2464_v1 = vpop.permute.xlu0 %2463 }
 0x416   :  { %v2629_v25 = vpop.permute.xlu1 %2628 }
 0x417   :  { %v2469_v49 = vpop.permute.xlu0 %2468 }
 0x41a   :  { %v2782_v33 = vpop.permute.xlu1 %2781 }
 0x41b   :  { %v2634_v47 = vpop.permute.xlu0 %2633 }
 0x41f   :  { %v2946_v13 = vpop.permute.xlu1 %2945  ;;  %v2941_v22 = vpop.permute.xlu0 %2940 }
 0x423   :  { %v2951_v6 = vpop.permute.xlu1 %2950  ;;  %v2639_v32 = vpop.permute.xlu0 %2638 }
 0x4b0   :  { %v2595_v14 = vpop.f32.mrb[0].mxu0  ;;  %v2907_v61 = vpop.f32.mrb[0].mxu1 }
 0x4b1   :  { %v3261_v9 = vadd.f32 %v2595_v14, %v2454_v5  ;;  %v3269_v24 = vadd.f32 %v2907_v61, %v2767_v35  ;;  %v2597_v36 = vpop.f32.mrb[1].mxu0  ;;  %v2909_v41 = vpop.f32.mrb[1].mxu1 }
 0x4b2   :  { %v3262_v16 = vadd.f32 %v2597_v36, %v2454_v5  ;;  %v3270_v34 = vadd.f32 %v2909_v41, %v2767_v35  ;;  %v2599_v37 = vpop.f32.mrb[2].mxu0  ;;  %v2911_v46 = vpop.f32.mrb[2].mxu1 }
 0x4b3   :  { %v2614_v0 = vmax.f32 %v3261_v9, 0.0  ;;  %v2926_v52 = vmax.f32 %v3269_v24, 0.0  ;;  %v3263_v62 = vadd.f32 %v2599_v37, %v2459_v59  ;;  %v3271_v40 = vadd.f32 %v2911_v46, %v2772_v48  ;;  %v2601_v4 = vpop.f32.mrb[3].mxu0  ;;  %v2913_v20 = vpop.f32.mrb[3].mxu1 }
 0x4b4   :  { %v2615_v60 = vmax.f32 %v3262_v16, 0.0  ;;  %v2927_v45 = vmax.f32 %v3270_v34, 0.0  ;;  %v3264_v30 = vadd.f32 %v2601_v4, %v2459_v59  ;;  %v3272_v17 = vadd.f32 %v2913_v20, %v2772_v48  ;;  %v2956_v9 = vpop.permute.xlu1 %2955  ;;  %v2644_v24 = vpop.permute.xlu0 %2643 }
 0x4b5   :  { %v2616_v43 = vmax.f32 %v3263_v62, 0.0  ;;  %v2928_v18 = vmax.f32 %v3271_v40, 0.0  ;;  %v2646_v29 = vmul.f32 %v2629_v25, %v2614_v0  ;;  %v2958_v56 = vmul.f32 %v2941_v22, %v2926_v52 }
 0x4b6   :  { %v2617_v63 = vmax.f32 %v3264_v30, 0.0  ;;  %v2929_v50 = vmax.f32 %v3272_v17, 0.0  ;;  %v2647_v11 = vmul.f32 %v2629_v25, %v2615_v60  ;;  %v2959_v19 = vmul.f32 %v2941_v22, %v2927_v45 }
 0x4b7   :  { %v2648_v7 = vmul.f32 %v2634_v47, %v2616_v43  ;;  %v2960_v21 = vmul.f32 %v2946_v13, %v2928_v18 }
 0x4b8   :  { %v2649_v26 = vmul.f32 %v2634_v47, %v2617_v63  ;;  %v2961_v3 = vmul.f32 %v2946_v13, %v2929_v50  ;;  %v2605_v53 = vpop.f32.mrb[4].mxu0  ;;  %v2917_v44 = vpop.f32.mrb[4].mxu1 }
 0x4b9   :  { %v2654_v38 = vadd.f32 %v2648_v7, %v2646_v29  ;;  %v2966_v31 = vadd.f32 %v2960_v21, %v2958_v56  ;;  %v3265_v57 = vadd.f32 %v2605_v53, %v2464_v1  ;;  %v3273_v51 = vadd.f32 %v2917_v44, %v2777_v8  ;;  %v2607_v42 = vpop.f32.mrb[5].mxu0  ;;  %v2919_v27 = vpop.f32.mrb[5].mxu1 }
 0x4ba   :  { %v2663_v58 = vadd.f32 %v2649_v26, %v2647_v11  ;;  %v2975_v15 = vadd.f32 %v2961_v3, %v2959_v19  ;;  %v3266_v23 = vadd.f32 %v2607_v42, %v2464_v1  ;;  %v3274_v12 = vadd.f32 %v2919_v27, %v2777_v8  ;;  %v2609_v54 = vpop.f32.mrb[6].mxu0  ;;  %v2921_v28 = vpop.f32.mrb[6].mxu1 }
 0x4bb   :  { %v2618_v55 = vmax.f32 %v3265_v57, 0.0  ;;  %v2930_v39 = vmax.f32 %v3273_v51, 0.0  ;;  %v3267_v10 = vadd.f32 %v2609_v54, %v2469_v49  ;;  %v3275_v2 = vadd.f32 %v2921_v28, %v2782_v33  ;;  %v2611_v35 = vpop.f32.mrb[7].mxu0  ;;  %v2923_v5 = vpop.f32.mrb[7].mxu1  ;;  %v5058_v57 = vld [vmem:[#allocation11_spill] sm:$0xff] }
 0x4bc   :  { %v2619_v48 = vmax.f32 %v3266_v23, 0.0  ;;  %v2931_v59 = vmax.f32 %v3274_v12, 0.0  ;;  %v3268_v25 = vadd.f32 %v2611_v35, %v2469_v49  ;;  %v3276_v47 = vadd.f32 %v2923_v5, %v2782_v33  ;;  %v2988_v11 = vpop.permute.xlu1 %2987  ;;  %v2676_v19 = vpop.permute.xlu0 %2675 }
 0x4bd   :  { %v2650_v13 = vmul.f32 %v2639_v32, %v2618_v55  ;;  %v2962_v22 = vmul.f32 %v2951_v6, %v2930_v39  ;;  %v2620_v14 = vmax.f32 %v3267_v10, 0.0  ;;  %v2932_v61 = vmax.f32 %v3275_v2, 0.0 }
 0x4be   :  { %v2651_v1 = vmul.f32 %v2639_v32, %v2619_v48  ;;  %v2963_v8 = vmul.f32 %v2951_v6, %v2931_v59  ;;  %v2621_v36 = vmax.f32 %v3268_v25, 0.0  ;;  %v2933_v41 = vmax.f32 %v3276_v47, 0.0 }
 0x4bf   :  { %v2655_v16 = vadd.f32 %v2654_v38, %v2650_v13  ;;  %v2967_v34 = vadd.f32 %v2966_v31, %v2962_v22  ;;  %v2652_v37 = vmul.f32 %v2644_v24, %v2620_v14  ;;  %v2964_v46 = vmul.f32 %v2956_v9, %v2932_v61 }
 0x4c0   :  { %v2664_v0 = vadd.f32 %v2663_v58, %v2651_v1  ;;  %v2976_v52 = vadd.f32 %v2975_v15, %v2963_v8  ;;  %v2653_v62 = vmul.f32 %v2644_v24, %v2621_v36  ;;  %v2965_v40 = vmul.f32 %v2956_v9, %v2933_v41  ;;  %v5059_v36 = vld [vmem:[#allocation10_spill] sm:$0xff] }
 0x4c1   :  { %v2656_v49 = vadd.f32 %v2655_v16, %v2652_v37  ;;  %v2968_v33 = vadd.f32 %v2967_v34, %v2964_v46  ;;  %v2993_v51 = vrot.slane %v2988_v11, %v5058_v57  ;;  %v2681_v42 = vrot.slane %v2676_v19, %v5058_v57 }
 0x4c2   :  { %v2665_v4 = vadd.f32 %v2664_v0, %v2653_v62  ;;  %v2977_v20 = vadd.f32 %v2976_v52, %v2965_v40  ;;  %v5060_v34 = vlaneseq }
 0x4c3   :  { %v2657_v60 = vrot.slane %v2656_v49, 4  ;;  %v2969_v45 = vrot.slane %v2968_v33, 4 }
 0x4c4   :  { %v2666_v30 = vrot.slane %v2665_v4, 4  ;;  %v2978_v17 = vrot.slane %v2977_v20, 4  ;;  %vm2712_vm0 = vcmp.lt.s32.totalorder %v5060_v34, 256 }
 0x4c5   :  { %v2658_v43 = vadd.f32 %v2657_v60, %v2656_v49  ;;  %v2970_v18 = vadd.f32 %v2969_v45, %v2968_v33 }
 0x4c6   :  { %v2667_v63 = vadd.f32 %v2666_v30, %v2665_v4  ;;  %v2979_v50 = vadd.f32 %v2978_v17, %v2977_v20 }
 0x4c7   :  { %v2659_v6 = vrot.slane %v2658_v43, 2  ;;  %v2971_v32 = vrot.slane %v2970_v18, 2 }
 0x4c8   :  { %v2668_v29 = vrot.slane %v2667_v63, 2  ;;  %v2980_v56 = vrot.slane %v2979_v50, 2 }
 0x4c9   :  { %v2660_v7 = vadd.f32 %v2659_v6, %v2658_v43  ;;  %v2972_v21 = vadd.f32 %v2971_v32, %v2970_v18 }
 0x4ca   :  { %v2669_v26 = vadd.f32 %v2668_v29, %v2667_v63  ;;  %v2981_v3 = vadd.f32 %v2980_v56, %v2979_v50 }
 0x4cb   :  { %v2661_v53 = vrot.slane %v2660_v7, 1  ;;  %v2973_v44 = vrot.slane %v2972_v21, 1 }
 0x4cc   :  { %v2670_v38 = vrot.slane %v2669_v26, 1  ;;  %v2982_v31 = vrot.slane %v2981_v3, 1 }
 0x4cd   :  { %v2662_v27 = vadd.f32 %v2661_v53, %v2660_v7  ;;  %v2974_v58 = vadd.f32 %v2973_v44, %v2972_v21 }
 0x4ce   :  { %v2671_v15 = vadd.f32 %v2670_v38, %v2669_v26  ;;  %v2983_v23 = vadd.f32 %v2982_v31, %v2981_v3 }
 0x4cf   :  { %v2682_v12 = vadd.f32 %v2681_v42, %v2662_v27  ;;  %v2994_v54 = vadd.f32 %v2993_v51, %v2974_v58 }
 0x4d0   :  { %v2683_v28 = vadd.f32 %v2681_v42, %v2671_v15  ;;  %v2995_v55 = vadd.f32 %v2993_v51, %v2983_v23 }
 0x4d1   :  { %v2684_v39 = vmul.f32 0.5, %v2682_v12  ;;  %v2996_v10 = vmul.f32 0.5, %v2994_v54 }
 0x4d2   :  { %v2685_v2 = vmul.f32 0.5, %v2683_v28  ;;  %v2997_v35 = vmul.f32 0.5, %v2995_v55 }
 0x4d3   :  { %3540 = vtanh.f32 %v2684_v39 }
 0x4d4   :  { %3542 = vtanh.f32 %v2685_v2 }
 0x4d5   :  { %3544 = vtanh.f32 %v2996_v10 }
 0x4d6   :  { %3546 = vtanh.f32 %v2997_v35 }
 0x4dd   :  { %v3541_v5 = vpop.eup %3540 }
 0x4de   :  { %v3543_v48 = vpop.eup %3542  ;;  %v2688_v59 = vmul.f32 0.5, %v3541_v5 }
 0x4df   :  { %v3545_v25 = vpop.eup %3544  ;;  %v2689_v47 = vmul.f32 0.5, %v3543_v48 }
 0x4e0   :  { %v3547_v13 = vpop.eup %3546  ;;  %v2690_v22 = vadd.f32 0.5, %v2688_v59  ;;  %v3000_v14 = vmul.f32 0.5, %v3545_v25 }
 0x4e1   :  { %v2691_v61 = vadd.f32 0.5, %v2689_v47  ;;  %v3001_v9 = vmul.f32 0.5, %v3547_v13 }
 0x4e2   :  { %v3002_v24 = vadd.f32 0.5, %v3000_v14 }
 0x4e3   :  { %v2694_v1 = vcombine.low %v2690_v22, %v2691_v61  ;;  %v3003_v8 = vadd.f32 0.5, %v3001_v9 }
 0x4e5   :  { %v2701_v41 = vrot.slane %v2694_v1, %v5059_v36  ;;  %v3006_v16 = vcombine.low %v3002_v24, %v3003_v8 }
 0x4e7   :  { %v2708_v37 = vrot.slane %v2701_v41, %v5059_v36  ;;  %v3013_v46 = vrot.slane %v3006_v16, %v5059_v36 }
 0x4e9   :  { %2714 = vst.msk [vmem:[#allocation6] ss:$2 sm:$0x3] %vm2712_vm0, %v2708_v37  ;;  %v3020_v0 = vrot.slane %v3013_v46, %v5059_v36 }
 0x4eb   :  { %3023 = vst.msk [vmem:[#allocation6 + $0x1] ss:$2 sm:$0x3] %vm2712_vm0, %v3020_v0 }
 0x4ec   :  { %3559 = shalt.err (!%p3556_p5)
}
 0x4ed   :  { %s3560_s10 = scalar_lea.hbm %s4993_s8, 64 }
 0x4ee   :  { %p3561_p6 = scmp.ne.s32.totalorder %s4993_s8, %s3560_s10  ;;  %p3564_p7 = scmp.lt.u32.totalorder %s3560_s10, %s4993_s8 }
 0x4f0   :  { %p3566_p8 = pnand %p3564_p7, %p3561_p6 }
 0x4f2   :  { %3569 = shalt.err (!%p3566_p8)
}
 0x4f3   :  { %3033 = dma.vmem_to_hbm [thread:$0]  %s3031_s7, 64, %s4993_s8, [#allocation7]  }
 0x4f4   :  { %3574 = dma.done.wait [#allocation7], 64  }
 0x4f5   :  { %3575 = vsyncadd [#allocation7], 4294967232 }
 0x4f6   :  { %3037 = vsyncpa [#allocation7], 1 }

</bundles_post_ra>
